<compile_context>
chip_gen: v6e
topology: v6e:2x2x1
jax: 0.10.0
libtpu: 0.0.40
codegen_flags: <defaults>
</compile_context>

<pallas_src>
import functools

import jax
import jax.numpy as jnp
from jax.experimental import pallas as pl
from jax.experimental.pallas import tpu as pltpu


_VMEM_LIMIT_BYTES = 48 * 1024 * 1024   # headroom below v7x's 64 MiB physical VMEM


def _pick_tile(n, target):
    """Largest tile <= target that divides n (falls back to n itself)."""
    for t in (target, 512, 256, 128, 64, 32, 16, 8):
        if t <= target and n % t == 0:
            return t
    return n


def _apply_act(x, act):
    if act == "relu":
        return jnp.maximum(x, 0.0)
    if act == "tanh01":                      # final head: (tanh(x) + 1) / 2
        return (jnp.tanh(x) + 1.0) * 0.5
    return x


# ----------------------------------------------------------------------------
# Fused Pallas kernel: (patches @ W) + bias -> activation (-> + residual).
# patches block: (1, tm, K) bf16, weights (K, Cout) bf16 (VMEM-resident),
# bias (1, Cout) f32, accumulation + epilogue in f32.
# ----------------------------------------------------------------------------
def _conv_matmul_kernel(*refs, act, has_residual):
    if has_residual:
        x_ref, w_ref, b_ref, r_ref, o_ref = refs
    else:
        x_ref, w_ref, b_ref, o_ref = refs
        r_ref = None
    acc = jnp.dot(x_ref[0], w_ref[...], preferred_element_type=jnp.float32)
    acc = acc + b_ref[...]                                 # f32 bias
    acc = _apply_act(acc, act)
    if has_residual:
        acc = acc + r_ref[0].astype(jnp.float32)           # fused residual add
    o_ref[0] = acc.astype(o_ref.dtype)


def _fused_conv_matmul(patches, wflat, b, residual, *, act, out_dtype, tile_m):
    N, M, K = patches.shape
    Cout = wflat.shape[-1]
    tm = _pick_tile(M, tile_m)
    grid = (N, M // tm)

    in_specs = [
        pl.BlockSpec((1, tm, K), lambda n, m: (n, m, 0)),      # patch tile
        pl.BlockSpec((K, Cout), lambda n, m: (0, 0)),          # weights resident
        pl.BlockSpec((1, Cout), lambda n, m: (0, 0)),          # f32 bias resident
    ]
    args = [patches, wflat, b]
    has_res = residual is not None
    if has_res:
        in_specs.append(pl.BlockSpec((1, tm, Cout), lambda n, m: (n, m, 0)))
        args.append(residual)

    kernel = functools.partial(_conv_matmul_kernel, act=act, has_residual=has_res)

    flops = 2 * N * M * K * Cout
    trans = N * M * Cout if act == "tanh01" else 0
    out_bytes = N * M * Cout * jnp.dtype(out_dtype).itemsize
    bytes_acc = (patches.size * patches.dtype.itemsize
                 + wflat.size * wflat.dtype.itemsize
                 + b.size * b.dtype.itemsize + out_bytes
                 + (residual.size * residual.dtype.itemsize if has_res else 0))

    return pl.pallas_call(
        kernel,
        out_shape=jax.ShapeDtypeStruct((N, M, Cout), out_dtype),
        grid=grid,
        in_specs=in_specs,
        out_specs=pl.BlockSpec((1, tm, Cout), lambda n, m: (n, m, 0)),
        compiler_params=pltpu.CompilerParams(
            dimension_semantics=("parallel", "parallel"),
            vmem_limit_bytes=_VMEM_LIMIT_BYTES),
        cost_estimate=pl.CostEstimate(flops=flops, transcendentals=trans,
                                      bytes_accessed=bytes_acc),
    )(*args)


# ----------------------------------------------------------------------------
# 3x3 conv dispatcher.  Padding / patch building is cheap XLA glue; the whole
# matmul + bias + activation (+ residual) runs inside the Pallas kernel.
# ----------------------------------------------------------------------------
def conv3x3(x, w, b, *, act="none", stride=1, residual=None,
            padding_mode="zeros", out_dtype=jnp.bfloat16, tile_m=512):
    """3x3 conv, pad=1.  x: (N,H,W,Cin) bf16.  w: (9,Cin,Cout) bf16.  b: (1,Cout) f32."""
    assert residual is None or stride == 1
    N, H, W, Cin = x.shape
    Cout = w.shape[-1]
    mode = "reflect" if padding_mode == "reflect" else "constant"
    xpad = jnp.pad(x, ((0, 0), (1, 1), (1, 1), (0, 0)), mode=mode)

    Ho = (H - 1) // stride + 1
    Wo = (W - 1) // stride + 1
    # Patches are built only at the strided output positions, so the stride-2
    # downsample convs do no wasted MXU work.
    # TODO(synk): for large resolutions, switch to a manual halo-DMA direct
    #             conv to avoid materializing the 9x patch tensor in HBM.
    patches = jnp.concatenate(
        [xpad[:, dy:dy + H:stride, dx:dx + W:stride, :]
         for dy in range(3) for dx in range(3)], axis=-1)
    patches = patches.reshape(N, Ho * Wo, 9 * Cin)
    wflat = w.reshape(9 * Cin, Cout)
    res = None if residual is None else residual.reshape(N, Ho * Wo, Cout)

    out = _fused_conv_matmul(patches, wflat, b, res, act=act,
                             out_dtype=out_dtype, tile_m=tile_m)
    return out.reshape(N, Ho, Wo, Cout)


def upsample2x_nearest(x):
    # TODO(synk): fuse the nearest-neighbour upsample into the following conv's
    #             patch construction instead of materializing the 4x tensor.
    return jnp.repeat(jnp.repeat(x, 2, axis=1), 2, axis=2)


# ----------------------------------------------------------------------------
# Parameters (matches init_weights(init_type='normal', gain=0.02): zero biases)
# ----------------------------------------------------------------------------
def init_params(key, c=8, latent_blocks=2):
    params = {}

    def add(name, cin, cout):
        nonlocal key
        key, k = jax.random.split(key)
        w = jax.random.normal(k, (9, cin, cout), jnp.float32) * 0.02
        params[name] = (w.astype(jnp.bfloat16), jnp.zeros((1, cout), jnp.float32))

    add("input_conv", 3, c)                     # ConvReLU(3, c, 3, 1, 1)
    add("S1_en", c, c)                          # PlainEncoder(c)
    add("S2_en", 2 * c, 2 * c)
    add("S3_en", 4 * c, 4 * c)
    add("down1", c, 2 * c)                      # Downsample(c): stride 2, c -> 2c
    add("down2", 2 * c, 4 * c)
    add("down3", 4 * c, 8 * c)
    for bidx in range(latent_blocks):           # latent PlainEncoder(8c) blocks
        add(f"latent{bidx}", 8 * c, 8 * c)
    add("latent_out", 8 * c, 8 * c)             # latent_out_layer = PlainEncoder(8c)
    add("up3", 8 * c, 4 * c)                    # Upsample(8c): 2x + conv 8c -> 4c
    add("up2", 4 * c, 2 * c)
    add("up1", 2 * c, c)
    add("S3_de", 8 * c, 4 * c)                  # PlainDecoder(4c): concat(4c,4c) -> 4c
    add("S2_de", 4 * c, 2 * c)
    add("S1_de", 2 * c, c)
    add("S1_out", c, 3)                         # Conv2d(c, 3, 3, 1, 1, reflect)
    # TODO(synk): KernelConv is constructed in __init__ but never used in
    #             forward(), so it is omitted.
    return params


# ----------------------------------------------------------------------------
# Baseline1Net forward
# ----------------------------------------------------------------------------
def baseline1net_forward(params, x_rgb, hsv_holder=None, lab_holder=None,
                         *, latent_blocks=2):
    """Matches Baseline1Net.forward: only x_rgb is used; the holders are ignored."""
    del hsv_holder, lab_holder
    x = jnp.transpose(x_rgb, (0, 2, 3, 1)).astype(jnp.bfloat16)   # NCHW -> NHWC

    def conv(name, x, **kw):
        w, b = params[name]
        return conv3x3(x, w, b, **kw)

    def plain_encoder(name, x):
        # TODO(synk): PlainEncoder's real definition was not provided; modeled
        #             as y = relu(conv3x3(x)) + x with the residual fused in-kernel.
        return conv(name, x, act="relu", residual=x)

    s1 = conv("input_conv", x, act="relu")              # 3 -> c
    s1 = plain_encoder("S1_en", s1)
    s2 = conv("down1", s1, act="relu", stride=2)        # c -> 2c, /2
    s2 = plain_encoder("S2_en", s2)
    s3 = conv("down2", s2, act="relu", stride=2)        # 2c -> 4c, /2
    s3 = plain_encoder("S3_en", s3)
    s4 = conv("down3", s3, act="relu", stride=2)        # 4c -> 8c, /2
    for bidx in range(latent_blocks):
        s4 = plain_encoder(f"latent{bidx}", s4)
    s4 = plain_encoder("latent_out", s4)

    def up(name, x):
        # TODO(synk): Upsample's real definition was not provided; modeled as
        #             nearest 2x upsample + conv3x3 (ch -> ch//2) + ReLU.
        return conv(name, upsample2x_nearest(x), act="relu")

    def decoder(name, agg, skip):
        # TODO(synk): PlainDecoder modeled as relu(conv3x3(concat(agg, skip))).
        return conv(name, jnp.concatenate([agg, skip], axis=-1), act="relu")

    a3 = decoder("S3_de", up("up3", s4), s3)
    a2 = decoder("S2_de", up("up2", a3), s2)
    a1 = decoder("S1_de", up("up1", a2), s1)

    # S1_out: Conv2d(c, 3, 3, 1, 1, padding_mode='reflect'); out = (tanh + 1) / 2
    out = conv("S1_out", a1, act="tanh01", padding_mode="reflect",
               out_dtype=jnp.float32)
    return jnp.transpose(out, (0, 3, 1, 2))             # back to NCHW


# ----------------------------------------------------------------------------
if __name__ == "__main__":
    C = 8            # base channel count (module default is 32; kept small)
    LATENT = 2
    N, H, W = 2, 16, 16

    key = jax.random.PRNGKey(0)
    kp, kx, kh, kl = jax.random.split(key, 4)
    params = init_params(kp, c=C, latent_blocks=LATENT)

    x_rgb = jax.random.uniform(kx, (N, 3, H, W), jnp.float32)
    hsv_holder = jax.random.uniform(kh, (N, 3, H, W), jnp.float32)
    lab_holder = jax.random.uniform(kl, (N, 3, H, W), jnp.float32)

    fwd = jax.jit(functools.partial(baseline1net_forward, latent_blocks=LATENT))
    out = jax.block_until_ready(fwd(params, x_rgb, hsv_holder, lab_holder))

    assert out.shape == (N, 3, H, W), out.shape
    assert bool(jnp.all(jnp.isfinite(out)))
    assert bool(jnp.all(out >= 0.0)) and bool(jnp.all(out <= 1.0))
    print("KERNEL_OK")
</pallas_src>

<mosaic_0001>
module attributes {stable_mosaic.version = 11 : i64} {
  func.func @_conv_matmul_kernel(%arg0: i32, %arg1: i32, %arg2: memref<1x256x27xbf16, #tpu.memory_space<vmem>>, %arg3: memref<27x8xbf16, #tpu.memory_space<vmem>>, %arg4: memref<1x8xf32, #tpu.memory_space<vmem>>, %arg5: memref<1x256x8xbf16, #tpu.memory_space<vmem>>) attributes {dimension_semantics = [#tpu.dimension_semantics<parallel>, #tpu.dimension_semantics<parallel>], iteration_bounds = array<i64: 2, 1>, scalar_prefetch = 0 : i64, scratch_operands = 0 : i64, tpu.core_type = #tpu.core_type<tc>, window_params = [{transform_indices = @transform_0, window_bounds = array<i64: 1, 256, 27>}, {pipeline_mode = #tpu.pipeline_mode<synchronous>, transform_indices = @transform_1, window_bounds = array<i64: 27, 8>}, {pipeline_mode = #tpu.pipeline_mode<synchronous>, transform_indices = @transform_2, window_bounds = array<i64: 1, 8>}, {transform_indices = @transform_3, window_bounds = array<i64: 1, 256, 8>}]} {
    %c0 = arith.constant 0 : index
    %c0_0 = arith.constant 0 : index
    %c0_1 = arith.constant 0 : index
    %0 = vector.load %arg2[%c0, %c0_0, %c0_1] : memref<1x256x27xbf16, #tpu.memory_space<vmem>>, vector<1x256x27xbf16>
    %1 = vector.shape_cast %0 : vector<1x256x27xbf16> to vector<256x27xbf16>
    %c0_2 = arith.constant 0 : index
    %c0_3 = arith.constant 0 : index
    %2 = vector.load %arg3[%c0_2, %c0_3] : memref<27x8xbf16, #tpu.memory_space<vmem>>, vector<27x8xbf16>
    %cst = arith.constant dense<0.000000e+00> : vector<256x8xf32>
    %3 = tpu.matmul %1, %2, %cst {dimension_numbers = #tpu.dot_dimension_numbers<[1], [0], [0], [1], [0, 0, 1, 1], [], []>} : vector<256x27xbf16>, vector<27x8xbf16>, vector<256x8xf32> -> vector<256x8xf32>
    %c0_4 = arith.constant 0 : index
    %c0_5 = arith.constant 0 : index
    %4 = vector.load %arg4[%c0_4, %c0_5] : memref<1x8xf32, #tpu.memory_space<vmem>>, vector<1x8xf32>
    %5 = vector.broadcast %4 : vector<1x8xf32> to vector<256x8xf32>
    %6 = arith.addf %3, %5 : vector<256x8xf32>
    %cst_6 = arith.constant 0.000000e+00 : f32
    %7 = vector.broadcast %cst_6 : f32 to vector<256x8xf32>
    %8 = arith.maximumf %6, %7 : vector<256x8xf32>
    %9 = arith.truncf %8 : vector<256x8xf32> to vector<256x8xbf16>
    %c0_7 = arith.constant 0 : index
    %c0_8 = arith.constant 0 : index
    %c0_9 = arith.constant 0 : index
    %10 = vector.load %arg5[%c0_7, %c0_8, %c0_9] : memref<1x256x8xbf16, #tpu.memory_space<vmem>>, vector<1x256x8xbf16>
    %11 = vector.shape_cast %10 : vector<1x256x8xbf16> to vector<256x8xbf16>
    %12 = vector.shape_cast %9 : vector<256x8xbf16> to vector<1x256x8xbf16>
    tpu.vector_store %arg5[%c0_7, %c0_8, %c0_9], %12 {strides = array<i32>} : memref<1x256x8xbf16, #tpu.memory_space<vmem>>, vector<1x256x8xbf16>,
    return
  }
  func.func @transform_0(%arg0: i32, %arg1: i32) -> (i32, i32, i32) {
    %c0_i32 = arith.constant 0 : i32
    %c0_i32_0 = arith.constant 0 : i32
    return %arg0, %arg1, %c0_i32 : i32, i32, i32
  }
  func.func @transform_1(%arg0: i32, %arg1: i32) -> (i32, i32) {
    %c0_i32 = arith.constant 0 : i32
    %c0_i32_0 = arith.constant 0 : i32
    %c0_i32_1 = arith.constant 0 : i32
    return %c0_i32, %c0_i32_0 : i32, i32
  }
  func.func @transform_2(%arg0: i32, %arg1: i32) -> (i32, i32) {
    %c0_i32 = arith.constant 0 : i32
    %c0_i32_0 = arith.constant 0 : i32
    %c0_i32_1 = arith.constant 0 : i32
    return %c0_i32, %c0_i32_0 : i32, i32
  }
  func.func @transform_3(%arg0: i32, %arg1: i32) -> (i32, i32, i32) {
    %c0_i32 = arith.constant 0 : i32
    %c0_i32_0 = arith.constant 0 : i32
    return %arg0, %arg1, %c0_i32 : i32, i32, i32
  }
}

module attributes {stable_mosaic.version = 11 : i64} {
  func.func @_conv_matmul_kernel(%arg0: i32, %arg1: i32, %arg2: memref<1x256x72xbf16, #tpu.memory_space<vmem>>, %arg3: memref<72x8xbf16, #tpu.memory_space<vmem>>, %arg4: memref<1x8xf32, #tpu.memory_space<vmem>>, %arg5: memref<1x256x8xbf16, #tpu.memory_space<vmem>>, %arg6: memref<1x256x8xbf16, #tpu.memory_space<vmem>>) attributes {dimension_semantics = [#tpu.dimension_semantics<parallel>, #tpu.dimension_semantics<parallel>], iteration_bounds = array<i64: 2, 1>, scalar_prefetch = 0 : i64, scratch_operands = 0 : i64, tpu.core_type = #tpu.core_type<tc>, window_params = [{transform_indices = @transform_0, window_bounds = array<i64: 1, 256, 72>}, {pipeline_mode = #tpu.pipeline_mode<synchronous>, transform_indices = @transform_1, window_bounds = array<i64: 72, 8>}, {pipeline_mode = #tpu.pipeline_mode<synchronous>, transform_indices = @transform_2, window_bounds = array<i64: 1, 8>}, {transform_indices = @transform_3, window_bounds = array<i64: 1, 256, 8>}, {transform_indices = @transform_4, window_bounds = array<i64: 1, 256, 8>}]} {
    %c0 = arith.constant 0 : index
    %c0_0 = arith.constant 0 : index
    %c0_1 = arith.constant 0 : index
    %0 = vector.load %arg2[%c0, %c0_0, %c0_1] : memref<1x256x72xbf16, #tpu.memory_space<vmem>>, vector<1x256x72xbf16>
    %1 = vector.shape_cast %0 : vector<1x256x72xbf16> to vector<256x72xbf16>
    %c0_2 = arith.constant 0 : index
    %c0_3 = arith.constant 0 : index
    %2 = vector.load %arg3[%c0_2, %c0_3] : memref<72x8xbf16, #tpu.memory_space<vmem>>, vector<72x8xbf16>
    %cst = arith.constant dense<0.000000e+00> : vector<256x8xf32>
    %3 = tpu.matmul %1, %2, %cst {dimension_numbers = #tpu.dot_dimension_numbers<[1], [0], [0], [1], [0, 0, 1, 1], [], []>} : vector<256x72xbf16>, vector<72x8xbf16>, vector<256x8xf32> -> vector<256x8xf32>
    %c0_4 = arith.constant 0 : index
    %c0_5 = arith.constant 0 : index
    %4 = vector.load %arg4[%c0_4, %c0_5] : memref<1x8xf32, #tpu.memory_space<vmem>>, vector<1x8xf32>
    %5 = vector.broadcast %4 : vector<1x8xf32> to vector<256x8xf32>
    %6 = arith.addf %3, %5 : vector<256x8xf32>
    %cst_6 = arith.constant 0.000000e+00 : f32
    %7 = vector.broadcast %cst_6 : f32 to vector<256x8xf32>
    %8 = arith.maximumf %6, %7 : vector<256x8xf32>
    %c0_7 = arith.constant 0 : index
    %c0_8 = arith.constant 0 : index
    %c0_9 = arith.constant 0 : index
    %9 = vector.load %arg5[%c0_7, %c0_8, %c0_9] : memref<1x256x8xbf16, #tpu.memory_space<vmem>>, vector<1x256x8xbf16>
    %10 = vector.shape_cast %9 : vector<1x256x8xbf16> to vector<256x8xbf16>
    %11 = arith.extf %10 : vector<256x8xbf16> to vector<256x8xf32>
    %12 = arith.addf %8, %11 : vector<256x8xf32>
    %13 = arith.truncf %12 : vector<256x8xf32> to vector<256x8xbf16>
    %c0_10 = arith.constant 0 : index
    %c0_11 = arith.constant 0 : index
    %c0_12 = arith.constant 0 : index
    %14 = vector.load %arg6[%c0_10, %c0_11, %c0_12] : memref<1x256x8xbf16, #tpu.memory_space<vmem>>, vector<1x256x8xbf16>
    %15 = vector.shape_cast %14 : vector<1x256x8xbf16> to vector<256x8xbf16>
    %16 = vector.shape_cast %13 : vector<256x8xbf16> to vector<1x256x8xbf16>
    tpu.vector_store %arg6[%c0_10, %c0_11, %c0_12], %16 {strides = array<i32>} : memref<1x256x8xbf16, #tpu.memory_space<vmem>>, vector<1x256x8xbf16>,
    return
  }
  func.func @transform_0(%arg0: i32, %arg1: i32) -> (i32, i32, i32) {
    %c0_i32 = arith.constant 0 : i32
    %c0_i32_0 = arith.constant 0 : i32
    return %arg0, %arg1, %c0_i32 : i32, i32, i32
  }
  func.func @transform_1(%arg0: i32, %arg1: i32) -> (i32, i32) {
    %c0_i32 = arith.constant 0 : i32
    %c0_i32_0 = arith.constant 0 : i32
    %c0_i32_1 = arith.constant 0 : i32
    return %c0_i32, %c0_i32_0 : i32, i32
  }
  func.func @transform_2(%arg0: i32, %arg1: i32) -> (i32, i32) {
    %c0_i32 = arith.constant 0 : i32
    %c0_i32_0 = arith.constant 0 : i32
    %c0_i32_1 = arith.constant 0 : i32
    return %c0_i32, %c0_i32_0 : i32, i32
  }
  func.func @transform_3(%arg0: i32, %arg1: i32) -> (i32, i32, i32) {
    %c0_i32 = arith.constant 0 : i32
    %c0_i32_0 = arith.constant 0 : i32
    return %arg0, %arg1, %c0_i32 : i32, i32, i32
  }
  func.func @transform_4(%arg0: i32, %arg1: i32) -> (i32, i32, i32) {
    %c0_i32 = arith.constant 0 : i32
    %c0_i32_0 = arith.constant 0 : i32
    return %arg0, %arg1, %c0_i32 : i32, i32, i32
  }
}

module attributes {stable_mosaic.version = 11 : i64} {
  func.func @_conv_matmul_kernel(%arg0: i32, %arg1: i32, %arg2: memref<1x64x72xbf16, #tpu.memory_space<vmem>>, %arg3: memref<72x16xbf16, #tpu.memory_space<vmem>>, %arg4: memref<1x16xf32, #tpu.memory_space<vmem>>, %arg5: memref<1x64x16xbf16, #tpu.memory_space<vmem>>) attributes {dimension_semantics = [#tpu.dimension_semantics<parallel>, #tpu.dimension_semantics<parallel>], iteration_bounds = array<i64: 2, 1>, scalar_prefetch = 0 : i64, scratch_operands = 0 : i64, tpu.core_type = #tpu.core_type<tc>, window_params = [{transform_indices = @transform_0, window_bounds = array<i64: 1, 64, 72>}, {pipeline_mode = #tpu.pipeline_mode<synchronous>, transform_indices = @transform_1, window_bounds = array<i64: 72, 16>}, {pipeline_mode = #tpu.pipeline_mode<synchronous>, transform_indices = @transform_2, window_bounds = array<i64: 1, 16>}, {transform_indices = @transform_3, window_bounds = array<i64: 1, 64, 16>}]} {
    %c0 = arith.constant 0 : index
    %c0_0 = arith.constant 0 : index
    %c0_1 = arith.constant 0 : index
    %0 = vector.load %arg2[%c0, %c0_0, %c0_1] : memref<1x64x72xbf16, #tpu.memory_space<vmem>>, vector<1x64x72xbf16>
    %1 = vector.shape_cast %0 : vector<1x64x72xbf16> to vector<64x72xbf16>
    %c0_2 = arith.constant 0 : index
    %c0_3 = arith.constant 0 : index
    %2 = vector.load %arg3[%c0_2, %c0_3] : memref<72x16xbf16, #tpu.memory_space<vmem>>, vector<72x16xbf16>
    %cst = arith.constant dense<0.000000e+00> : vector<64x16xf32>
    %3 = tpu.matmul %1, %2, %cst {dimension_numbers = #tpu.dot_dimension_numbers<[1], [0], [0], [1], [0, 0, 1, 1], [], []>} : vector<64x72xbf16>, vector<72x16xbf16>, vector<64x16xf32> -> vector<64x16xf32>
    %c0_4 = arith.constant 0 : index
    %c0_5 = arith.constant 0 : index
    %4 = vector.load %arg4[%c0_4, %c0_5] : memref<1x16xf32, #tpu.memory_space<vmem>>, vector<1x16xf32>
    %5 = vector.broadcast %4 : vector<1x16xf32> to vector<64x16xf32>
    %6 = arith.addf %3, %5 : vector<64x16xf32>
    %cst_6 = arith.constant 0.000000e+00 : f32
    %7 = vector.broadcast %cst_6 : f32 to vector<64x16xf32>
    %8 = arith.maximumf %6, %7 : vector<64x16xf32>
    %9 = arith.truncf %8 : vector<64x16xf32> to vector<64x16xbf16>
    %c0_7 = arith.constant 0 : index
    %c0_8 = arith.constant 0 : index
    %c0_9 = arith.constant 0 : index
    %10 = vector.load %arg5[%c0_7, %c0_8, %c0_9] : memref<1x64x16xbf16, #tpu.memory_space<vmem>>, vector<1x64x16xbf16>
    %11 = vector.shape_cast %10 : vector<1x64x16xbf16> to vector<64x16xbf16>
    %12 = vector.shape_cast %9 : vector<64x16xbf16> to vector<1x64x16xbf16>
    tpu.vector_store %arg5[%c0_7, %c0_8, %c0_9], %12 {strides = array<i32>} : memref<1x64x16xbf16, #tpu.memory_space<vmem>>, vector<1x64x16xbf16>,
    return
  }
  func.func @transform_0(%arg0: i32, %arg1: i32) -> (i32, i32, i32) {
    %c0_i32 = arith.constant 0 : i32
    %c0_i32_0 = arith.constant 0 : i32
    return %arg0, %arg1, %c0_i32 : i32, i32, i32
  }
  func.func @transform_1(%arg0: i32, %arg1: i32) -> (i32, i32) {
    %c0_i32 = arith.constant 0 : i32
    %c0_i32_0 = arith.constant 0 : i32
    %c0_i32_1 = arith.constant 0 : i32
    return %c0_i32, %c0_i32_0 : i32, i32
  }
  func.func @transform_2(%arg0: i32, %arg1: i32) -> (i32, i32) {
    %c0_i32 = arith.constant 0 : i32
    %c0_i32_0 = arith.constant 0 : i32
    %c0_i32_1 = arith.constant 0 : i32
    return %c0_i32, %c0_i32_0 : i32, i32
  }
  func.func @transform_3(%arg0: i32, %arg1: i32) -> (i32, i32, i32) {
    %c0_i32 = arith.constant 0 : i32
    %c0_i32_0 = arith.constant 0 : i32
    return %arg0, %arg1, %c0_i32 : i32, i32, i32
  }
}

module attributes {stable_mosaic.version = 11 : i64} {
  func.func @_conv_matmul_kernel(%arg0: i32, %arg1: i32, %arg2: memref<1x64x144xbf16, #tpu.memory_space<vmem>>, %arg3: memref<144x16xbf16, #tpu.memory_space<vmem>>, %arg4: memref<1x16xf32, #tpu.memory_space<vmem>>, %arg5: memref<1x64x16xbf16, #tpu.memory_space<vmem>>, %arg6: memref<1x64x16xbf16, #tpu.memory_space<vmem>>) attributes {dimension_semantics = [#tpu.dimension_semantics<parallel>, #tpu.dimension_semantics<parallel>], iteration_bounds = array<i64: 2, 1>, scalar_prefetch = 0 : i64, scratch_operands = 0 : i64, tpu.core_type = #tpu.core_type<tc>, window_params = [{transform_indices = @transform_0, window_bounds = array<i64: 1, 64, 144>}, {pipeline_mode = #tpu.pipeline_mode<synchronous>, transform_indices = @transform_1, window_bounds = array<i64: 144, 16>}, {pipeline_mode = #tpu.pipeline_mode<synchronous>, transform_indices = @transform_2, window_bounds = array<i64: 1, 16>}, {transform_indices = @transform_3, window_bounds = array<i64: 1, 64, 16>}, {transform_indices = @transform_4, window_bounds = array<i64: 1, 64, 16>}]} {
    %c0 = arith.constant 0 : index
    %c0_0 = arith.constant 0 : index
    %c0_1 = arith.constant 0 : index
    %0 = vector.load %arg2[%c0, %c0_0, %c0_1] : memref<1x64x144xbf16, #tpu.memory_space<vmem>>, vector<1x64x144xbf16>
    %1 = vector.shape_cast %0 : vector<1x64x144xbf16> to vector<64x144xbf16>
    %c0_2 = arith.constant 0 : index
    %c0_3 = arith.constant 0 : index
    %2 = vector.load %arg3[%c0_2, %c0_3] : memref<144x16xbf16, #tpu.memory_space<vmem>>, vector<144x16xbf16>
    %cst = arith.constant dense<0.000000e+00> : vector<64x16xf32>
    %3 = tpu.matmul %1, %2, %cst {dimension_numbers = #tpu.dot_dimension_numbers<[1], [0], [0], [1], [0, 0, 1, 1], [], []>} : vector<64x144xbf16>, vector<144x16xbf16>, vector<64x16xf32> -> vector<64x16xf32>
    %c0_4 = arith.constant 0 : index
    %c0_5 = arith.constant 0 : index
    %4 = vector.load %arg4[%c0_4, %c0_5] : memref<1x16xf32, #tpu.memory_space<vmem>>, vector<1x16xf32>
    %5 = vector.broadcast %4 : vector<1x16xf32> to vector<64x16xf32>
    %6 = arith.addf %3, %5 : vector<64x16xf32>
    %cst_6 = arith.constant 0.000000e+00 : f32
    %7 = vector.broadcast %cst_6 : f32 to vector<64x16xf32>
    %8 = arith.maximumf %6, %7 : vector<64x16xf32>
    %c0_7 = arith.constant 0 : index
    %c0_8 = arith.constant 0 : index
    %c0_9 = arith.constant 0 : index
    %9 = vector.load %arg5[%c0_7, %c0_8, %c0_9] : memref<1x64x16xbf16, #tpu.memory_space<vmem>>, vector<1x64x16xbf16>
    %10 = vector.shape_cast %9 : vector<1x64x16xbf16> to vector<64x16xbf16>
    %11 = arith.extf %10 : vector<64x16xbf16> to vector<64x16xf32>
    %12 = arith.addf %8, %11 : vector<64x16xf32>
    %13 = arith.truncf %12 : vector<64x16xf32> to vector<64x16xbf16>
    %c0_10 = arith.constant 0 : index
    %c0_11 = arith.constant 0 : index
    %c0_12 = arith.constant 0 : index
    %14 = vector.load %arg6[%c0_10, %c0_11, %c0_12] : memref<1x64x16xbf16, #tpu.memory_space<vmem>>, vector<1x64x16xbf16>
    %15 = vector.shape_cast %14 : vector<1x64x16xbf16> to vector<64x16xbf16>
    %16 = vector.shape_cast %13 : vector<64x16xbf16> to vector<1x64x16xbf16>
    tpu.vector_store %arg6[%c0_10, %c0_11, %c0_12], %16 {strides = array<i32>} : memref<1x64x16xbf16, #tpu.memory_space<vmem>>, vector<1x64x16xbf16>,
    return
  }
  func.func @transform_0(%arg0: i32, %arg1: i32) -> (i32, i32, i32) {
    %c0_i32 = arith.constant 0 : i32
    %c0_i32_0 = arith.constant 0 : i32
    return %arg0, %arg1, %c0_i32 : i32, i32, i32
  }
  func.func @transform_1(%arg0: i32, %arg1: i32) -> (i32, i32) {
    %c0_i32 = arith.constant 0 : i32
    %c0_i32_0 = arith.constant 0 : i32
    %c0_i32_1 = arith.constant 0 : i32
    return %c0_i32, %c0_i32_0 : i32, i32
  }
  func.func @transform_2(%arg0: i32, %arg1: i32) -> (i32, i32) {
    %c0_i32 = arith.constant 0 : i32
    %c0_i32_0 = arith.constant 0 : i32
    %c0_i32_1 = arith.constant 0 : i32
    return %c0_i32, %c0_i32_0 : i32, i32
  }
  func.func @transform_3(%arg0: i32, %arg1: i32) -> (i32, i32, i32) {
    %c0_i32 = arith.constant 0 : i32
    %c0_i32_0 = arith.constant 0 : i32
    return %arg0, %arg1, %c0_i32 : i32, i32, i32
  }
  func.func @transform_4(%arg0: i32, %arg1: i32) -> (i32, i32, i32) {
    %c0_i32 = arith.constant 0 : i32
    %c0_i32_0 = arith.constant 0 : i32
    return %arg0, %arg1, %c0_i32 : i32, i32, i32
  }
}

module attributes {stable_mosaic.version = 11 : i64} {
  func.func @_conv_matmul_kernel(%arg0: i32, %arg1: i32, %arg2: memref<1x16x144xbf16, #tpu.memory_space<vmem>>, %arg3: memref<144x32xbf16, #tpu.memory_space<vmem>>, %arg4: memref<1x32xf32, #tpu.memory_space<vmem>>, %arg5: memref<1x16x32xbf16, #tpu.memory_space<vmem>>) attributes {dimension_semantics = [#tpu.dimension_semantics<parallel>, #tpu.dimension_semantics<parallel>], iteration_bounds = array<i64: 2, 1>, scalar_prefetch = 0 : i64, scratch_operands = 0 : i64, tpu.core_type = #tpu.core_type<tc>, window_params = [{transform_indices = @transform_0, window_bounds = array<i64: 1, 16, 144>}, {pipeline_mode = #tpu.pipeline_mode<synchronous>, transform_indices = @transform_1, window_bounds = array<i64: 144, 32>}, {pipeline_mode = #tpu.pipeline_mode<synchronous>, transform_indices = @transform_2, window_bounds = array<i64: 1, 32>}, {transform_indices = @transform_3, window_bounds = array<i64: 1, 16, 32>}]} {
    %c0 = arith.constant 0 : index
    %c0_0 = arith.constant 0 : index
    %c0_1 = arith.constant 0 : index
    %0 = vector.load %arg2[%c0, %c0_0, %c0_1] : memref<1x16x144xbf16, #tpu.memory_space<vmem>>, vector<1x16x144xbf16>
    %1 = vector.shape_cast %0 : vector<1x16x144xbf16> to vector<16x144xbf16>
    %c0_2 = arith.constant 0 : index
    %c0_3 = arith.constant 0 : index
    %2 = vector.load %arg3[%c0_2, %c0_3] : memref<144x32xbf16, #tpu.memory_space<vmem>>, vector<144x32xbf16>
    %cst = arith.constant dense<0.000000e+00> : vector<16x32xf32>
    %3 = tpu.matmul %1, %2, %cst {dimension_numbers = #tpu.dot_dimension_numbers<[1], [0], [0], [1], [0, 0, 1, 1], [], []>} : vector<16x144xbf16>, vector<144x32xbf16>, vector<16x32xf32> -> vector<16x32xf32>
    %c0_4 = arith.constant 0 : index
    %c0_5 = arith.constant 0 : index
    %4 = vector.load %arg4[%c0_4, %c0_5] : memref<1x32xf32, #tpu.memory_space<vmem>>, vector<1x32xf32>
    %5 = vector.broadcast %4 : vector<1x32xf32> to vector<16x32xf32>
    %6 = arith.addf %3, %5 : vector<16x32xf32>
    %cst_6 = arith.constant 0.000000e+00 : f32
    %7 = vector.broadcast %cst_6 : f32 to vector<16x32xf32>
    %8 = arith.maximumf %6, %7 : vector<16x32xf32>
    %9 = arith.truncf %8 : vector<16x32xf32> to vector<16x32xbf16>
    %c0_7 = arith.constant 0 : index
    %c0_8 = arith.constant 0 : index
    %c0_9 = arith.constant 0 : index
    %10 = vector.load %arg5[%c0_7, %c0_8, %c0_9] : memref<1x16x32xbf16, #tpu.memory_space<vmem>>, vector<1x16x32xbf16>
    %11 = vector.shape_cast %10 : vector<1x16x32xbf16> to vector<16x32xbf16>
    %12 = vector.shape_cast %9 : vector<16x32xbf16> to vector<1x16x32xbf16>
    tpu.vector_store %arg5[%c0_7, %c0_8, %c0_9], %12 {strides = array<i32>} : memref<1x16x32xbf16, #tpu.memory_space<vmem>>, vector<1x16x32xbf16>,
    return
  }
  func.func @transform_0(%arg0: i32, %arg1: i32) -> (i32, i32, i32) {
    %c0_i32 = arith.constant 0 : i32
    %c0_i32_0 = arith.constant 0 : i32
    return %arg0, %arg1, %c0_i32 : i32, i32, i32
  }
  func.func @transform_1(%arg0: i32, %arg1: i32) -> (i32, i32) {
    %c0_i32 = arith.constant 0 : i32
    %c0_i32_0 = arith.constant 0 : i32
    %c0_i32_1 = arith.constant 0 : i32
    return %c0_i32, %c0_i32_0 : i32, i32
  }
  func.func @transform_2(%arg0: i32, %arg1: i32) -> (i32, i32) {
    %c0_i32 = arith.constant 0 : i32
    %c0_i32_0 = arith.constant 0 : i32
    %c0_i32_1 = arith.constant 0 : i32
    return %c0_i32, %c0_i32_0 : i32, i32
  }
  func.func @transform_3(%arg0: i32, %arg1: i32) -> (i32, i32, i32) {
    %c0_i32 = arith.constant 0 : i32
    %c0_i32_0 = arith.constant 0 : i32
    return %arg0, %arg1, %c0_i32 : i32, i32, i32
  }
}

module attributes {stable_mosaic.version = 11 : i64} {
  func.func @_conv_matmul_kernel(%arg0: i32, %arg1: i32, %arg2: memref<1x16x288xbf16, #tpu.memory_space<vmem>>, %arg3: memref<288x32xbf16, #tpu.memory_space<vmem>>, %arg4: memref<1x32xf32, #tpu.memory_space<vmem>>, %arg5: memref<1x16x32xbf16, #tpu.memory_space<vmem>>, %arg6: memref<1x16x32xbf16, #tpu.memory_space<vmem>>) attributes {dimension_semantics = [#tpu.dimension_semantics<parallel>, #tpu.dimension_semantics<parallel>], iteration_bounds = array<i64: 2, 1>, scalar_prefetch = 0 : i64, scratch_operands = 0 : i64, tpu.core_type = #tpu.core_type<tc>, window_params = [{transform_indices = @transform_0, window_bounds = array<i64: 1, 16, 288>}, {pipeline_mode = #tpu.pipeline_mode<synchronous>, transform_indices = @transform_1, window_bounds = array<i64: 288, 32>}, {pipeline_mode = #tpu.pipeline_mode<synchronous>, transform_indices = @transform_2, window_bounds = array<i64: 1, 32>}, {transform_indices = @transform_3, window_bounds = array<i64: 1, 16, 32>}, {transform_indices = @transform_4, window_bounds = array<i64: 1, 16, 32>}]} {
    %c0 = arith.constant 0 : index
    %c0_0 = arith.constant 0 : index
    %c0_1 = arith.constant 0 : index
    %0 = vector.load %arg2[%c0, %c0_0, %c0_1] : memref<1x16x288xbf16, #tpu.memory_space<vmem>>, vector<1x16x288xbf16>
    %1 = vector.shape_cast %0 : vector<1x16x288xbf16> to vector<16x288xbf16>
    %c0_2 = arith.constant 0 : index
    %c0_3 = arith.constant 0 : index
    %2 = vector.load %arg3[%c0_2, %c0_3] : memref<288x32xbf16, #tpu.memory_space<vmem>>, vector<288x32xbf16>
    %cst = arith.constant dense<0.000000e+00> : vector<16x32xf32>
    %3 = tpu.matmul %1, %2, %cst {dimension_numbers = #tpu.dot_dimension_numbers<[1], [0], [0], [1], [0, 0, 1, 1], [], []>} : vector<16x288xbf16>, vector<288x32xbf16>, vector<16x32xf32> -> vector<16x32xf32>
    %c0_4 = arith.constant 0 : index
    %c0_5 = arith.constant 0 : index
    %4 = vector.load %arg4[%c0_4, %c0_5] : memref<1x32xf32, #tpu.memory_space<vmem>>, vector<1x32xf32>
    %5 = vector.broadcast %4 : vector<1x32xf32> to vector<16x32xf32>
    %6 = arith.addf %3, %5 : vector<16x32xf32>
    %cst_6 = arith.constant 0.000000e+00 : f32
    %7 = vector.broadcast %cst_6 : f32 to vector<16x32xf32>
    %8 = arith.maximumf %6, %7 : vector<16x32xf32>
    %c0_7 = arith.constant 0 : index
    %c0_8 = arith.constant 0 : index
    %c0_9 = arith.constant 0 : index
    %9 = vector.load %arg5[%c0_7, %c0_8, %c0_9] : memref<1x16x32xbf16, #tpu.memory_space<vmem>>, vector<1x16x32xbf16>
    %10 = vector.shape_cast %9 : vector<1x16x32xbf16> to vector<16x32xbf16>
    %11 = arith.extf %10 : vector<16x32xbf16> to vector<16x32xf32>
    %12 = arith.addf %8, %11 : vector<16x32xf32>
    %13 = arith.truncf %12 : vector<16x32xf32> to vector<16x32xbf16>
    %c0_10 = arith.constant 0 : index
    %c0_11 = arith.constant 0 : index
    %c0_12 = arith.constant 0 : index
    %14 = vector.load %arg6[%c0_10, %c0_11, %c0_12] : memref<1x16x32xbf16, #tpu.memory_space<vmem>>, vector<1x16x32xbf16>
    %15 = vector.shape_cast %14 : vector<1x16x32xbf16> to vector<16x32xbf16>
    %16 = vector.shape_cast %13 : vector<16x32xbf16> to vector<1x16x32xbf16>
    tpu.vector_store %arg6[%c0_10, %c0_11, %c0_12], %16 {strides = array<i32>} : memref<1x16x32xbf16, #tpu.memory_space<vmem>>, vector<1x16x32xbf16>,
    return
  }
  func.func @transform_0(%arg0: i32, %arg1: i32) -> (i32, i32, i32) {
    %c0_i32 = arith.constant 0 : i32
    %c0_i32_0 = arith.constant 0 : i32
    return %arg0, %arg1, %c0_i32 : i32, i32, i32
  }
  func.func @transform_1(%arg0: i32, %arg1: i32) -> (i32, i32) {
    %c0_i32 = arith.constant 0 : i32
    %c0_i32_0 = arith.constant 0 : i32
    %c0_i32_1 = arith.constant 0 : i32
    return %c0_i32, %c0_i32_0 : i32, i32
  }
  func.func @transform_2(%arg0: i32, %arg1: i32) -> (i32, i32) {
    %c0_i32 = arith.constant 0 : i32
    %c0_i32_0 = arith.constant 0 : i32
    %c0_i32_1 = arith.constant 0 : i32
    return %c0_i32, %c0_i32_0 : i32, i32
  }
  func.func @transform_3(%arg0: i32, %arg1: i32) -> (i32, i32, i32) {
    %c0_i32 = arith.constant 0 : i32
    %c0_i32_0 = arith.constant 0 : i32
    return %arg0, %arg1, %c0_i32 : i32, i32, i32
  }
  func.func @transform_4(%arg0: i32, %arg1: i32) -> (i32, i32, i32) {
    %c0_i32 = arith.constant 0 : i32
    %c0_i32_0 = arith.constant 0 : i32
    return %arg0, %arg1, %c0_i32 : i32, i32, i32
  }
}

module attributes {stable_mosaic.version = 11 : i64} {
  func.func @_conv_matmul_kernel(%arg0: i32, %arg1: i32, %arg2: memref<1x4x288xbf16, #tpu.memory_space<vmem>>, %arg3: memref<288x64xbf16, #tpu.memory_space<vmem>>, %arg4: memref<1x64xf32, #tpu.memory_space<vmem>>, %arg5: memref<1x4x64xbf16, #tpu.memory_space<vmem>>) attributes {dimension_semantics = [#tpu.dimension_semantics<parallel>, #tpu.dimension_semantics<parallel>], iteration_bounds = array<i64: 2, 1>, scalar_prefetch = 0 : i64, scratch_operands = 0 : i64, tpu.core_type = #tpu.core_type<tc>, window_params = [{transform_indices = @transform_0, window_bounds = array<i64: 1, 4, 288>}, {pipeline_mode = #tpu.pipeline_mode<synchronous>, transform_indices = @transform_1, window_bounds = array<i64: 288, 64>}, {pipeline_mode = #tpu.pipeline_mode<synchronous>, transform_indices = @transform_2, window_bounds = array<i64: 1, 64>}, {transform_indices = @transform_3, window_bounds = array<i64: 1, 4, 64>}]} {
    %c0 = arith.constant 0 : index
    %c0_0 = arith.constant 0 : index
    %c0_1 = arith.constant 0 : index
    %0 = vector.load %arg2[%c0, %c0_0, %c0_1] : memref<1x4x288xbf16, #tpu.memory_space<vmem>>, vector<1x4x288xbf16>
    %1 = vector.shape_cast %0 : vector<1x4x288xbf16> to vector<4x288xbf16>
    %c0_2 = arith.constant 0 : index
    %c0_3 = arith.constant 0 : index
    %2 = vector.load %arg3[%c0_2, %c0_3] : memref<288x64xbf16, #tpu.memory_space<vmem>>, vector<288x64xbf16>
    %cst = arith.constant dense<0.000000e+00> : vector<4x64xf32>
    %3 = tpu.matmul %1, %2, %cst {dimension_numbers = #tpu.dot_dimension_numbers<[1], [0], [0], [1], [0, 0, 1, 1], [], []>} : vector<4x288xbf16>, vector<288x64xbf16>, vector<4x64xf32> -> vector<4x64xf32>
    %c0_4 = arith.constant 0 : index
    %c0_5 = arith.constant 0 : index
    %4 = vector.load %arg4[%c0_4, %c0_5] : memref<1x64xf32, #tpu.memory_space<vmem>>, vector<1x64xf32>
    %5 = vector.broadcast %4 : vector<1x64xf32> to vector<4x64xf32>
    %6 = arith.addf %3, %5 : vector<4x64xf32>
    %cst_6 = arith.constant 0.000000e+00 : f32
    %7 = vector.broadcast %cst_6 : f32 to vector<4x64xf32>
    %8 = arith.maximumf %6, %7 : vector<4x64xf32>
    %9 = arith.truncf %8 : vector<4x64xf32> to vector<4x64xbf16>
    %c0_7 = arith.constant 0 : index
    %c0_8 = arith.constant 0 : index
    %c0_9 = arith.constant 0 : index
    %10 = vector.load %arg5[%c0_7, %c0_8, %c0_9] : memref<1x4x64xbf16, #tpu.memory_space<vmem>>, vector<1x4x64xbf16>
    %11 = vector.shape_cast %10 : vector<1x4x64xbf16> to vector<4x64xbf16>
    %12 = vector.shape_cast %9 : vector<4x64xbf16> to vector<1x4x64xbf16>
    tpu.vector_store %arg5[%c0_7, %c0_8, %c0_9], %12 {strides = array<i32>} : memref<1x4x64xbf16, #tpu.memory_space<vmem>>, vector<1x4x64xbf16>,
    return
  }
  func.func @transform_0(%arg0: i32, %arg1: i32) -> (i32, i32, i32) {
    %c0_i32 = arith.constant 0 : i32
    %c0_i32_0 = arith.constant 0 : i32
    return %arg0, %arg1, %c0_i32 : i32, i32, i32
  }
  func.func @transform_1(%arg0: i32, %arg1: i32) -> (i32, i32) {
    %c0_i32 = arith.constant 0 : i32
    %c0_i32_0 = arith.constant 0 : i32
    %c0_i32_1 = arith.constant 0 : i32
    return %c0_i32, %c0_i32_0 : i32, i32
  }
  func.func @transform_2(%arg0: i32, %arg1: i32) -> (i32, i32) {
    %c0_i32 = arith.constant 0 : i32
    %c0_i32_0 = arith.constant 0 : i32
    %c0_i32_1 = arith.constant 0 : i32
    return %c0_i32, %c0_i32_0 : i32, i32
  }
  func.func @transform_3(%arg0: i32, %arg1: i32) -> (i32, i32, i32) {
    %c0_i32 = arith.constant 0 : i32
    %c0_i32_0 = arith.constant 0 : i32
    return %arg0, %arg1, %c0_i32 : i32, i32, i32
  }
}

module attributes {stable_mosaic.version = 11 : i64} {
  func.func @_conv_matmul_kernel(%arg0: i32, %arg1: i32, %arg2: memref<1x4x576xbf16, #tpu.memory_space<vmem>>, %arg3: memref<576x64xbf16, #tpu.memory_space<vmem>>, %arg4: memref<1x64xf32, #tpu.memory_space<vmem>>, %arg5: memref<1x4x64xbf16, #tpu.memory_space<vmem>>, %arg6: memref<1x4x64xbf16, #tpu.memory_space<vmem>>) attributes {dimension_semantics = [#tpu.dimension_semantics<parallel>, #tpu.dimension_semantics<parallel>], iteration_bounds = array<i64: 2, 1>, scalar_prefetch = 0 : i64, scratch_operands = 0 : i64, tpu.core_type = #tpu.core_type<tc>, window_params = [{transform_indices = @transform_0, window_bounds = array<i64: 1, 4, 576>}, {pipeline_mode = #tpu.pipeline_mode<synchronous>, transform_indices = @transform_1, window_bounds = array<i64: 576, 64>}, {pipeline_mode = #tpu.pipeline_mode<synchronous>, transform_indices = @transform_2, window_bounds = array<i64: 1, 64>}, {transform_indices = @transform_3, window_bounds = array<i64: 1, 4, 64>}, {transform_indices = @transform_4, window_bounds = array<i64: 1, 4, 64>}]} {
    %c0 = arith.constant 0 : index
    %c0_0 = arith.constant 0 : index
    %c0_1 = arith.constant 0 : index
    %0 = vector.load %arg2[%c0, %c0_0, %c0_1] : memref<1x4x576xbf16, #tpu.memory_space<vmem>>, vector<1x4x576xbf16>
    %1 = vector.shape_cast %0 : vector<1x4x576xbf16> to vector<4x576xbf16>
    %c0_2 = arith.constant 0 : index
    %c0_3 = arith.constant 0 : index
    %2 = vector.load %arg3[%c0_2, %c0_3] : memref<576x64xbf16, #tpu.memory_space<vmem>>, vector<576x64xbf16>
    %cst = arith.constant dense<0.000000e+00> : vector<4x64xf32>
    %3 = tpu.matmul %1, %2, %cst {dimension_numbers = #tpu.dot_dimension_numbers<[1], [0], [0], [1], [0, 0, 1, 1], [], []>} : vector<4x576xbf16>, vector<576x64xbf16>, vector<4x64xf32> -> vector<4x64xf32>
    %c0_4 = arith.constant 0 : index
    %c0_5 = arith.constant 0 : index
    %4 = vector.load %arg4[%c0_4, %c0_5] : memref<1x64xf32, #tpu.memory_space<vmem>>, vector<1x64xf32>
    %5 = vector.broadcast %4 : vector<1x64xf32> to vector<4x64xf32>
    %6 = arith.addf %3, %5 : vector<4x64xf32>
    %cst_6 = arith.constant 0.000000e+00 : f32
    %7 = vector.broadcast %cst_6 : f32 to vector<4x64xf32>
    %8 = arith.maximumf %6, %7 : vector<4x64xf32>
    %c0_7 = arith.constant 0 : index
    %c0_8 = arith.constant 0 : index
    %c0_9 = arith.constant 0 : index
    %9 = vector.load %arg5[%c0_7, %c0_8, %c0_9] : memref<1x4x64xbf16, #tpu.memory_space<vmem>>, vector<1x4x64xbf16>
    %10 = vector.shape_cast %9 : vector<1x4x64xbf16> to vector<4x64xbf16>
    %11 = arith.extf %10 : vector<4x64xbf16> to vector<4x64xf32>
    %12 = arith.addf %8, %11 : vector<4x64xf32>
    %13 = arith.truncf %12 : vector<4x64xf32> to vector<4x64xbf16>
    %c0_10 = arith.constant 0 : index
    %c0_11 = arith.constant 0 : index
    %c0_12 = arith.constant 0 : index
    %14 = vector.load %arg6[%c0_10, %c0_11, %c0_12] : memref<1x4x64xbf16, #tpu.memory_space<vmem>>, vector<1x4x64xbf16>
    %15 = vector.shape_cast %14 : vector<1x4x64xbf16> to vector<4x64xbf16>
    %16 = vector.shape_cast %13 : vector<4x64xbf16> to vector<1x4x64xbf16>
    tpu.vector_store %arg6[%c0_10, %c0_11, %c0_12], %16 {strides = array<i32>} : memref<1x4x64xbf16, #tpu.memory_space<vmem>>, vector<1x4x64xbf16>,
    return
  }
  func.func @transform_0(%arg0: i32, %arg1: i32) -> (i32, i32, i32) {
    %c0_i32 = arith.constant 0 : i32
    %c0_i32_0 = arith.constant 0 : i32
    return %arg0, %arg1, %c0_i32 : i32, i32, i32
  }
  func.func @transform_1(%arg0: i32, %arg1: i32) -> (i32, i32) {
    %c0_i32 = arith.constant 0 : i32
    %c0_i32_0 = arith.constant 0 : i32
    %c0_i32_1 = arith.constant 0 : i32
    return %c0_i32, %c0_i32_0 : i32, i32
  }
  func.func @transform_2(%arg0: i32, %arg1: i32) -> (i32, i32) {
    %c0_i32 = arith.constant 0 : i32
    %c0_i32_0 = arith.constant 0 : i32
    %c0_i32_1 = arith.constant 0 : i32
    return %c0_i32, %c0_i32_0 : i32, i32
  }
  func.func @transform_3(%arg0: i32, %arg1: i32) -> (i32, i32, i32) {
    %c0_i32 = arith.constant 0 : i32
    %c0_i32_0 = arith.constant 0 : i32
    return %arg0, %arg1, %c0_i32 : i32, i32, i32
  }
  func.func @transform_4(%arg0: i32, %arg1: i32) -> (i32, i32, i32) {
    %c0_i32 = arith.constant 0 : i32
    %c0_i32_0 = arith.constant 0 : i32
    return %arg0, %arg1, %c0_i32 : i32, i32, i32
  }
}

module attributes {stable_mosaic.version = 11 : i64} {
  func.func @_conv_matmul_kernel(%arg0: i32, %arg1: i32, %arg2: memref<1x16x576xbf16, #tpu.memory_space<vmem>>, %arg3: memref<576x32xbf16, #tpu.memory_space<vmem>>, %arg4: memref<1x32xf32, #tpu.memory_space<vmem>>, %arg5: memref<1x16x32xbf16, #tpu.memory_space<vmem>>) attributes {dimension_semantics = [#tpu.dimension_semantics<parallel>, #tpu.dimension_semantics<parallel>], iteration_bounds = array<i64: 2, 1>, scalar_prefetch = 0 : i64, scratch_operands = 0 : i64, tpu.core_type = #tpu.core_type<tc>, window_params = [{transform_indices = @transform_0, window_bounds = array<i64: 1, 16, 576>}, {pipeline_mode = #tpu.pipeline_mode<synchronous>, transform_indices = @transform_1, window_bounds = array<i64: 576, 32>}, {pipeline_mode = #tpu.pipeline_mode<synchronous>, transform_indices = @transform_2, window_bounds = array<i64: 1, 32>}, {transform_indices = @transform_3, window_bounds = array<i64: 1, 16, 32>}]} {
    %c0 = arith.constant 0 : index
    %c0_0 = arith.constant 0 : index
    %c0_1 = arith.constant 0 : index
    %0 = vector.load %arg2[%c0, %c0_0, %c0_1] : memref<1x16x576xbf16, #tpu.memory_space<vmem>>, vector<1x16x576xbf16>
    %1 = vector.shape_cast %0 : vector<1x16x576xbf16> to vector<16x576xbf16>
    %c0_2 = arith.constant 0 : index
    %c0_3 = arith.constant 0 : index
    %2 = vector.load %arg3[%c0_2, %c0_3] : memref<576x32xbf16, #tpu.memory_space<vmem>>, vector<576x32xbf16>
    %cst = arith.constant dense<0.000000e+00> : vector<16x32xf32>
    %3 = tpu.matmul %1, %2, %cst {dimension_numbers = #tpu.dot_dimension_numbers<[1], [0], [0], [1], [0, 0, 1, 1], [], []>} : vector<16x576xbf16>, vector<576x32xbf16>, vector<16x32xf32> -> vector<16x32xf32>
    %c0_4 = arith.constant 0 : index
    %c0_5 = arith.constant 0 : index
    %4 = vector.load %arg4[%c0_4, %c0_5] : memref<1x32xf32, #tpu.memory_space<vmem>>, vector<1x32xf32>
    %5 = vector.broadcast %4 : vector<1x32xf32> to vector<16x32xf32>
    %6 = arith.addf %3, %5 : vector<16x32xf32>
    %cst_6 = arith.constant 0.000000e+00 : f32
    %7 = vector.broadcast %cst_6 : f32 to vector<16x32xf32>
    %8 = arith.maximumf %6, %7 : vector<16x32xf32>
    %9 = arith.truncf %8 : vector<16x32xf32> to vector<16x32xbf16>
    %c0_7 = arith.constant 0 : index
    %c0_8 = arith.constant 0 : index
    %c0_9 = arith.constant 0 : index
    %10 = vector.load %arg5[%c0_7, %c0_8, %c0_9] : memref<1x16x32xbf16, #tpu.memory_space<vmem>>, vector<1x16x32xbf16>
    %11 = vector.shape_cast %10 : vector<1x16x32xbf16> to vector<16x32xbf16>
    %12 = vector.shape_cast %9 : vector<16x32xbf16> to vector<1x16x32xbf16>
    tpu.vector_store %arg5[%c0_7, %c0_8, %c0_9], %12 {strides = array<i32>} : memref<1x16x32xbf16, #tpu.memory_space<vmem>>, vector<1x16x32xbf16>,
    return
  }
  func.func @transform_0(%arg0: i32, %arg1: i32) -> (i32, i32, i32) {
    %c0_i32 = arith.constant 0 : i32
    %c0_i32_0 = arith.constant 0 : i32
    return %arg0, %arg1, %c0_i32 : i32, i32, i32
  }
  func.func @transform_1(%arg0: i32, %arg1: i32) -> (i32, i32) {
    %c0_i32 = arith.constant 0 : i32
    %c0_i32_0 = arith.constant 0 : i32
    %c0_i32_1 = arith.constant 0 : i32
    return %c0_i32, %c0_i32_0 : i32, i32
  }
  func.func @transform_2(%arg0: i32, %arg1: i32) -> (i32, i32) {
    %c0_i32 = arith.constant 0 : i32
    %c0_i32_0 = arith.constant 0 : i32
    %c0_i32_1 = arith.constant 0 : i32
    return %c0_i32, %c0_i32_0 : i32, i32
  }
  func.func @transform_3(%arg0: i32, %arg1: i32) -> (i32, i32, i32) {
    %c0_i32 = arith.constant 0 : i32
    %c0_i32_0 = arith.constant 0 : i32
    return %arg0, %arg1, %c0_i32 : i32, i32, i32
  }
}

module attributes {stable_mosaic.version = 11 : i64} {
  func.func @_conv_matmul_kernel(%arg0: i32, %arg1: i32, %arg2: memref<1x64x288xbf16, #tpu.memory_space<vmem>>, %arg3: memref<288x16xbf16, #tpu.memory_space<vmem>>, %arg4: memref<1x16xf32, #tpu.memory_space<vmem>>, %arg5: memref<1x64x16xbf16, #tpu.memory_space<vmem>>) attributes {dimension_semantics = [#tpu.dimension_semantics<parallel>, #tpu.dimension_semantics<parallel>], iteration_bounds = array<i64: 2, 1>, scalar_prefetch = 0 : i64, scratch_operands = 0 : i64, tpu.core_type = #tpu.core_type<tc>, window_params = [{transform_indices = @transform_0, window_bounds = array<i64: 1, 64, 288>}, {pipeline_mode = #tpu.pipeline_mode<synchronous>, transform_indices = @transform_1, window_bounds = array<i64: 288, 16>}, {pipeline_mode = #tpu.pipeline_mode<synchronous>, transform_indices = @transform_2, window_bounds = array<i64: 1, 16>}, {transform_indices = @transform_3, window_bounds = array<i64: 1, 64, 16>}]} {
    %c0 = arith.constant 0 : index
    %c0_0 = arith.constant 0 : index
    %c0_1 = arith.constant 0 : index
    %0 = vector.load %arg2[%c0, %c0_0, %c0_1] : memref<1x64x288xbf16, #tpu.memory_space<vmem>>, vector<1x64x288xbf16>
    %1 = vector.shape_cast %0 : vector<1x64x288xbf16> to vector<64x288xbf16>
    %c0_2 = arith.constant 0 : index
    %c0_3 = arith.constant 0 : index
    %2 = vector.load %arg3[%c0_2, %c0_3] : memref<288x16xbf16, #tpu.memory_space<vmem>>, vector<288x16xbf16>
    %cst = arith.constant dense<0.000000e+00> : vector<64x16xf32>
    %3 = tpu.matmul %1, %2, %cst {dimension_numbers = #tpu.dot_dimension_numbers<[1], [0], [0], [1], [0, 0, 1, 1], [], []>} : vector<64x288xbf16>, vector<288x16xbf16>, vector<64x16xf32> -> vector<64x16xf32>
    %c0_4 = arith.constant 0 : index
    %c0_5 = arith.constant 0 : index
    %4 = vector.load %arg4[%c0_4, %c0_5] : memref<1x16xf32, #tpu.memory_space<vmem>>, vector<1x16xf32>
    %5 = vector.broadcast %4 : vector<1x16xf32> to vector<64x16xf32>
    %6 = arith.addf %3, %5 : vector<64x16xf32>
    %cst_6 = arith.constant 0.000000e+00 : f32
    %7 = vector.broadcast %cst_6 : f32 to vector<64x16xf32>
    %8 = arith.maximumf %6, %7 : vector<64x16xf32>
    %9 = arith.truncf %8 : vector<64x16xf32> to vector<64x16xbf16>
    %c0_7 = arith.constant 0 : index
    %c0_8 = arith.constant 0 : index
    %c0_9 = arith.constant 0 : index
    %10 = vector.load %arg5[%c0_7, %c0_8, %c0_9] : memref<1x64x16xbf16, #tpu.memory_space<vmem>>, vector<1x64x16xbf16>
    %11 = vector.shape_cast %10 : vector<1x64x16xbf16> to vector<64x16xbf16>
    %12 = vector.shape_cast %9 : vector<64x16xbf16> to vector<1x64x16xbf16>
    tpu.vector_store %arg5[%c0_7, %c0_8, %c0_9], %12 {strides = array<i32>} : memref<1x64x16xbf16, #tpu.memory_space<vmem>>, vector<1x64x16xbf16>,
    return
  }
  func.func @transform_0(%arg0: i32, %arg1: i32) -> (i32, i32, i32) {
    %c0_i32 = arith.constant 0 : i32
    %c0_i32_0 = arith.constant 0 : i32
    return %arg0, %arg1, %c0_i32 : i32, i32, i32
  }
  func.func @transform_1(%arg0: i32, %arg1: i32) -> (i32, i32) {
    %c0_i32 = arith.constant 0 : i32
    %c0_i32_0 = arith.constant 0 : i32
    %c0_i32_1 = arith.constant 0 : i32
    return %c0_i32, %c0_i32_0 : i32, i32
  }
  func.func @transform_2(%arg0: i32, %arg1: i32) -> (i32, i32) {
    %c0_i32 = arith.constant 0 : i32
    %c0_i32_0 = arith.constant 0 : i32
    %c0_i32_1 = arith.constant 0 : i32
    return %c0_i32, %c0_i32_0 : i32, i32
  }
  func.func @transform_3(%arg0: i32, %arg1: i32) -> (i32, i32, i32) {
    %c0_i32 = arith.constant 0 : i32
    %c0_i32_0 = arith.constant 0 : i32
    return %arg0, %arg1, %c0_i32 : i32, i32, i32
  }
}

module attributes {stable_mosaic.version = 11 : i64} {
  func.func @_conv_matmul_kernel(%arg0: i32, %arg1: i32, %arg2: memref<1x256x144xbf16, #tpu.memory_space<vmem>>, %arg3: memref<144x8xbf16, #tpu.memory_space<vmem>>, %arg4: memref<1x8xf32, #tpu.memory_space<vmem>>, %arg5: memref<1x256x8xbf16, #tpu.memory_space<vmem>>) attributes {dimension_semantics = [#tpu.dimension_semantics<parallel>, #tpu.dimension_semantics<parallel>], iteration_bounds = array<i64: 2, 1>, scalar_prefetch = 0 : i64, scratch_operands = 0 : i64, tpu.core_type = #tpu.core_type<tc>, window_params = [{transform_indices = @transform_0, window_bounds = array<i64: 1, 256, 144>}, {pipeline_mode = #tpu.pipeline_mode<synchronous>, transform_indices = @transform_1, window_bounds = array<i64: 144, 8>}, {pipeline_mode = #tpu.pipeline_mode<synchronous>, transform_indices = @transform_2, window_bounds = array<i64: 1, 8>}, {transform_indices = @transform_3, window_bounds = array<i64: 1, 256, 8>}]} {
    %c0 = arith.constant 0 : index
    %c0_0 = arith.constant 0 : index
    %c0_1 = arith.constant 0 : index
    %0 = vector.load %arg2[%c0, %c0_0, %c0_1] : memref<1x256x144xbf16, #tpu.memory_space<vmem>>, vector<1x256x144xbf16>
    %1 = vector.shape_cast %0 : vector<1x256x144xbf16> to vector<256x144xbf16>
    %c0_2 = arith.constant 0 : index
    %c0_3 = arith.constant 0 : index
    %2 = vector.load %arg3[%c0_2, %c0_3] : memref<144x8xbf16, #tpu.memory_space<vmem>>, vector<144x8xbf16>
    %cst = arith.constant dense<0.000000e+00> : vector<256x8xf32>
    %3 = tpu.matmul %1, %2, %cst {dimension_numbers = #tpu.dot_dimension_numbers<[1], [0], [0], [1], [0, 0, 1, 1], [], []>} : vector<256x144xbf16>, vector<144x8xbf16>, vector<256x8xf32> -> vector<256x8xf32>
    %c0_4 = arith.constant 0 : index
    %c0_5 = arith.constant 0 : index
    %4 = vector.load %arg4[%c0_4, %c0_5] : memref<1x8xf32, #tpu.memory_space<vmem>>, vector<1x8xf32>
    %5 = vector.broadcast %4 : vector<1x8xf32> to vector<256x8xf32>
    %6 = arith.addf %3, %5 : vector<256x8xf32>
    %cst_6 = arith.constant 0.000000e+00 : f32
    %7 = vector.broadcast %cst_6 : f32 to vector<256x8xf32>
    %8 = arith.maximumf %6, %7 : vector<256x8xf32>
    %9 = arith.truncf %8 : vector<256x8xf32> to vector<256x8xbf16>
    %c0_7 = arith.constant 0 : index
    %c0_8 = arith.constant 0 : index
    %c0_9 = arith.constant 0 : index
    %10 = vector.load %arg5[%c0_7, %c0_8, %c0_9] : memref<1x256x8xbf16, #tpu.memory_space<vmem>>, vector<1x256x8xbf16>
    %11 = vector.shape_cast %10 : vector<1x256x8xbf16> to vector<256x8xbf16>
    %12 = vector.shape_cast %9 : vector<256x8xbf16> to vector<1x256x8xbf16>
    tpu.vector_store %arg5[%c0_7, %c0_8, %c0_9], %12 {strides = array<i32>} : memref<1x256x8xbf16, #tpu.memory_space<vmem>>, vector<1x256x8xbf16>,
    return
  }
  func.func @transform_0(%arg0: i32, %arg1: i32) -> (i32, i32, i32) {
    %c0_i32 = arith.constant 0 : i32
    %c0_i32_0 = arith.constant 0 : i32
    return %arg0, %arg1, %c0_i32 : i32, i32, i32
  }
  func.func @transform_1(%arg0: i32, %arg1: i32) -> (i32, i32) {
    %c0_i32 = arith.constant 0 : i32
    %c0_i32_0 = arith.constant 0 : i32
    %c0_i32_1 = arith.constant 0 : i32
    return %c0_i32, %c0_i32_0 : i32, i32
  }
  func.func @transform_2(%arg0: i32, %arg1: i32) -> (i32, i32) {
    %c0_i32 = arith.constant 0 : i32
    %c0_i32_0 = arith.constant 0 : i32
    %c0_i32_1 = arith.constant 0 : i32
    return %c0_i32, %c0_i32_0 : i32, i32
  }
  func.func @transform_3(%arg0: i32, %arg1: i32) -> (i32, i32, i32) {
    %c0_i32 = arith.constant 0 : i32
    %c0_i32_0 = arith.constant 0 : i32
    return %arg0, %arg1, %c0_i32 : i32, i32, i32
  }
}

module attributes {stable_mosaic.version = 11 : i64} {
  func.func @_conv_matmul_kernel(%arg0: i32, %arg1: i32, %arg2: memref<1x256x72xbf16, #tpu.memory_space<vmem>>, %arg3: memref<72x3xbf16, #tpu.memory_space<vmem>>, %arg4: memref<1x3xf32, #tpu.memory_space<vmem>>, %arg5: memref<1x256x3xf32, #tpu.memory_space<vmem>>) attributes {dimension_semantics = [#tpu.dimension_semantics<parallel>, #tpu.dimension_semantics<parallel>], iteration_bounds = array<i64: 2, 1>, scalar_prefetch = 0 : i64, scratch_operands = 0 : i64, tpu.core_type = #tpu.core_type<tc>, window_params = [{transform_indices = @transform_0, window_bounds = array<i64: 1, 256, 72>}, {pipeline_mode = #tpu.pipeline_mode<synchronous>, transform_indices = @transform_1, window_bounds = array<i64: 72, 3>}, {pipeline_mode = #tpu.pipeline_mode<synchronous>, transform_indices = @transform_2, window_bounds = array<i64: 1, 3>}, {transform_indices = @transform_3, window_bounds = array<i64: 1, 256, 3>}]} {
    %c0 = arith.constant 0 : index
    %c0_0 = arith.constant 0 : index
    %c0_1 = arith.constant 0 : index
    %0 = vector.load %arg2[%c0, %c0_0, %c0_1] : memref<1x256x72xbf16, #tpu.memory_space<vmem>>, vector<1x256x72xbf16>
    %1 = vector.shape_cast %0 : vector<1x256x72xbf16> to vector<256x72xbf16>
    %c0_2 = arith.constant 0 : index
    %c0_3 = arith.constant 0 : index
    %2 = vector.load %arg3[%c0_2, %c0_3] : memref<72x3xbf16, #tpu.memory_space<vmem>>, vector<72x3xbf16>
    %cst = arith.constant dense<0.000000e+00> : vector<256x3xf32>
    %3 = tpu.matmul %1, %2, %cst {dimension_numbers = #tpu.dot_dimension_numbers<[1], [0], [0], [1], [0, 0, 1, 1], [], []>} : vector<256x72xbf16>, vector<72x3xbf16>, vector<256x3xf32> -> vector<256x3xf32>
    %c0_4 = arith.constant 0 : index
    %c0_5 = arith.constant 0 : index
    %4 = vector.load %arg4[%c0_4, %c0_5] : memref<1x3xf32, #tpu.memory_space<vmem>>, vector<1x3xf32>
    %5 = vector.broadcast %4 : vector<1x3xf32> to vector<256x3xf32>
    %6 = arith.addf %3, %5 : vector<256x3xf32>
    %7 = math.tanh %6 : vector<256x3xf32>
    %cst_6 = arith.constant 1.000000e+00 : f32
    %8 = vector.broadcast %cst_6 : f32 to vector<256x3xf32>
    %9 = arith.addf %7, %8 : vector<256x3xf32>
    %cst_7 = arith.constant 5.000000e-01 : f32
    %10 = vector.broadcast %cst_7 : f32 to vector<256x3xf32>
    %11 = arith.mulf %9, %10 : vector<256x3xf32>
    %c0_8 = arith.constant 0 : index
    %c0_9 = arith.constant 0 : index
    %c0_10 = arith.constant 0 : index
    %12 = vector.load %arg5[%c0_8, %c0_9, %c0_10] : memref<1x256x3xf32, #tpu.memory_space<vmem>>, vector<1x256x3xf32>
    %13 = vector.shape_cast %12 : vector<1x256x3xf32> to vector<256x3xf32>
    %14 = vector.shape_cast %11 : vector<256x3xf32> to vector<1x256x3xf32>
    tpu.vector_store %arg5[%c0_8, %c0_9, %c0_10], %14 {strides = array<i32>} : memref<1x256x3xf32, #tpu.memory_space<vmem>>, vector<1x256x3xf32>,
    return
  }
  func.func @transform_0(%arg0: i32, %arg1: i32) -> (i32, i32, i32) {
    %c0_i32 = arith.constant 0 : i32
    %c0_i32_0 = arith.constant 0 : i32
    return %arg0, %arg1, %c0_i32 : i32, i32, i32
  }
  func.func @transform_1(%arg0: i32, %arg1: i32) -> (i32, i32) {
    %c0_i32 = arith.constant 0 : i32
    %c0_i32_0 = arith.constant 0 : i32
    %c0_i32_1 = arith.constant 0 : i32
    return %c0_i32, %c0_i32_0 : i32, i32
  }
  func.func @transform_2(%arg0: i32, %arg1: i32) -> (i32, i32) {
    %c0_i32 = arith.constant 0 : i32
    %c0_i32_0 = arith.constant 0 : i32
    %c0_i32_1 = arith.constant 0 : i32
    return %c0_i32, %c0_i32_0 : i32, i32
  }
  func.func @transform_3(%arg0: i32, %arg1: i32) -> (i32, i32, i32) {
    %c0_i32 = arith.constant 0 : i32
    %c0_i32_0 = arith.constant 0 : i32
    return %arg0, %arg1, %c0_i32 : i32, i32, i32
  }
}

</mosaic_0001>

<bundles_post_ra>
// kernel: baseline1net_forward.17
= control target key start
LH: loop header
LB: loop body
LE: loop exit
PB: predicated region body
PF: predicated region fallthrough
CT: control target
= control target key end

     0   :  { %s1100_s12 = smov 0   ;;  %s1102_s13 = smov 0   ;;  %s1283_s0 = inlined_call_operand.vmem [shape: bf16[2,256,27], index: 0, kind: input, shape index: {}]   ;;  %s1284_s1 = inlined_call_operand.vmem [shape: bf16[27,8], index: 1, kind: input, shape index: {}]   ;;  %s1285_s2 = inlined_call_operand.vmem [shape: f32[1,8], index: 2, kind: input, shape index: {}]   ;;  %s1286_s3 = inlined_call_operand.vmem [shape: bf16[2,256,8], index: 3, kind: output, shape index: {}]  }
   0x1   :  { %s1104_s14 = smov 0  }
   0x2 LB: > { %s25_s15 = sadd.s32 1, %s1073_s13  ;;  %p846_p0 = scmp.ge.s32.totalorder %s1077_s14, 1  ;;  %s1077_s14 = sphi %s1104_s14, %s13_s14   ;;  %s1073_s13 = sphi %s1102_s13, %s1288_s13   ;;  %s1069_s12 = sphi %s1100_s12, %s1287_s12  }
   0x3   : > { %p27_p1 = scmp.ge.s32.totalorder %s25_s15, 2  ;;  %p158_p2 = scmp.lt.s32.totalorder %s1077_s14, 3 }
   0x5   : > { %s1290_s15 = smov (%p27_p1, %s25_s15), 0  ;;  %p159_p3 = pnand %p846_p0, %p158_p2 }
   0x6   : > { %p191_p4 = scmp.lt.s32.totalorder (!%p159_p3), %s1069_s12, 1 }
   0x7   : > { %162 = sbr.rel (%p159_p3) target bundleno = 256 (0x100), region = 32 }
   0xc   : > { %v1037_v0 = vld [vmem:[%s1284_s1 + $0x8] sm:$0x3f]   ;;  %vm394_vm0 = vcmask 1044480   ;;  %vm395_vm1 = vcmask 1045504   ;;  %v1079_v1 = vmov 65535   ;;  %v1038_v5 = vld [vmem:[%s1284_s1] sm:$0xff]  }
   0xd   : > { %v396_v2 = vsel %vm394_vm0, 4294967295, %v1079_v1  ;;  %s1292_s12 = smov (!%p191_p4, %s1069_s12), 1  ;;  %vm345_vm2 = vcmask 220160   ;;  %v1169_v22 = vld [vmem:[%s1285_s2] ss:$0 sm:$0xff]  ;;  %vm722_vm3 = vcmask 60416  }
   0xe   : > { %v397_v3 = vsel %vm395_vm1, %v396_v2, 0  ;;  %s920_s20 = sshll.u32 %s1292_s12, 7 }
   0xf   : > { %v399_v4 = vand.u32 %v1037_v0, %v397_v3  ;;  %s1132_s23 = scalar_lea.vmem %s1283_s0, %s920_s20  ;;  %s1180_s28 = scalar_lea.vmem %s1286_s3, %s920_s20 }
  0x10   : > { %v1039_v6 = vld [vmem:[%s1132_s23] sm:$0xff]   ;;  %v1041_v8 = vld [vmem:[%s1132_s23 + $0x8] sm:$0xff]   ;;  %v1043_v10 = vld [vmem:[%s1132_s23 + $0x10] sm:$0xff]  }
  0x11   : > { %972 = vmatprep.subr.bf16.mxu0 %v399_v4  ;;  %1008 = vmatprep.subr.bf16.mxu1 %v399_v4  ;;  %v1040_v7 = vld [vmem:[%s1132_s23 + $0x40] sm:$0xff]   ;;  %v1042_v9 = vld [vmem:[%s1132_s23 + $0x48] sm:$0xff]   ;;  %v1044_v11 = vld [vmem:[%s1132_s23 + $0x50] sm:$0xff]  }
  0x12   : > { %973 = vmatpush3.bf16.msra.mxu0 %v399_v4  ;;  %1010 = vmatpush3.bf16.msra.mxu1 %v399_v4  ;;  %v1045_v12 = vld [vmem:[%s1132_s23 + $0x18] sm:$0xff]   ;;  %v1047_v14 = vld [vmem:[%s1132_s23 + $0x20] sm:$0xff]   ;;  %v1049_v16 = vld [vmem:[%s1132_s23 + $0x28] sm:$0xff]  }
  0x13   : > { %974 = vmatprep.subr.bf16.mxu0 %v1038_v5  ;;  %1009 = vmatprep.subr.bf16.mxu1 %v1038_v5  ;;  %v1046_v13 = vld [vmem:[%s1132_s23 + $0x58] sm:$0xff]   ;;  %v1048_v15 = vld [vmem:[%s1132_s23 + $0x60] sm:$0xff]   ;;  %v1050_v17 = vld [vmem:[%s1132_s23 + $0x68] sm:$0xff]  }
  0x14   : > { %976 = vmatprep.mubr.msk.bf16.mxu0 %vm345_vm2, %v1039_v6  ;;  %992 = vmatprep.mubr.msk.bf16.mxu1 %vm345_vm2, %v1040_v7  ;;  %v1051_v18 = vld [vmem:[%s1132_s23 + $0x30] sm:$0xff]   ;;  %v1053_v20 = vld [vmem:[%s1132_s23 + $0x38] sm:$0xff]  }
  0x15   : > { %v1052_v19 = vld [vmem:[%s1132_s23 + $0x70] sm:$0xff]   ;;  %v1054_v21 = vld [vmem:[%s1132_s23 + $0x78] sm:$0xff]  }
  0x16   : > { %975 = vmatpush3.bf16.msra.mxu0 %v1038_v5  ;;  %1011 = vmatpush3.bf16.msra.mxu1 %v1038_v5 }
  0x19   : > { %977 = vmatmul.mubr.msk.bf16.vlgmr.msra.gmra.mxu0 %vm345_vm2, %v1041_v8  ;;  %993 = vmatmul.mubr.msk.bf16.vlgmr.msra.gmra.mxu1 %vm345_vm2, %v1042_v9 }
  0x1a   : > { %980 = vmatprep.mubr.msk.bf16.mxu0 %vm345_vm2, %v1043_v10  ;;  %996 = vmatprep.mubr.msk.bf16.mxu1 %vm345_vm2, %v1044_v11 }
  0x21   : > { %981 = vmatmul.mubr.msk.bf16.gmra.mxu0 %vm345_vm2, %v1045_v12  ;;  %997 = vmatmul.mubr.msk.bf16.gmra.mxu1 %vm345_vm2, %v1046_v13 }
  0x22   : > { %984 = vmatprep.mubr.msk.bf16.mxu0 %vm345_vm2, %v1047_v14  ;;  %1000 = vmatprep.mubr.msk.bf16.mxu1 %vm345_vm2, %v1048_v15 }
  0x29   : > { %985 = vmatmul.mubr.msk.bf16.gmra.mxu0 %vm345_vm2, %v1049_v16  ;;  %1001 = vmatmul.mubr.msk.bf16.gmra.mxu1 %vm345_vm2, %v1050_v17 }
  0x2a   : > { %988 = vmatprep.mubr.msk.bf16.mxu0 %vm345_vm2, %v1051_v18  ;;  %1004 = vmatprep.mubr.msk.bf16.mxu1 %vm345_vm2, %v1052_v19 }
  0x31   : > { %989 = vmatmul.mubr.msk.bf16.gmra.mxu0 %vm345_vm2, %v1053_v20  ;;  %1005 = vmatmul.mubr.msk.bf16.gmra.mxu1 %vm345_vm2, %v1054_v21 }
  0xd9   : > { %v978_v23 = vpop.f32.mrf.mxu0  ;;  %v994_v24 = vpop.f32.mrf.mxu1 }
  0xda   : > { %v444_v25 = vadd.f32 %v978_v23, %v1169_v22  ;;  %v508_v26 = vadd.f32 %v994_v24, %v1169_v22 }
  0xdb   : > { %v435_v27 = vpop.f32.mrf.mxu0  ;;  %v499_v28 = vpop.f32.mrf.mxu1 }
  0xdc   : > { %v564_v29 = vmax.f32 %v444_v25, 0.0  ;;  %v580_v30 = vmax.f32 %v508_v26, 0.0  ;;  %v436_v31 = vadd.f32 %v1169_v22, %v435_v27  ;;  %v500_v32 = vadd.f32 %v1169_v22, %v499_v28 }
  0xdd   : > { %v979_v33 = vpop.f32.mrf.mxu0  ;;  %v995_v34 = vpop.f32.mrf.mxu1 }
  0xde   : > { %v924_v35 = vpack.c.bf16 %v564_v29, %v564_v29  ;;  %v940_v36 = vpack.c.bf16 %v580_v30, %v580_v30  ;;  %v562_v37 = vmax.f32 %v436_v31, 0.0  ;;  %v578_v38 = vmax.f32 %v500_v32, 0.0 }
  0xdf   : > { %v447_v39 = vadd.f32 %v979_v33, %v1169_v22  ;;  %v511_v40 = vadd.f32 %v995_v34, %v1169_v22  ;;  %v438_v41 = vpop.f32.mrf.mxu0  ;;  %v502_v42 = vpop.f32.mrf.mxu1 }
  0xe0   : > { %725 = vst.msk [vmem:[%s1180_s28 + $0x8] sm:$0xf] %vm722_vm3, %v924_v35  ;;  %741 = vst.msk [vmem:[%s1180_s28 + $0x48] sm:$0xf] %vm722_vm3, %v940_v36  ;;  %v922_v43 = vpack.c.bf16 %v562_v37, %v562_v37  ;;  %v938_v44 = vpack.c.bf16 %v578_v38, %v578_v38  ;;  %v439_v45 = vadd.f32 %v1169_v22, %v438_v41 }
  0xe1   : > { %v503_v46 = vadd.f32 %v1169_v22, %v502_v42  ;;  %v565_v47 = vmax.f32 %v447_v39, 0.0  ;;  %v581_v48 = vmax.f32 %v511_v40, 0.0  ;;  %v982_v49 = vpop.f32.mrf.mxu0  ;;  %v998_v50 = vpop.f32.mrf.mxu1 }
  0xe2   : > { %723 = vst.msk [vmem:[%s1180_s28] sm:$0xf] %vm722_vm3, %v922_v43  ;;  %739 = vst.msk [vmem:[%s1180_s28 + $0x40] sm:$0xf] %vm722_vm3, %v938_v44  ;;  %v563_v51 = vmax.f32 %v439_v45, 0.0  ;;  %v460_v53 = vadd.f32 %v982_v49, %v1169_v22  ;;  %v524_v54 = vadd.f32 %v998_v50, %v1169_v22 }
  0xe3   : > { %v579_v52 = vmax.f32 %v503_v46, 0.0  ;;  %v925_v55 = vpack.c.bf16 %v565_v47, %v565_v47  ;;  %v941_v56 = vpack.c.bf16 %v581_v48, %v581_v48  ;;  %v451_v57 = vpop.f32.mrf.mxu0  ;;  %v515_v58 = vpop.f32.mrf.mxu1 }
  0xe4   : > { %v923_v59 = vpack.c.bf16 %v563_v51, %v563_v51  ;;  %v568_v61 = vmax.f32 %v460_v53, 0.0  ;;  %v584_v62 = vmax.f32 %v524_v54, 0.0  ;;  %v452_v63 = vadd.f32 %v1169_v22, %v451_v57 }
  0xe5   : > { %v939_v60 = vpack.c.bf16 %v579_v52, %v579_v52  ;;  %726 = vst.msk [vmem:[%s1180_s28 + $0xc] sm:$0xf] %vm722_vm3, %v925_v55  ;;  %742 = vst.msk [vmem:[%s1180_s28 + $0x4c] sm:$0xf] %vm722_vm3, %v941_v56  ;;  %v516_v0 = vadd.f32 %v1169_v22, %v515_v58  ;;  %v983_v1 = vpop.f32.mrf.mxu0  ;;  %v999_v2 = vpop.f32.mrf.mxu1 }
  0xe6   : > { %724 = vst.msk [vmem:[%s1180_s28 + $0x4] sm:$0xf] %vm722_vm3, %v923_v59  ;;  %v928_v3 = vpack.c.bf16 %v568_v61, %v568_v61  ;;  %v944_v4 = vpack.c.bf16 %v584_v62, %v584_v62  ;;  %v463_v5 = vadd.f32 %v983_v1, %v1169_v22  ;;  %v527_v6 = vadd.f32 %v999_v2, %v1169_v22 }
  0xe7   : > { %740 = vst.msk [vmem:[%s1180_s28 + $0x44] sm:$0xf] %vm722_vm3, %v939_v60  ;;  %v566_v7 = vmax.f32 %v452_v63, 0.0  ;;  %v582_v8 = vmax.f32 %v516_v0, 0.0  ;;  %v454_v9 = vpop.f32.mrf.mxu0  ;;  %v518_v10 = vpop.f32.mrf.mxu1 }
  0xe8   : > { %729 = vst.msk [vmem:[%s1180_s28 + $0x18] sm:$0xf] %vm722_vm3, %v928_v3  ;;  %745 = vst.msk [vmem:[%s1180_s28 + $0x58] sm:$0xf] %vm722_vm3, %v944_v4  ;;  %v569_v11 = vmax.f32 %v463_v5, 0.0  ;;  %v585_v12 = vmax.f32 %v527_v6, 0.0  ;;  %v455_v13 = vadd.f32 %v1169_v22, %v454_v9  ;;  %v519_v14 = vadd.f32 %v1169_v22, %v518_v10 }
  0xe9   : > { %v926_v15 = vpack.c.bf16 %v566_v7, %v566_v7  ;;  %v942_v16 = vpack.c.bf16 %v582_v8, %v582_v8  ;;  %v986_v17 = vpop.f32.mrf.mxu0  ;;  %v1002_v18 = vpop.f32.mrf.mxu1 }
  0xea   : > { %v929_v19 = vpack.c.bf16 %v569_v11, %v569_v11  ;;  %v945_v20 = vpack.c.bf16 %v585_v12, %v585_v12  ;;  %v567_v21 = vmax.f32 %v455_v13, 0.0  ;;  %v583_v23 = vmax.f32 %v519_v14, 0.0 }
  0xeb   : > { %727 = vst.msk [vmem:[%s1180_s28 + $0x10] sm:$0xf] %vm722_vm3, %v926_v15  ;;  %743 = vst.msk [vmem:[%s1180_s28 + $0x50] sm:$0xf] %vm722_vm3, %v942_v16  ;;  %v476_v24 = vadd.f32 %v986_v17, %v1169_v22  ;;  %v540_v25 = vadd.f32 %v1002_v18, %v1169_v22  ;;  %v467_v26 = vpop.f32.mrf.mxu0  ;;  %v531_v27 = vpop.f32.mrf.mxu1 }
  0xec   : > { %730 = vst.msk [vmem:[%s1180_s28 + $0x1c] sm:$0xf] %vm722_vm3, %v929_v19  ;;  %746 = vst.msk [vmem:[%s1180_s28 + $0x5c] sm:$0xf] %vm722_vm3, %v945_v20  ;;  %v927_v28 = vpack.c.bf16 %v567_v21, %v567_v21  ;;  %v943_v29 = vpack.c.bf16 %v583_v23, %v583_v23  ;;  %v468_v30 = vadd.f32 %v1169_v22, %v467_v26 }
  0xed   : > { %v532_v31 = vadd.f32 %v1169_v22, %v531_v27  ;;  %v572_v32 = vmax.f32 %v476_v24, 0.0  ;;  %v588_v33 = vmax.f32 %v540_v25, 0.0  ;;  %v987_v34 = vpop.f32.mrf.mxu0  ;;  %v1003_v35 = vpop.f32.mrf.mxu1 }
  0xee   : > { %728 = vst.msk [vmem:[%s1180_s28 + $0x14] sm:$0xf] %vm722_vm3, %v927_v28  ;;  %744 = vst.msk [vmem:[%s1180_s28 + $0x54] sm:$0xf] %vm722_vm3, %v943_v29  ;;  %v570_v36 = vmax.f32 %v468_v30, 0.0  ;;  %v479_v38 = vadd.f32 %v987_v34, %v1169_v22  ;;  %v543_v39 = vadd.f32 %v1003_v35, %v1169_v22 }
  0xef   : > { %v586_v37 = vmax.f32 %v532_v31, 0.0  ;;  %v932_v40 = vpack.c.bf16 %v572_v32, %v572_v32  ;;  %v948_v41 = vpack.c.bf16 %v588_v33, %v588_v33  ;;  %v470_v42 = vpop.f32.mrf.mxu0  ;;  %v534_v43 = vpop.f32.mrf.mxu1 }
  0xf0   : > { %v930_v44 = vpack.c.bf16 %v570_v36, %v570_v36  ;;  %v573_v46 = vmax.f32 %v479_v38, 0.0  ;;  %v589_v47 = vmax.f32 %v543_v39, 0.0  ;;  %v471_v48 = vadd.f32 %v1169_v22, %v470_v42 }
  0xf1   : > { %v946_v45 = vpack.c.bf16 %v586_v37, %v586_v37  ;;  %733 = vst.msk [vmem:[%s1180_s28 + $0x28] sm:$0xf] %vm722_vm3, %v932_v40  ;;  %749 = vst.msk [vmem:[%s1180_s28 + $0x68] sm:$0xf] %vm722_vm3, %v948_v41  ;;  %v535_v49 = vadd.f32 %v1169_v22, %v534_v43  ;;  %v990_v50 = vpop.f32.mrf.mxu0  ;;  %v1006_v51 = vpop.f32.mrf.mxu1 }
  0xf2   : > { %731 = vst.msk [vmem:[%s1180_s28 + $0x20] sm:$0xf] %vm722_vm3, %v930_v44  ;;  %v933_v52 = vpack.c.bf16 %v573_v46, %v573_v46  ;;  %v949_v53 = vpack.c.bf16 %v589_v47, %v589_v47  ;;  %v492_v54 = vadd.f32 %v990_v50, %v1169_v22  ;;  %v556_v55 = vadd.f32 %v1006_v51, %v1169_v22 }
  0xf3   : > { %747 = vst.msk [vmem:[%s1180_s28 + $0x60] sm:$0xf] %vm722_vm3, %v946_v45  ;;  %v571_v56 = vmax.f32 %v471_v48, 0.0  ;;  %v587_v57 = vmax.f32 %v535_v49, 0.0  ;;  %v483_v58 = vpop.f32.mrf.mxu0  ;;  %v547_v59 = vpop.f32.mrf.mxu1 }
  0xf4   : > { %734 = vst.msk [vmem:[%s1180_s28 + $0x2c] sm:$0xf] %vm722_vm3, %v933_v52  ;;  %750 = vst.msk [vmem:[%s1180_s28 + $0x6c] sm:$0xf] %vm722_vm3, %v949_v53  ;;  %v576_v60 = vmax.f32 %v492_v54, 0.0  ;;  %v592_v61 = vmax.f32 %v556_v55, 0.0  ;;  %v484_v62 = vadd.f32 %v1169_v22, %v483_v58  ;;  %v548_v63 = vadd.f32 %v1169_v22, %v547_v59 }
  0xf5   : > { %v931_v0 = vpack.c.bf16 %v571_v56, %v571_v56  ;;  %v947_v1 = vpack.c.bf16 %v587_v57, %v587_v57  ;;  %v991_v2 = vpop.f32.mrf.mxu0  ;;  %v1007_v3 = vpop.f32.mrf.mxu1 }
  0xf6   : > { %v936_v4 = vpack.c.bf16 %v576_v60, %v576_v60  ;;  %v952_v5 = vpack.c.bf16 %v592_v61, %v592_v61  ;;  %v574_v6 = vmax.f32 %v484_v62, 0.0  ;;  %v590_v7 = vmax.f32 %v548_v63, 0.0 }
  0xf7   : > { %732 = vst.msk [vmem:[%s1180_s28 + $0x24] sm:$0xf] %vm722_vm3, %v931_v0  ;;  %748 = vst.msk [vmem:[%s1180_s28 + $0x64] sm:$0xf] %vm722_vm3, %v947_v1  ;;  %v495_v8 = vadd.f32 %v991_v2, %v1169_v22  ;;  %v559_v9 = vadd.f32 %v1007_v3, %v1169_v22  ;;  %v486_v10 = vpop.f32.mrf.mxu0  ;;  %v550_v11 = vpop.f32.mrf.mxu1 }
  0xf8   : > { %737 = vst.msk [vmem:[%s1180_s28 + $0x38] sm:$0xf] %vm722_vm3, %v936_v4  ;;  %753 = vst.msk [vmem:[%s1180_s28 + $0x78] sm:$0xf] %vm722_vm3, %v952_v5  ;;  %v934_v12 = vpack.c.bf16 %v574_v6, %v574_v6  ;;  %v950_v13 = vpack.c.bf16 %v590_v7, %v590_v7  ;;  %v487_v14 = vadd.f32 %v1169_v22, %v486_v10 }
  0xf9   : > { %v551_v15 = vadd.f32 %v1169_v22, %v550_v11  ;;  %v577_v16 = vmax.f32 %v495_v8, 0.0  ;;  %v593_v17 = vmax.f32 %v559_v9, 0.0 }
  0xfa   : > { %735 = vst.msk [vmem:[%s1180_s28 + $0x30] sm:$0xf] %vm722_vm3, %v934_v12  ;;  %751 = vst.msk [vmem:[%s1180_s28 + $0x70] sm:$0xf] %vm722_vm3, %v950_v13  ;;  %v575_v18 = vmax.f32 %v487_v14, 0.0 }
  0xfb   : > { %v591_v19 = vmax.f32 %v551_v15, 0.0  ;;  %v937_v20 = vpack.c.bf16 %v577_v16, %v577_v16  ;;  %v953_v21 = vpack.c.bf16 %v593_v17, %v593_v17 }
  0xfc   : > { %v935_v23 = vpack.c.bf16 %v575_v18, %v575_v18 }
  0xfd   : > { %v951_v24 = vpack.c.bf16 %v591_v19, %v591_v19  ;;  %738 = vst.msk [vmem:[%s1180_s28 + $0x3c] sm:$0xf] %vm722_vm3, %v937_v20  ;;  %754 = vst.msk [vmem:[%s1180_s28 + $0x7c] sm:$0xf] %vm722_vm3, %v953_v21 }
  0xfe   : > { %736 = vst.msk [vmem:[%s1180_s28 + $0x34] sm:$0xf] %vm722_vm3, %v935_v23 }
  0xff   : > { %752 = vst.msk [vmem:[%s1180_s28 + $0x74] sm:$0xf] %vm722_vm3, %v951_v24 }
 0x100 PF: > { %s13_s14 = sadd.s32 1, %s1077_s14   ;;  %s1287_s12 = smov %s1073_s13 }
 0x101   : > { %p10_p5 = scmp.ge.s32.totalorder %s13_s14, 4   ;;  %s1288_s13 = smov %s1290_s15 }
 0x103   :  { %12 = sbr.rel (!%p10_p5) target bundleno = 2 (0x2), region = 62 }

// kernel: baseline1net_forward.18
= control target key start
LH: loop header
LB: loop body
LE: loop exit
PB: predicated region body
PF: predicated region fallthrough
CT: control target
= control target key end

     0   :  { %s1403_s15 = smov 0   ;;  %s1405_s16 = smov 0   ;;  %s1738_s0 = inlined_call_operand.vmem [shape: bf16[2,256,72], index: 0, kind: input, shape index: {}]   ;;  %s1739_s1 = inlined_call_operand.vmem [shape: bf16[72,8], index: 1, kind: input, shape index: {}]   ;;  %s1740_s2 = inlined_call_operand.vmem [shape: f32[1,8], index: 2, kind: input, shape index: {}]   ;;  %s1741_s3 = inlined_call_operand.vmem [shape: bf16[2,256,8], index: 3, kind: input, shape index: {}]   ;;  %s1742_s4 = inlined_call_operand.vmem [shape: bf16[2,256,8], index: 4, kind: output, shape index: {}]  }
   0x1   :  { %s1407_s17 = smov 0  }
   0x2 LB: > { %s26_s18 = sadd.s32 1, %s1372_s16  ;;  %p1041_p0 = scmp.ge.s32.totalorder %s1376_s17, 1  ;;  %s1376_s17 = sphi %s1407_s17, %s14_s17   ;;  %s1372_s16 = sphi %s1405_s16, %s1745_s16   ;;  %s1368_s15 = sphi %s1403_s15, %s1744_s15  }
   0x3   : > { %p28_p1 = scmp.ge.s32.totalorder %s26_s18, 2  ;;  %p200_p2 = scmp.lt.s32.totalorder %s1376_s17, 3 }
   0x5   : > { %s1747_s18 = smov (%p28_p1, %s26_s18), 0  ;;  %p201_p3 = pnand %p1041_p0, %p200_p2 }
   0x6   : > { %p244_p4 = scmp.lt.s32.totalorder (!%p201_p3), %s1368_s15, 1 }
   0x7   : > { %204 = sbr.rel (%p201_p3) target bundleno = 267 (0x10b), region = 36 }
   0xc   : > { %v1333_v0 = vld [vmem:[%s1739_s1 + $0x20] ss:$0 sps:$4 sm:$0xff]   ;;  %vm478_vm0 = vcmask 1043456   ;;  %v1334_v1 = vld [vmem:[%s1739_s1 + $0x18] sm:$0xff]   ;;  %v1335_v3 = vld [vmem:[%s1739_s1 + $0x10] sm:$0xff]   ;;  %s1749_s15 = smov (!%p244_p4, %s1368_s15), 1 }
   0xd   : > { %1307 = vmatprep.subr.msk.bf16.mxu0 %vm478_vm0, %v1333_v0  ;;  %1308 = vmatprep.subr.msk.bf16.mxu1 %vm478_vm0, %v1333_v0  ;;  %v480_v2 = vsel %vm478_vm0, %v1333_v0, 0  ;;  %s1430_s25 = sshll.u32 %s1749_s15, 7  ;;  %v1336_v4 = vld [vmem:[%s1739_s1 + $0x8] sm:$0xff]   ;;  %vm429_vm1 = vcmask 588800   ;;  %v1337_v7 = vld [vmem:[%s1739_s1] sm:$0xff]   ;;  %vm899_vm2 = vcmask 60416  }
   0xe   : > { %1256 = vmatpush3.bf16.msra.mxu0 %v480_v2  ;;  %1302 = vmatpush3.bf16.msra.mxu1 %v480_v2  ;;  %s1439_s30 = scalar_lea.vmem %s1738_s0, %s1430_s25  ;;  %s1480_s9 = scalar_lea.vmem %s1741_s3, %s1430_s25  ;;  %v1529_v42 = vld [vmem:[%s1740_s2] ss:$0 sm:$0xff] }
   0xf   : > { %1257 = vmatprep.subr.bf16.mxu0 %v1334_v1  ;;  %1298 = vmatprep.subr.bf16.mxu1 %v1334_v1  ;;  %v1338_v5 = vld [vmem:[%s1439_s30] sm:$0xff]   ;;  %v1340_v8 = vld [vmem:[%s1439_s30 + $0x8] sm:$0xff]   ;;  %v1342_v10 = vld [vmem:[%s1439_s30 + $0x10] sm:$0xff]   ;;  %s1573_s14 = scalar_lea.vmem %s1742_s4, %s1430_s25 }
  0x10   : > { %v1339_v6 = vld [vmem:[%s1439_s30 + $0x40] sm:$0xff]   ;;  %1265 = vmatprep.mubr.msk.bf16.mxu0 %vm429_vm1, %v1338_v5  ;;  %v1341_v9 = vld [vmem:[%s1439_s30 + $0x48] sm:$0xff]   ;;  %v1343_v11 = vld [vmem:[%s1439_s30 + $0x50] sm:$0xff]  }
  0x11   : > { %1281 = vmatprep.mubr.msk.bf16.mxu1 %vm429_vm1, %v1339_v6  ;;  %v1344_v12 = vld [vmem:[%s1439_s30 + $0x18] sm:$0xff]   ;;  %v1346_v14 = vld [vmem:[%s1439_s30 + $0x20] sm:$0xff]   ;;  %v1348_v16 = vld [vmem:[%s1439_s30 + $0x28] sm:$0xff]  }
  0x12   : > { %1258 = vmatpush3.bf16.msra.mxu0 %v1334_v1  ;;  %1303 = vmatpush3.bf16.msra.mxu1 %v1334_v1  ;;  %v1345_v13 = vld [vmem:[%s1439_s30 + $0x58] sm:$0xff]   ;;  %v1347_v15 = vld [vmem:[%s1439_s30 + $0x60] sm:$0xff]   ;;  %v1349_v17 = vld [vmem:[%s1439_s30 + $0x68] sm:$0xff]  }
  0x13   : > { %1259 = vmatprep.subr.bf16.mxu0 %v1335_v3  ;;  %1299 = vmatprep.subr.bf16.mxu1 %v1335_v3  ;;  %v1350_v18 = vld [vmem:[%s1439_s30 + $0x30] sm:$0xff]   ;;  %v1352_v20 = vld [vmem:[%s1439_s30 + $0x38] sm:$0xff]   ;;  %v1483_v22 = vld [vmem:[%s1480_s9 + $0x8] sm:$0xff]  }
  0x14   : > { %v1351_v19 = vld [vmem:[%s1439_s30 + $0x70] sm:$0xff]   ;;  %v1353_v21 = vld [vmem:[%s1439_s30 + $0x78] sm:$0xff]   ;;  %v1486_v23 = vld [vmem:[%s1480_s9 + $0x48] sm:$0xff]   ;;  %v1161_v30 = vunpack.c.l.bf16 %v1483_v22  ;;  %v1162_v35 = vunpack.c.h.bf16 %v1483_v22 }
  0x15   : > { %v1489_v24 = vld [vmem:[%s1480_s9] sm:$0xff]   ;;  %v1495_v26 = vld [vmem:[%s1480_s9 + $0x18] sm:$0xff]   ;;  %v1501_v28 = vld [vmem:[%s1480_s9 + $0x10] sm:$0xff]   ;;  %v1193_v31 = vunpack.c.l.bf16 %v1486_v23  ;;  %v1194_v36 = vunpack.c.h.bf16 %v1486_v23 }
  0x16   : > { %1260 = vmatpush3.bf16.msra.mxu0 %v1335_v3  ;;  %1304 = vmatpush3.bf16.msra.mxu1 %v1335_v3  ;;  %v1492_v25 = vld [vmem:[%s1480_s9 + $0x40] sm:$0xff]   ;;  %v1498_v27 = vld [vmem:[%s1480_s9 + $0x58] sm:$0xff]   ;;  %v1504_v29 = vld [vmem:[%s1480_s9 + $0x50] sm:$0xff]   ;;  %v1157_v32 = vunpack.c.l.bf16 %v1489_v24  ;;  %v1158_v37 = vunpack.c.h.bf16 %v1489_v24  ;;  %v1169_v43 = vunpack.c.l.bf16 %v1495_v26  ;;  %v1165_v45 = vunpack.c.l.bf16 %v1501_v28 }
  0x17   : > { %1261 = vmatprep.subr.bf16.mxu0 %v1336_v4  ;;  %1300 = vmatprep.subr.bf16.mxu1 %v1336_v4  ;;  %v1189_v33 = vunpack.c.l.bf16 %v1492_v25  ;;  %v1511_v34 = vld [vmem:[%s1480_s9 + $0x28] sm:$0xff]   ;;  %v1190_v38 = vunpack.c.h.bf16 %v1492_v25  ;;  %v1521_v40 = vld [vmem:[%s1480_s9 + $0x20] sm:$0xff]   ;;  %v1201_v44 = vunpack.c.l.bf16 %v1498_v27  ;;  %v1197_v46 = vunpack.c.l.bf16 %v1504_v29  ;;  %v1540_v51 = vld [vmem:[%s1480_s9 + $0x38] sm:$0xff]  }
  0x18   : > { %v1518_v39 = vld [vmem:[%s1480_s9 + $0x68] sm:$0xff]   ;;  %v1524_v41 = vld [vmem:[%s1480_s9 + $0x60] sm:$0xff]   ;;  %v1170_v47 = vunpack.c.h.bf16 %v1495_v26  ;;  %v1202_v48 = vunpack.c.h.bf16 %v1498_v27  ;;  %v1166_v49 = vunpack.c.h.bf16 %v1501_v28  ;;  %v1198_v50 = vunpack.c.h.bf16 %v1504_v29  ;;  %v1543_v52 = vld [vmem:[%s1480_s9 + $0x78] sm:$0xff]  }
  0x19   : > { %v1177_v55 = vunpack.c.l.bf16 %v1511_v34  ;;  %v1209_v56 = vunpack.c.l.bf16 %v1518_v39  ;;  %v1173_v57 = vunpack.c.l.bf16 %v1521_v40  ;;  %v1205_v58 = vunpack.c.l.bf16 %v1524_v41  ;;  %v1554_v63 = vld [vmem:[%s1480_s9 + $0x30] sm:$0xff]  }
  0x1a   : > { %1262 = vmatpush3.bf16.msra.mxu0 %v1336_v4  ;;  %1305 = vmatpush3.bf16.msra.mxu1 %v1336_v4  ;;  %v1178_v61 = vunpack.c.h.bf16 %v1511_v34  ;;  %v1210_v62 = vunpack.c.h.bf16 %v1518_v39  ;;  %v1557_v0 = vld [vmem:[%s1480_s9 + $0x70] sm:$0xff]   ;;  %v1174_v3 = vunpack.c.h.bf16 %v1521_v40  ;;  %v1206_v4 = vunpack.c.h.bf16 %v1524_v41 }
  0x1b   : > { %1263 = vmatprep.subr.bf16.mxu0 %v1337_v7  ;;  %1301 = vmatprep.subr.bf16.mxu1 %v1337_v7  ;;  %v1185_v5 = vunpack.c.l.bf16 %v1540_v51  ;;  %v1217_v6 = vunpack.c.l.bf16 %v1543_v52 }
  0x1e   : > { %1264 = vmatpush3.bf16.msra.mxu0 %v1337_v7  ;;  %1306 = vmatpush3.bf16.msra.mxu1 %v1337_v7 }
  0x21   : > { %1266 = vmatmul.mubr.msk.bf16.vlgmr.msra.gmra.mxu0 %vm429_vm1, %v1340_v8  ;;  %1282 = vmatmul.mubr.msk.bf16.vlgmr.msra.gmra.mxu1 %vm429_vm1, %v1341_v9 }
  0x22   : > { %1269 = vmatprep.mubr.msk.bf16.mxu0 %vm429_vm1, %v1342_v10  ;;  %1285 = vmatprep.mubr.msk.bf16.mxu1 %vm429_vm1, %v1343_v11 }
  0x29   : > { %1270 = vmatmul.mubr.msk.bf16.gmra.mxu0 %vm429_vm1, %v1344_v12  ;;  %1286 = vmatmul.mubr.msk.bf16.gmra.mxu1 %vm429_vm1, %v1345_v13  ;;  %v1181_v13 = vunpack.c.l.bf16 %v1554_v63 }
  0x2a   : > { %1273 = vmatprep.mubr.msk.bf16.mxu0 %vm429_vm1, %v1346_v14  ;;  %1289 = vmatprep.mubr.msk.bf16.mxu1 %vm429_vm1, %v1347_v15  ;;  %v1213_v14 = vunpack.c.l.bf16 %v1557_v0  ;;  %v1186_v15 = vunpack.c.h.bf16 %v1540_v51 }
  0x31   : > { %1274 = vmatmul.mubr.msk.bf16.gmra.mxu0 %vm429_vm1, %v1348_v16  ;;  %1290 = vmatmul.mubr.msk.bf16.gmra.mxu1 %vm429_vm1, %v1349_v17  ;;  %v1218_v16 = vunpack.c.h.bf16 %v1543_v52 }
  0x32   : > { %1277 = vmatprep.mubr.msk.bf16.mxu0 %vm429_vm1, %v1350_v18  ;;  %1293 = vmatprep.mubr.msk.bf16.mxu1 %vm429_vm1, %v1351_v19 }
  0x39   : > { %1278 = vmatmul.mubr.msk.bf16.gmra.mxu0 %vm429_vm1, %v1352_v20  ;;  %1294 = vmatmul.mubr.msk.bf16.gmra.mxu1 %vm429_vm1, %v1353_v21 }
  0xe1   : > { %v1267_v53 = vpop.f32.mrf.mxu0  ;;  %v1283_v54 = vpop.f32.mrf.mxu1 }
  0xe2   : > { %v525_v59 = vadd.f32 %v1267_v53, %v1529_v42  ;;  %v589_v60 = vadd.f32 %v1283_v54, %v1529_v42 }
  0xe3   : > { %v516_v1 = vpop.f32.mrf.mxu0  ;;  %v580_v2 = vpop.f32.mrf.mxu1 }
  0xe4   : > { %v645_v7 = vmax.f32 %v525_v59, 0.0  ;;  %v661_v8 = vmax.f32 %v589_v60, 0.0  ;;  %v517_v9 = vadd.f32 %v1529_v42, %v516_v1  ;;  %v581_v10 = vadd.f32 %v1529_v42, %v580_v2 }
  0xe5   : > { %v1268_v11 = vpop.f32.mrf.mxu0  ;;  %v1284_v12 = vpop.f32.mrf.mxu1 }
  0xe6   : > { %v741_v17 = vadd.f32 %v1161_v30, %v645_v7  ;;  %v757_v18 = vadd.f32 %v1193_v31, %v661_v8  ;;  %v643_v19 = vmax.f32 %v517_v9, 0.0  ;;  %v659_v20 = vmax.f32 %v581_v10, 0.0 }
  0xe7   : > { %v528_v21 = vadd.f32 %v1268_v11, %v1529_v42  ;;  %v592_v53 = vadd.f32 %v1284_v12, %v1529_v42  ;;  %v519_v54 = vpop.f32.mrf.mxu0  ;;  %v583_v59 = vpop.f32.mrf.mxu1  ;;  %v1214_v30 = vunpack.c.h.bf16 %v1557_v0 }
  0xe8   : > { %v1125_v31 = vpack.c.bf16 %v741_v17, %v741_v17  ;;  %v1141_v1 = vpack.c.bf16 %v757_v18, %v757_v18  ;;  %v739_v2 = vadd.f32 %v1157_v32, %v643_v19  ;;  %v755_v7 = vadd.f32 %v1189_v33, %v659_v20 }
  0xe9   : > { %v646_v8 = vmax.f32 %v528_v21, 0.0  ;;  %v662_v9 = vmax.f32 %v592_v53, 0.0  ;;  %v520_v10 = vadd.f32 %v1529_v42, %v519_v54  ;;  %v584_v11 = vadd.f32 %v1529_v42, %v583_v59  ;;  %v1271_v12 = vpop.f32.mrf.mxu0  ;;  %v1287_v60 = vpop.f32.mrf.mxu1 }
  0xea   : > { %902 = vst.msk [vmem:[%s1573_s14 + $0x8] sm:$0xf] %vm899_vm2, %v1125_v31  ;;  %918 = vst.msk [vmem:[%s1573_s14 + $0x48] sm:$0xf] %vm899_vm2, %v1141_v1  ;;  %v1123_v17 = vpack.c.bf16 %v739_v2, %v739_v2  ;;  %v1139_v18 = vpack.c.bf16 %v755_v7, %v755_v7  ;;  %v541_v32 = vadd.f32 %v1271_v12, %v1529_v42 }
  0xeb   : > { %v605_v33 = vadd.f32 %v1287_v60, %v1529_v42  ;;  %v742_v19 = vadd.f32 %v1162_v35, %v646_v8  ;;  %v758_v20 = vadd.f32 %v1194_v36, %v662_v9  ;;  %v644_v21 = vmax.f32 %v520_v10, 0.0  ;;  %v532_v54 = vpop.f32.mrf.mxu0  ;;  %v596_v59 = vpop.f32.mrf.mxu1 }
  0xec   : > { %v660_v53 = vmax.f32 %v584_v11, 0.0  ;;  %900 = vst.msk [vmem:[%s1573_s14] sm:$0xf] %vm899_vm2, %v1123_v17  ;;  %916 = vst.msk [vmem:[%s1573_s14 + $0x40] sm:$0xf] %vm899_vm2, %v1139_v18  ;;  %v649_v31 = vmax.f32 %v541_v32, 0.0  ;;  %v533_v60 = vadd.f32 %v1529_v42, %v532_v54  ;;  %v597_v22 = vadd.f32 %v1529_v42, %v596_v59 }
  0xed   : > { %v665_v1 = vmax.f32 %v605_v33, 0.0  ;;  %v1126_v35 = vpack.c.bf16 %v742_v19, %v742_v19  ;;  %v1142_v2 = vpack.c.bf16 %v758_v20, %v758_v20  ;;  %v740_v23 = vadd.f32 %v1158_v37, %v644_v21  ;;  %v1272_v7 = vpop.f32.mrf.mxu0  ;;  %v1288_v8 = vpop.f32.mrf.mxu1 }
  0xee   : > { %v756_v36 = vadd.f32 %v1190_v38, %v660_v53  ;;  %v745_v9 = vadd.f32 %v1169_v43, %v649_v31  ;;  %v647_v11 = vmax.f32 %v533_v60, 0.0  ;;  %v663_v12 = vmax.f32 %v597_v22, 0.0 }
  0xef   : > { %v761_v10 = vadd.f32 %v1201_v44, %v665_v1  ;;  %903 = vst.msk [vmem:[%s1573_s14 + $0xc] sm:$0xf] %vm899_vm2, %v1126_v35  ;;  %919 = vst.msk [vmem:[%s1573_s14 + $0x4c] sm:$0xf] %vm899_vm2, %v1142_v2  ;;  %v1124_v24 = vpack.c.bf16 %v740_v23, %v740_v23  ;;  %v544_v25 = vadd.f32 %v1272_v7, %v1529_v42  ;;  %v535_v43 = vpop.f32.mrf.mxu0  ;;  %v599_v17 = vpop.f32.mrf.mxu1 }
  0xf0   : > { %v1140_v37 = vpack.c.bf16 %v756_v36, %v756_v36  ;;  %v608_v38 = vadd.f32 %v1288_v8, %v1529_v42  ;;  %v1129_v18 = vpack.c.bf16 %v745_v9, %v745_v9  ;;  %v743_v44 = vadd.f32 %v1165_v45, %v647_v11 }
  0xf1   : > { %v1145_v32 = vpack.c.bf16 %v761_v10, %v761_v10  ;;  %v759_v33 = vadd.f32 %v1197_v46, %v663_v12  ;;  %901 = vst.msk [vmem:[%s1573_s14 + $0x4] sm:$0xf] %vm899_vm2, %v1124_v24  ;;  %v650_v19 = vmax.f32 %v544_v25, 0.0  ;;  %v536_v21 = vadd.f32 %v1529_v42, %v535_v43  ;;  %v1275_v54 = vpop.f32.mrf.mxu0  ;;  %v1291_v59 = vpop.f32.mrf.mxu1 }
  0xf2   : > { %917 = vst.msk [vmem:[%s1573_s14 + $0x44] sm:$0xf] %vm899_vm2, %v1140_v37  ;;  %v666_v20 = vmax.f32 %v608_v38, 0.0  ;;  %v600_v53 = vadd.f32 %v1529_v42, %v599_v17  ;;  %906 = vst.msk [vmem:[%s1573_s14 + $0x18] sm:$0xf] %vm899_vm2, %v1129_v18  ;;  %v1127_v45 = vpack.c.bf16 %v743_v44, %v743_v44  ;;  %v557_v31 = vadd.f32 %v1275_v54, %v1529_v42 }
  0xf3   : > { %922 = vst.msk [vmem:[%s1573_s14 + $0x58] sm:$0xf] %vm899_vm2, %v1145_v32  ;;  %v1143_v46 = vpack.c.bf16 %v759_v33, %v759_v33  ;;  %v621_v1 = vadd.f32 %v1291_v59, %v1529_v42  ;;  %v746_v60 = vadd.f32 %v1170_v47, %v650_v19  ;;  %v648_v35 = vmax.f32 %v536_v21, 0.0  ;;  %v548_v23 = vpop.f32.mrf.mxu0  ;;  %v612_v36 = vpop.f32.mrf.mxu1 }
  0xf4   : > { %v762_v22 = vadd.f32 %v1202_v48, %v666_v20  ;;  %v664_v2 = vmax.f32 %v600_v53, 0.0  ;;  %904 = vst.msk [vmem:[%s1573_s14 + $0x10] sm:$0xf] %vm899_vm2, %v1127_v45  ;;  %v653_v7 = vmax.f32 %v557_v31, 0.0  ;;  %v549_v9 = vadd.f32 %v1529_v42, %v548_v23 }
  0xf5   : > { %920 = vst.msk [vmem:[%s1573_s14 + $0x50] sm:$0xf] %vm899_vm2, %v1143_v46  ;;  %v669_v8 = vmax.f32 %v621_v1, 0.0  ;;  %v613_v26 = vadd.f32 %v1529_v42, %v612_v36  ;;  %v1130_v47 = vpack.c.bf16 %v746_v60, %v746_v60  ;;  %v744_v27 = vadd.f32 %v1166_v49, %v648_v35  ;;  %v1276_v11 = vpop.f32.mrf.mxu0  ;;  %v1292_v12 = vpop.f32.mrf.mxu1 }
  0xf6   : > { %v1146_v10 = vpack.c.bf16 %v762_v22, %v762_v22  ;;  %v760_v48 = vadd.f32 %v1198_v50, %v664_v2  ;;  %v749_v24 = vadd.f32 %v1177_v55, %v653_v7  ;;  %v651_v25 = vmax.f32 %v549_v9, 0.0 }
  0xf7   : > { %v765_v37 = vadd.f32 %v1209_v56, %v669_v8  ;;  %v667_v38 = vmax.f32 %v613_v26, 0.0  ;;  %907 = vst.msk [vmem:[%s1573_s14 + $0x1c] sm:$0xf] %vm899_vm2, %v1130_v47  ;;  %v1128_v28 = vpack.c.bf16 %v744_v27, %v744_v27  ;;  %v560_v29 = vadd.f32 %v1276_v11, %v1529_v42  ;;  %v551_v55 = vpop.f32.mrf.mxu0  ;;  %v615_v43 = vpop.f32.mrf.mxu1 }
  0xf8   : > { %923 = vst.msk [vmem:[%s1573_s14 + $0x5c] sm:$0xf] %vm899_vm2, %v1146_v10  ;;  %v1144_v49 = vpack.c.bf16 %v760_v48, %v760_v48  ;;  %v624_v50 = vadd.f32 %v1292_v12, %v1529_v42  ;;  %v1133_v17 = vpack.c.bf16 %v749_v24, %v749_v24  ;;  %v747_v56 = vadd.f32 %v1173_v57, %v651_v25 }
  0xf9   : > { %v1149_v18 = vpack.c.bf16 %v765_v37, %v765_v37  ;;  %v763_v32 = vadd.f32 %v1205_v58, %v667_v38  ;;  %905 = vst.msk [vmem:[%s1573_s14 + $0x14] sm:$0xf] %vm899_vm2, %v1128_v28  ;;  %v654_v44 = vmax.f32 %v560_v29, 0.0  ;;  %v552_v19 = vadd.f32 %v1529_v42, %v551_v55  ;;  %v1279_v21 = vpop.f32.mrf.mxu0  ;;  %v1295_v53 = vpop.f32.mrf.mxu1 }
  0xfa   : > { %921 = vst.msk [vmem:[%s1573_s14 + $0x54] sm:$0xf] %vm899_vm2, %v1144_v49  ;;  %v670_v33 = vmax.f32 %v624_v50, 0.0  ;;  %v616_v20 = vadd.f32 %v1529_v42, %v615_v43  ;;  %910 = vst.msk [vmem:[%s1573_s14 + $0x28] sm:$0xf] %vm899_vm2, %v1133_v17  ;;  %v1131_v57 = vpack.c.bf16 %v747_v56, %v747_v56  ;;  %v573_v54 = vadd.f32 %v1279_v21, %v1529_v42 }
  0xfb   : > { %926 = vst.msk [vmem:[%s1573_s14 + $0x68] sm:$0xf] %vm899_vm2, %v1149_v18  ;;  %v1147_v58 = vpack.c.bf16 %v763_v32, %v763_v32  ;;  %v637_v59 = vadd.f32 %v1295_v53, %v1529_v42  ;;  %v750_v45 = vadd.f32 %v1178_v61, %v654_v44  ;;  %v652_v31 = vmax.f32 %v552_v19, 0.0  ;;  %v564_v60 = vpop.f32.mrf.mxu0  ;;  %v628_v22 = vpop.f32.mrf.mxu1 }
  0xfc   : > { %v766_v46 = vadd.f32 %v1210_v62, %v670_v33  ;;  %v668_v1 = vmax.f32 %v616_v20, 0.0  ;;  %908 = vst.msk [vmem:[%s1573_s14 + $0x20] sm:$0xf] %vm899_vm2, %v1131_v57  ;;  %v657_v35 = vmax.f32 %v573_v54, 0.0  ;;  %v565_v23 = vadd.f32 %v1529_v42, %v564_v60 }
  0xfd   : > { %924 = vst.msk [vmem:[%s1573_s14 + $0x60] sm:$0xf] %vm899_vm2, %v1147_v58  ;;  %v673_v2 = vmax.f32 %v637_v59, 0.0  ;;  %v629_v34 = vadd.f32 %v1529_v42, %v628_v22  ;;  %v1134_v61 = vpack.c.bf16 %v750_v45, %v750_v45  ;;  %v748_v39 = vadd.f32 %v1174_v3, %v652_v31  ;;  %v1280_v7 = vpop.f32.mrf.mxu0  ;;  %v1296_v8 = vpop.f32.mrf.mxu1 }
  0xfe   : > { %v1150_v36 = vpack.c.bf16 %v766_v46, %v766_v46  ;;  %v764_v62 = vadd.f32 %v1206_v4, %v668_v1  ;;  %v753_v9 = vadd.f32 %v1185_v5, %v657_v35  ;;  %v655_v47 = vmax.f32 %v565_v23, 0.0 }
  0xff   : > { %v769_v26 = vadd.f32 %v1217_v6, %v673_v2  ;;  %v671_v10 = vmax.f32 %v629_v34, 0.0  ;;  %911 = vst.msk [vmem:[%s1573_s14 + $0x2c] sm:$0xf] %vm899_vm2, %v1134_v61  ;;  %v1132_v40 = vpack.c.bf16 %v748_v39, %v748_v39  ;;  %v576_v3 = vadd.f32 %v1280_v7, %v1529_v42  ;;  %v567_v5 = vpop.f32.mrf.mxu0  ;;  %v631_v27 = vpop.f32.mrf.mxu1 }
 0x100   : > { %927 = vst.msk [vmem:[%s1573_s14 + $0x6c] sm:$0xf] %vm899_vm2, %v1150_v36  ;;  %v1148_v41 = vpack.c.bf16 %v764_v62, %v764_v62  ;;  %v640_v4 = vadd.f32 %v1296_v8, %v1529_v42  ;;  %v1137_v48 = vpack.c.bf16 %v753_v9, %v753_v9  ;;  %v751_v6 = vadd.f32 %v1181_v13, %v655_v47 }
 0x101   : > { %v1153_v11 = vpack.c.bf16 %v769_v26, %v769_v26  ;;  %v767_v12 = vadd.f32 %v1213_v14, %v671_v10  ;;  %909 = vst.msk [vmem:[%s1573_s14 + $0x24] sm:$0xf] %vm899_vm2, %v1132_v40  ;;  %v658_v24 = vmax.f32 %v576_v3, 0.0  ;;  %v568_v25 = vadd.f32 %v1529_v42, %v567_v5 }
 0x102   : > { %925 = vst.msk [vmem:[%s1573_s14 + $0x64] sm:$0xf] %vm899_vm2, %v1148_v41  ;;  %v674_v37 = vmax.f32 %v640_v4, 0.0  ;;  %v632_v38 = vadd.f32 %v1529_v42, %v631_v27  ;;  %914 = vst.msk [vmem:[%s1573_s14 + $0x38] sm:$0xf] %vm899_vm2, %v1137_v48  ;;  %v1135_v13 = vpack.c.bf16 %v751_v6, %v751_v6  ;;  %v1743_v43 = vunpack.c.h.bf16 %v1554_v63 }
 0x103   : > { %930 = vst.msk [vmem:[%s1573_s14 + $0x78] sm:$0xf] %vm899_vm2, %v1153_v11  ;;  %v1151_v14 = vpack.c.bf16 %v767_v12, %v767_v12  ;;  %v754_v28 = vadd.f32 %v1186_v15, %v658_v24  ;;  %v656_v29 = vmax.f32 %v568_v25, 0.0 }
 0x104   : > { %v770_v49 = vadd.f32 %v1218_v16, %v674_v37  ;;  %v672_v50 = vmax.f32 %v632_v38, 0.0  ;;  %912 = vst.msk [vmem:[%s1573_s14 + $0x30] sm:$0xf] %vm899_vm2, %v1135_v13 }
 0x105   : > { %928 = vst.msk [vmem:[%s1573_s14 + $0x70] sm:$0xf] %vm899_vm2, %v1151_v14  ;;  %v1138_v42 = vpack.c.bf16 %v754_v28, %v754_v28  ;;  %v752_v17 = vadd.f32 %v1743_v43, %v656_v29 }
 0x106   : > { %v1154_v55 = vpack.c.bf16 %v770_v49, %v770_v49  ;;  %v768_v18 = vadd.f32 %v1214_v30, %v672_v50 }
 0x107   : > { %915 = vst.msk [vmem:[%s1573_s14 + $0x3c] sm:$0xf] %vm899_vm2, %v1138_v42  ;;  %v1136_v51 = vpack.c.bf16 %v752_v17, %v752_v17 }
 0x108   : > { %931 = vst.msk [vmem:[%s1573_s14 + $0x7c] sm:$0xf] %vm899_vm2, %v1154_v55  ;;  %v1152_v52 = vpack.c.bf16 %v768_v18, %v768_v18 }
 0x109   : > { %913 = vst.msk [vmem:[%s1573_s14 + $0x34] sm:$0xf] %vm899_vm2, %v1136_v51 }
 0x10a   : > { %929 = vst.msk [vmem:[%s1573_s14 + $0x74] sm:$0xf] %vm899_vm2, %v1152_v52 }
 0x10b PF: > { %s14_s17 = sadd.s32 1, %s1376_s17   ;;  %s1744_s15 = smov %s1372_s16 }
 0x10c   : > { %p11_p5 = scmp.ge.s32.totalorder %s14_s17, 4   ;;  %s1745_s16 = smov %s1747_s18 }
 0x10e   :  { %13 = sbr.rel (!%p11_p5) target bundleno = 2 (0x2), region = 69 }

// kernel: baseline1net_forward.19
= control target key start
LH: loop header
LB: loop body
LE: loop exit
PB: predicated region body
PF: predicated region fallthrough
CT: control target
= control target key end

     0   :  { %s659_s12 = smov 0   ;;  %s661_s13 = smov 0   ;;  %s739_s0 = inlined_call_operand.vmem [shape: bf16[2,64,72], index: 0, kind: input, shape index: {}]   ;;  %s740_s1 = inlined_call_operand.vmem [shape: bf16[72,16], index: 1, kind: input, shape index: {}]   ;;  %s741_s2 = inlined_call_operand.vmem [shape: f32[1,16], index: 2, kind: input, shape index: {}]   ;;  %s742_s3 = inlined_call_operand.vmem [shape: bf16[2,64,16], index: 3, kind: output, shape index: {}]  }
   0x1   :  { %s663_s14 = smov 0  }
   0x2 LB: > { %s25_s15 = sadd.s32 1, %s633_s13  ;;  %p504_p0 = scmp.ge.s32.totalorder %s637_s14, 1  ;;  %s637_s14 = sphi %s663_s14, %s13_s14   ;;  %s633_s13 = sphi %s661_s13, %s744_s13   ;;  %s629_s12 = sphi %s659_s12, %s743_s12  }
   0x3   : > { %p27_p1 = scmp.ge.s32.totalorder %s25_s15, 2  ;;  %p158_p2 = scmp.lt.s32.totalorder %s637_s14, 3 }
   0x5   : > { %s746_s15 = smov (%p27_p1, %s25_s15), 0  ;;  %p159_p3 = pnand %p504_p0, %p158_p2 }
   0x6   : > { %p191_p4 = scmp.lt.s32.totalorder (!%p159_p3), %s629_s12, 1 }
   0x7   : > { %162 = sbr.rel (%p159_p3) target bundleno = 240 (0xf0), region = 32 }
   0xc   : > { %v606_v0 = vld [vmem:[%s740_s1 + $0x20] ss:$0 sps:$4 sm:$0xff]   ;;  %vm295_vm0 = vcmask 1043456   ;;  %v607_v1 = vld [vmem:[%s740_s1 + $0x18] sm:$0xff]   ;;  %v608_v3 = vld [vmem:[%s740_s1 + $0x10] sm:$0xff]   ;;  %s748_s12 = smov (!%p191_p4, %s629_s12), 1 }
   0xd   : > { %580 = vmatprep.subr.msk.bf16.mxu0 %vm295_vm0, %v606_v0  ;;  %581 = vmatprep.subr.msk.bf16.mxu1 %vm295_vm0, %v606_v0  ;;  %v297_v2 = vsel %vm295_vm0, %v606_v0, 0  ;;  %s533_s22 = sshll.u32 %s748_s12, 5  ;;  %v609_v4 = vld [vmem:[%s740_s1 + $0x8] sm:$0xff]   ;;  %vm282_vm1 = vcmask 588800   ;;  %v610_v7 = vld [vmem:[%s740_s1] sm:$0xff]   ;;  %vm404_vm2 = vcmask 125952  }
   0xe   : > { %553 = vmatpush3.bf16.msra.mxu0 %v297_v2  ;;  %575 = vmatpush3.bf16.msra.mxu1 %v297_v2  ;;  %s198_s27 = scalar_lea.vmem %s739_s0, %s533_s22  ;;  %v509_v10 = vld [vmem:[%s741_s2] ss:$0 sm:$0xff]  ;;  %s712_s7 = scalar_lea.vmem %s742_s3, %s533_s22 }
   0xf   : > { %554 = vmatprep.subr.bf16.mxu0 %v607_v1  ;;  %571 = vmatprep.subr.bf16.mxu1 %v607_v1  ;;  %v611_v5 = vld [vmem:[%s198_s27] sm:$0xff]   ;;  %v612_v6 = vld [vmem:[%s198_s27 + $0x10] sm:$0xff]   ;;  %v613_v8 = vld [vmem:[%s198_s27 + $0x8] sm:$0xff]  }
  0x10   : > { %562 = vmatprep.mubr.msk.bf16.mxu0 %vm282_vm1, %v611_v5  ;;  %566 = vmatprep.mubr.msk.bf16.mxu1 %vm282_vm1, %v612_v6  ;;  %v614_v9 = vld [vmem:[%s198_s27 + $0x18] sm:$0xff]  }
  0x12   : > { %555 = vmatpush3.bf16.msra.mxu0 %v607_v1  ;;  %576 = vmatpush3.bf16.msra.mxu1 %v607_v1 }
  0x13   : > { %556 = vmatprep.subr.bf16.mxu0 %v608_v3  ;;  %572 = vmatprep.subr.bf16.mxu1 %v608_v3 }
  0x16   : > { %557 = vmatpush3.bf16.msra.mxu0 %v608_v3  ;;  %577 = vmatpush3.bf16.msra.mxu1 %v608_v3 }
  0x17   : > { %558 = vmatprep.subr.bf16.mxu0 %v609_v4  ;;  %573 = vmatprep.subr.bf16.mxu1 %v609_v4 }
  0x1a   : > { %559 = vmatpush3.bf16.msra.mxu0 %v609_v4  ;;  %578 = vmatpush3.bf16.msra.mxu1 %v609_v4 }
  0x1b   : > { %560 = vmatprep.subr.bf16.mxu0 %v610_v7  ;;  %574 = vmatprep.subr.bf16.mxu1 %v610_v7 }
  0x1e   : > { %561 = vmatpush3.bf16.msra.mxu0 %v610_v7  ;;  %579 = vmatpush3.bf16.msra.mxu1 %v610_v7 }
  0x21   : > { %563 = vmatmul.mubr.msk.bf16.vlgmr.msra.gmra.mxu0 %vm282_vm1, %v613_v8  ;;  %567 = vmatmul.mubr.msk.bf16.vlgmr.msra.gmra.mxu1 %vm282_vm1, %v614_v9 }
  0xe1   : > { %v564_v11 = vpop.f32.mrf.mxu0  ;;  %v568_v12 = vpop.f32.mrf.mxu1 }
  0xe2   : > { %v342_v13 = vadd.f32 %v564_v11, %v509_v10  ;;  %v358_v14 = vadd.f32 %v568_v12, %v509_v10 }
  0xe3   : > { %v333_v15 = vpop.f32.mrf.mxu0  ;;  %v349_v16 = vpop.f32.mrf.mxu1 }
  0xe4   : > { %v366_v17 = vmax.f32 %v342_v13, 0.0  ;;  %v370_v18 = vmax.f32 %v358_v14, 0.0  ;;  %v334_v19 = vadd.f32 %v509_v10, %v333_v15  ;;  %v350_v20 = vadd.f32 %v509_v10, %v349_v16 }
  0xe5   : > { %v565_v21 = vpop.f32.mrf.mxu0  ;;  %v569_v22 = vpop.f32.mrf.mxu1 }
  0xe6   : > { %v537_v23 = vpack.c.bf16 %v366_v17, %v366_v17  ;;  %v541_v24 = vpack.c.bf16 %v370_v18, %v370_v18  ;;  %v364_v25 = vmax.f32 %v334_v19, 0.0  ;;  %v368_v26 = vmax.f32 %v350_v20, 0.0 }
  0xe7   : > { %v345_v27 = vadd.f32 %v565_v21, %v509_v10  ;;  %v361_v28 = vadd.f32 %v569_v22, %v509_v10  ;;  %v336_v29 = vpop.f32.mrf.mxu0  ;;  %v352_v30 = vpop.f32.mrf.mxu1 }
  0xe8   : > { %407 = vst.msk [vmem:[%s712_s7 + $0x8] sm:$0xf] %vm404_vm2, %v537_v23  ;;  %411 = vst.msk [vmem:[%s712_s7 + $0x18] sm:$0xf] %vm404_vm2, %v541_v24  ;;  %v535_v31 = vpack.c.bf16 %v364_v25, %v364_v25  ;;  %v539_v32 = vpack.c.bf16 %v368_v26, %v368_v26  ;;  %v337_v33 = vadd.f32 %v509_v10, %v336_v29 }
  0xe9   : > { %v353_v34 = vadd.f32 %v509_v10, %v352_v30  ;;  %v367_v35 = vmax.f32 %v345_v27, 0.0  ;;  %v371_v36 = vmax.f32 %v361_v28, 0.0 }
  0xea   : > { %405 = vst.msk [vmem:[%s712_s7] sm:$0xf] %vm404_vm2, %v535_v31  ;;  %409 = vst.msk [vmem:[%s712_s7 + $0x10] sm:$0xf] %vm404_vm2, %v539_v32  ;;  %v365_v37 = vmax.f32 %v337_v33, 0.0 }
  0xeb   : > { %v369_v38 = vmax.f32 %v353_v34, 0.0  ;;  %v538_v39 = vpack.c.bf16 %v367_v35, %v367_v35  ;;  %v542_v40 = vpack.c.bf16 %v371_v36, %v371_v36 }
  0xec   : > { %v536_v41 = vpack.c.bf16 %v365_v37, %v365_v37 }
  0xed   : > { %v540_v42 = vpack.c.bf16 %v369_v38, %v369_v38  ;;  %408 = vst.msk [vmem:[%s712_s7 + $0xc] sm:$0xf] %vm404_vm2, %v538_v39  ;;  %412 = vst.msk [vmem:[%s712_s7 + $0x1c] sm:$0xf] %vm404_vm2, %v542_v40 }
  0xee   : > { %406 = vst.msk [vmem:[%s712_s7 + $0x4] sm:$0xf] %vm404_vm2, %v536_v41 }
  0xef   : > { %410 = vst.msk [vmem:[%s712_s7 + $0x14] sm:$0xf] %vm404_vm2, %v540_v42 }
  0xf0 PF: > { %s13_s14 = sadd.s32 1, %s637_s14   ;;  %s743_s12 = smov %s633_s13 }
  0xf1   : > { %p10_p5 = scmp.ge.s32.totalorder %s13_s14, 4   ;;  %s744_s13 = smov %s746_s15 }
  0xf3   :  { %12 = sbr.rel (!%p10_p5) target bundleno = 2 (0x2), region = 62 }

// kernel: baseline1net_forward.20
= control target key start
LH: loop header
LB: loop body
LE: loop exit
PB: predicated region body
PF: predicated region fallthrough
CT: control target
= control target key end

     0   :  { %s846_s15 = smov 0   ;;  %s848_s16 = smov 0   ;;  %s948_s0 = inlined_call_operand.vmem [shape: bf16[2,64,144], index: 0, kind: input, shape index: {}]   ;;  %s949_s1 = inlined_call_operand.vmem [shape: bf16[144,16], index: 1, kind: input, shape index: {}]   ;;  %s950_s2 = inlined_call_operand.vmem [shape: f32[1,16], index: 2, kind: input, shape index: {}]   ;;  %s951_s3 = inlined_call_operand.vmem [shape: bf16[2,64,16], index: 3, kind: input, shape index: {}]   ;;  %s952_s4 = inlined_call_operand.vmem [shape: bf16[2,64,16], index: 4, kind: output, shape index: {}]  }
   0x1   :  { %s850_s17 = smov 0  }
   0x2 LB: > { %s26_s18 = sadd.s32 1, %s814_s16  ;;  %p663_p0 = scmp.ge.s32.totalorder %s818_s17, 1  ;;  %s818_s17 = sphi %s850_s17, %s14_s17   ;;  %s814_s16 = sphi %s848_s16, %s954_s16   ;;  %s810_s15 = sphi %s846_s15, %s953_s15  }
   0x3   : > { %p28_p1 = scmp.ge.s32.totalorder %s26_s18, 2  ;;  %p201_p2 = scmp.lt.s32.totalorder %s818_s17, 3 }
   0x5   : > { %s956_s18 = smov (%p28_p1, %s26_s18), 0  ;;  %p202_p3 = pnand %p663_p0, %p201_p2 }
   0x6   : > { %p246_p4 = scmp.lt.s32.totalorder (!%p202_p3), %s810_s15, 1 }
   0x7   : > { %205 = sbr.rel (%p202_p3) target bundleno = 263 (0x107), region = 36 }
   0xc   : > { %v775_v0 = vld [vmem:[%s949_s1 + $0x38] sm:$0xff]   ;;  %v820_v1 = vmov 0   ;;  %v776_v2 = vld [vmem:[%s949_s1 + $0x30] sm:$0xff]   ;;  %s958_s15 = smov (!%p246_p4, %s810_s15), 1  ;;  %v777_v3 = vld [vmem:[%s949_s1 + $0x28] sm:$0xff]   ;;  %vm400_vm0 = vcmask 130048  }
   0xd   : > { %413 = vmatprep.subr.bf16.mxu0 %v820_v1  ;;  %732 = vmatprep.subr.bf16.mxu1 %v820_v1  ;;  %s702_s23 = sshll.u32 %s958_s15, 6  ;;  %v778_v4 = vld [vmem:[%s949_s1 + $0x20] sm:$0xff]   ;;  %v779_v7 = vld [vmem:[%s949_s1 + $0x18] sm:$0xff]   ;;  %v780_v8 = vld [vmem:[%s949_s1 + $0x10] sm:$0xff]   ;;  %s703_s19 = sshll.u32 %s958_s15, 5  ;;  %vm542_vm1 = vcmask 125952  }
   0xe   : > { %414 = vmatpush1.bf16.msra.mxu0 %v775_v0  ;;  %741 = vmatpush1.bf16.msra.mxu1 %v775_v0  ;;  %s879_s28 = scalar_lea.vmem %s948_s0, %s702_s23  ;;  %v781_v9 = vld [vmem:[%s949_s1 + $0x8] sm:$0xff]   ;;  %v782_v10 = vld [vmem:[%s949_s1] sm:$0xff]   ;;  %s264_s22 = scalar_lea.vmem %s951_s3, %s703_s19 }
   0xf   : > { %415 = vmatprep.subr.bf16.mxu0 %v820_v1  ;;  %733 = vmatprep.subr.bf16.mxu1 %v820_v1  ;;  %v786_v5 = vld [vmem:[%s879_s28 + $0x4] ss:$8 sps:$4 sm:$0xff]   ;;  %v784_v12 = vld [vmem:[%s879_s28] ss:$8 sps:$4 sm:$0xff]   ;;  %v790_v14 = vld [vmem:[%s879_s28 + $0x14] ss:$8 sps:$4 sm:$0xff]   ;;  %s921_s26 = scalar_lea.vmem %s952_s4, %s703_s19 }
  0x10   : > { %v789_v6 = vld [vmem:[%s879_s28 + $0x24] ss:$8 sps:$4 sm:$0xff]   ;;  %688 = vmatprep.mubr.msk.bf16.mxu0 %vm400_vm0, %v786_v5  ;;  %v787_v13 = vld [vmem:[%s879_s28 + $0x20] ss:$8 sps:$4 sm:$0xff]   ;;  %v792_v15 = vld [vmem:[%s879_s28 + $0x34] ss:$8 sps:$4 sm:$0xff]  }
  0x11   : > { %690 = vmatprep.mubr.msk.bf16.mxu1 %vm400_vm0, %v789_v6  ;;  %v783_v11 = vld [vmem:[%s949_s1 + $0x40] sm:$0xff]   ;;  %v794_v16 = vld [vmem:[%s879_s28 + $0x10] ss:$8 sps:$4 sm:$0xff]   ;;  %v729_v39 = vld [vmem:[%s264_s22 + $0x8] sm:$0xff]  }
  0x12   : > { %416 = vmatpush1.bf16.msra.mxu0 %v776_v2  ;;  %742 = vmatpush1.bf16.msra.mxu1 %v776_v2  ;;  %v795_v17 = vld [vmem:[%s879_s28 + $0x30] ss:$8 sps:$4 sm:$0xff]   ;;  %v670_v18 = vld [vmem:[%s950_s2] ss:$0 sm:$0xff]  ;;  %v719_v48 = vunpack.c.l.bf16 %v729_v39  ;;  %v720_v62 = vunpack.c.h.bf16 %v729_v39 }
  0x13   : > { %417 = vmatprep.subr.bf16.mxu0 %v820_v1  ;;  %734 = vmatprep.subr.bf16.mxu1 %v820_v1  ;;  %v714_v19 = vld [vmem:[%s264_s22] sm:$0xff]   ;;  %v730_v20 = vld [vmem:[%s264_s22 + $0x10] sm:$0xff]   ;;  %v731_v40 = vld [vmem:[%s264_s22 + $0x18] sm:$0xff]  }
  0x14   : > { %v715_v24 = vunpack.c.l.bf16 %v714_v19  ;;  %v723_v26 = vunpack.c.l.bf16 %v730_v20  ;;  %v716_v32 = vunpack.c.h.bf16 %v714_v19  ;;  %v724_v34 = vunpack.c.h.bf16 %v730_v20 }
  0x15   : > { %v727_v50 = vunpack.c.l.bf16 %v731_v40  ;;  %v728_v0 = vunpack.c.h.bf16 %v731_v40 }
  0x16   : > { %418 = vmatpush1.bf16.msra.mxu0 %v777_v3  ;;  %743 = vmatpush1.bf16.msra.mxu1 %v777_v3 }
  0x17   : > { %419 = vmatprep.subr.bf16.mxu0 %v820_v1  ;;  %735 = vmatprep.subr.bf16.mxu1 %v820_v1 }
  0x1a   : > { %420 = vmatpush1.bf16.msra.mxu0 %v778_v4  ;;  %744 = vmatpush1.bf16.msra.mxu1 %v778_v4 }
  0x1b   : > { %421 = vmatprep.subr.bf16.mxu0 %v820_v1  ;;  %736 = vmatprep.subr.bf16.mxu1 %v820_v1 }
  0x1e   : > { %422 = vmatpush1.bf16.msra.mxu0 %v779_v7  ;;  %745 = vmatpush1.bf16.msra.mxu1 %v779_v7 }
  0x1f   : > { %423 = vmatprep.subr.bf16.mxu0 %v820_v1  ;;  %737 = vmatprep.subr.bf16.mxu1 %v820_v1 }
  0x22   : > { %424 = vmatpush1.bf16.msra.mxu0 %v780_v8  ;;  %746 = vmatpush1.bf16.msra.mxu1 %v780_v8 }
  0x23   : > { %425 = vmatprep.subr.bf16.mxu0 %v820_v1  ;;  %738 = vmatprep.subr.bf16.mxu1 %v820_v1 }
  0x26   : > { %426 = vmatpush1.bf16.msra.mxu0 %v781_v9  ;;  %747 = vmatpush1.bf16.msra.mxu1 %v781_v9 }
  0x27   : > { %427 = vmatprep.subr.bf16.mxu0 %v820_v1  ;;  %739 = vmatprep.subr.bf16.mxu1 %v820_v1 }
  0x2a   : > { %428 = vmatpush1.bf16.msra.mxu0 %v782_v10  ;;  %748 = vmatpush1.bf16.msra.mxu1 %v782_v10 }
  0x2b   : > { %443 = vmatprep.subr.bf16.mxu0 %v820_v1  ;;  %740 = vmatprep.subr.bf16.mxu1 %v820_v1 }
  0x2e   : > { %444 = vmatpush2.bf16.msra.mxu0 %v783_v11  ;;  %749 = vmatpush2.bf16.msra.mxu1 %v783_v11 }
  0x31   : > { %446 = vmatmul.mubr.bf16.vlgmr.msra.gmra.mxu0 %v784_v12  ;;  %462 = vmatmul.mubr.bf16.vlgmr.msra.gmra.mxu1 %v787_v13 }
  0x32   : > { %689 = vmatprep.mubr.msk.bf16.mxu0 %vm400_vm0, %v790_v14  ;;  %691 = vmatprep.mubr.msk.bf16.mxu1 %vm400_vm0, %v792_v15 }
  0x39   : > { %454 = vmatmul.mubr.bf16.gmra.mxu0 %v794_v16  ;;  %470 = vmatmul.mubr.bf16.gmra.mxu1 %v795_v17 }
  0xf1   : > { %v447_v21 = vpop.f32.mrf.mxu0  ;;  %v463_v22 = vpop.f32.mrf.mxu1 }
  0xf2   : > { %v448_v23 = vadd.f32 %v670_v18, %v447_v21  ;;  %v464_v25 = vadd.f32 %v670_v18, %v463_v22 }
  0xf3   : > { %v449_v27 = vpop.f32.mrf.mxu0  ;;  %v465_v28 = vpop.f32.mrf.mxu1 }
  0xf4   : > { %v478_v29 = vmax.f32 %v448_v23, 0.0  ;;  %v482_v30 = vmax.f32 %v464_v25, 0.0 }
  0xf5   : > { %v450_v31 = vpop.f32.mrf.mxu0  ;;  %v466_v33 = vpop.f32.mrf.mxu1 }
  0xf6   : > { %v502_v35 = vadd.f32 %v715_v24, %v478_v29  ;;  %v506_v36 = vadd.f32 %v723_v26, %v482_v30  ;;  %v451_v37 = vadd.f32 %v670_v18, %v450_v31  ;;  %v467_v38 = vadd.f32 %v670_v18, %v466_v33 }
  0xf7   : > { %v452_v41 = vpop.f32.mrf.mxu0  ;;  %v468_v42 = vpop.f32.mrf.mxu1 }
  0xf8   : > { %v705_v43 = vpack.c.bf16 %v502_v35, %v502_v35  ;;  %v709_v44 = vpack.c.bf16 %v506_v36, %v506_v36  ;;  %v479_v45 = vmax.f32 %v451_v37, 0.0  ;;  %v483_v46 = vmax.f32 %v467_v38, 0.0 }
  0xf9   : > { %v455_v47 = vpop.f32.mrf.mxu0  ;;  %v471_v49 = vpop.f32.mrf.mxu1 }
  0xfa   : > { %543 = vst.msk [vmem:[%s921_s26] sm:$0xf] %vm542_vm1, %v705_v43  ;;  %547 = vst.msk [vmem:[%s921_s26 + $0x10] sm:$0xf] %vm542_vm1, %v709_v44  ;;  %v503_v51 = vadd.f32 %v716_v32, %v479_v45  ;;  %v507_v52 = vadd.f32 %v724_v34, %v483_v46  ;;  %v456_v53 = vadd.f32 %v670_v18, %v455_v47 }
  0xfb   : > { %v472_v54 = vadd.f32 %v670_v18, %v471_v49  ;;  %v457_v55 = vpop.f32.mrf.mxu0  ;;  %v473_v56 = vpop.f32.mrf.mxu1 }
  0xfc   : > { %v706_v57 = vpack.c.bf16 %v503_v51, %v503_v51  ;;  %v710_v58 = vpack.c.bf16 %v507_v52, %v507_v52  ;;  %v480_v59 = vmax.f32 %v456_v53, 0.0 }
  0xfd   : > { %v484_v60 = vmax.f32 %v472_v54, 0.0  ;;  %v458_v61 = vpop.f32.mrf.mxu0  ;;  %v474_v63 = vpop.f32.mrf.mxu1 }
  0xfe   : > { %544 = vst.msk [vmem:[%s921_s26 + $0x4] sm:$0xf] %vm542_vm1, %v706_v57  ;;  %548 = vst.msk [vmem:[%s921_s26 + $0x14] sm:$0xf] %vm542_vm1, %v710_v58  ;;  %v504_v1 = vadd.f32 %v719_v48, %v480_v59  ;;  %v459_v3 = vadd.f32 %v670_v18, %v458_v61  ;;  %v475_v4 = vadd.f32 %v670_v18, %v474_v63 }
  0xff   : > { %v508_v2 = vadd.f32 %v727_v50, %v484_v60  ;;  %v460_v5 = vpop.f32.mrf.mxu0  ;;  %v476_v6 = vpop.f32.mrf.mxu1 }
 0x100   : > { %v707_v7 = vpack.c.bf16 %v504_v1, %v504_v1  ;;  %v481_v9 = vmax.f32 %v459_v3, 0.0  ;;  %v485_v10 = vmax.f32 %v475_v4, 0.0 }
 0x101   : > { %v711_v8 = vpack.c.bf16 %v508_v2, %v508_v2 }
 0x102   : > { %545 = vst.msk [vmem:[%s921_s26 + $0x8] sm:$0xf] %vm542_vm1, %v707_v7  ;;  %v505_v11 = vadd.f32 %v720_v62, %v481_v9  ;;  %v509_v12 = vadd.f32 %v728_v0, %v485_v10 }
 0x103   : > { %549 = vst.msk [vmem:[%s921_s26 + $0x18] sm:$0xf] %vm542_vm1, %v711_v8 }
 0x104   : > { %v708_v13 = vpack.c.bf16 %v505_v11, %v505_v11  ;;  %v712_v14 = vpack.c.bf16 %v509_v12, %v509_v12 }
 0x106   : > { %546 = vst.msk [vmem:[%s921_s26 + $0xc] sm:$0xf] %vm542_vm1, %v708_v13  ;;  %550 = vst.msk [vmem:[%s921_s26 + $0x1c] sm:$0xf] %vm542_vm1, %v712_v14 }
 0x107 PF: > { %s14_s17 = sadd.s32 1, %s818_s17   ;;  %s953_s15 = smov %s814_s16 }
 0x108   : > { %p11_p5 = scmp.ge.s32.totalorder %s14_s17, 4   ;;  %s954_s16 = smov %s956_s18 }
 0x10a   :  { %13 = sbr.rel (!%p11_p5) target bundleno = 2 (0x2), region = 69 }

// kernel: baseline1net_forward.21
= control target key start
LH: loop header
LB: loop body
LE: loop exit
PB: predicated region body
PF: predicated region fallthrough
CT: control target
= control target key end

     0   :  { %s564_s12 = smov 0   ;;  %s566_s13 = smov 0   ;;  %s631_s0 = inlined_call_operand.vmem [shape: bf16[2,16,144], index: 0, kind: input, shape index: {}]   ;;  %s632_s1 = inlined_call_operand.vmem [shape: bf16[144,32], index: 1, kind: input, shape index: {}]   ;;  %s633_s2 = inlined_call_operand.vmem [shape: f32[1,32], index: 2, kind: input, shape index: {}]   ;;  %s634_s3 = inlined_call_operand.vmem [shape: bf16[2,16,32], index: 3, kind: output, shape index: {}]  }
   0x1   :  { %s568_s14 = smov 0  }
   0x2 LB: > { %s25_s15 = sadd.s32 1, %s537_s13  ;;  %p456_p0 = scmp.ge.s32.totalorder %s541_s14, 1  ;;  %s541_s14 = sphi %s568_s14, %s13_s14   ;;  %s537_s13 = sphi %s566_s13, %s636_s13   ;;  %s533_s12 = sphi %s564_s12, %s635_s12  }
   0x3   : > { %p27_p1 = scmp.ge.s32.totalorder %s25_s15, 2  ;;  %p159_p2 = scmp.lt.s32.totalorder %s541_s14, 3 }
   0x5   : > { %s638_s15 = smov (%p27_p1, %s25_s15), 0  ;;  %p160_p3 = pnand %p456_p0, %p159_p2 }
   0x6   : > { %p193_p4 = scmp.lt.s32.totalorder (!%p160_p3), %s533_s12, 1 }
   0x7   : > { %163 = sbr.rel (%p160_p3) target bundleno = 253 (0xfd), region = 32 }
   0xc   : > { %v507_v0 = vld [vmem:[%s632_s1 + $0x38] sm:$0xff]   ;;  %v543_v1 = vmov 0   ;;  %v508_v2 = vld [vmem:[%s632_s1 + $0x30] sm:$0xff]   ;;  %s640_s12 = smov (!%p193_p4, %s533_s12), 1  ;;  %v509_v3 = vld [vmem:[%s632_s1 + $0x28] sm:$0xff]   ;;  %vm304_vm0 = vcmask 130048  }
   0xd   : > { %308 = vmatprep.subr.bf16.mxu0 %v543_v1  ;;  %s478_s20 = sshll.u32 %s640_s12, 4  ;;  %v510_v4 = vld [vmem:[%s632_s1 + $0x20] sm:$0xff]   ;;  %v511_v6 = vld [vmem:[%s632_s1 + $0x18] sm:$0xff]   ;;  %v512_v7 = vld [vmem:[%s632_s1 + $0x10] sm:$0xff]   ;;  %s479_s17 = sshll.u32 %s640_s12, 3  ;;  %vm359_vm1 = vcmask 257024  }
   0xe   : > { %309 = vmatpush1.bf16.msra.mxu0 %v507_v0  ;;  %s201_s25 = scalar_lea.vmem %s631_s0, %s478_s20  ;;  %v513_v8 = vld [vmem:[%s632_s1 + $0x8] sm:$0xff]   ;;  %v514_v9 = vld [vmem:[%s632_s1] sm:$0xff]   ;;  %s211_s20 = scalar_lea.vmem %s634_s3, %s479_s17 }
   0xf   : > { %310 = vmatprep.subr.bf16.mxu0 %v543_v1  ;;  %v518_v5 = vld [vmem:[%s201_s25 + $0x4] ss:$8 sps:$4 sm:$0xff]   ;;  %v516_v11 = vld [vmem:[%s201_s25] ss:$8 sps:$4 sm:$0xff]  }
  0x10   : > { %473 = vmatprep.mubr.msk.bf16.mxu0 %vm304_vm0, %v518_v5  ;;  %v515_v10 = vld [vmem:[%s632_s1 + $0x40] sm:$0xff]  }
  0x11   : > { %v461_v12 = vld [vmem:[%s633_s2] ss:$0 sm:$0xff] }
  0x12   : > { %311 = vmatpush1.bf16.msra.mxu0 %v508_v2 }
  0x13   : > { %312 = vmatprep.subr.bf16.mxu0 %v543_v1 }
  0x16   : > { %313 = vmatpush1.bf16.msra.mxu0 %v509_v3 }
  0x17   : > { %314 = vmatprep.subr.bf16.mxu0 %v543_v1 }
  0x1a   : > { %315 = vmatpush1.bf16.msra.mxu0 %v510_v4 }
  0x1b   : > { %316 = vmatprep.subr.bf16.mxu0 %v543_v1 }
  0x1e   : > { %317 = vmatpush1.bf16.msra.mxu0 %v511_v6 }
  0x1f   : > { %318 = vmatprep.subr.bf16.mxu0 %v543_v1 }
  0x22   : > { %319 = vmatpush1.bf16.msra.mxu0 %v512_v7 }
  0x23   : > { %320 = vmatprep.subr.bf16.mxu0 %v543_v1 }
  0x26   : > { %321 = vmatpush1.bf16.msra.mxu0 %v513_v8 }
  0x27   : > { %322 = vmatprep.subr.bf16.mxu0 %v543_v1 }
  0x2a   : > { %323 = vmatpush1.bf16.msra.mxu0 %v514_v9 }
  0x2b   : > { %338 = vmatprep.subr.bf16.mxu0 %v543_v1 }
  0x2e   : > { %339 = vmatpush2.bf16.msra.mxu0 %v515_v10 }
  0x31   : > { %341 = vmatmul.mubr.bf16.vlgmr.msra.gmra.mxu0 %v516_v11 }
  0xf1   : > { %v342_v13 = vpop.f32.mrf.mxu0 }
  0xf2   : > { %v343_v14 = vadd.f32 %v461_v12, %v342_v13 }
  0xf3   : > { %v344_v15 = vpop.f32.mrf.mxu0 }
  0xf4   : > { %v349_v16 = vmax.f32 %v343_v14, 0.0 }
  0xf5   : > { %v345_v17 = vpop.f32.mrf.mxu0 }
  0xf6   : > { %v480_v18 = vpack.c.bf16 %v349_v16, %v349_v16  ;;  %v346_v19 = vadd.f32 %v461_v12, %v345_v17 }
  0xf7   : > { %v347_v20 = vpop.f32.mrf.mxu0 }
  0xf8   : > { %360 = vst.msk [vmem:[%s211_s20] sm:$0xf] %vm359_vm1, %v480_v18  ;;  %v350_v21 = vmax.f32 %v346_v19, 0.0 }
  0xfa   : > { %v481_v22 = vpack.c.bf16 %v350_v21, %v350_v21 }
  0xfc   : > { %361 = vst.msk [vmem:[%s211_s20 + $0x4] sm:$0xf] %vm359_vm1, %v481_v22 }
  0xfd PF: > { %s13_s14 = sadd.s32 1, %s541_s14   ;;  %s635_s12 = smov %s537_s13 }
  0xfe   : > { %p10_p5 = scmp.ge.s32.totalorder %s13_s14, 4   ;;  %s636_s13 = smov %s638_s15 }
 0x100   :  { %12 = sbr.rel (!%p10_p5) target bundleno = 2 (0x2), region = 62 }

// kernel: baseline1net_forward.22
= control target key start
LH: loop header
LB: loop body
LE: loop exit
PB: predicated region body
PF: predicated region fallthrough
CT: control target
= control target key end

     0   :  { %s838_s15 = smov 0   ;;  %s840_s16 = smov 0   ;;  %s935_s0 = inlined_call_operand.vmem [shape: bf16[2,16,288], index: 0, kind: input, shape index: {}]   ;;  %s936_s1 = inlined_call_operand.vmem [shape: bf16[288,32], index: 1, kind: input, shape index: {}]   ;;  %s937_s2 = inlined_call_operand.vmem [shape: f32[1,32], index: 2, kind: input, shape index: {}]   ;;  %s938_s3 = inlined_call_operand.vmem [shape: bf16[2,16,32], index: 3, kind: input, shape index: {}]   ;;  %s939_s4 = inlined_call_operand.vmem [shape: bf16[2,16,32], index: 4, kind: output, shape index: {}]  }
   0x1   :  { %s842_s17 = smov 0  }
   0x2 LB: > { %s26_s18 = sadd.s32 1, %s805_s16  ;;  %p664_p0 = scmp.ge.s32.totalorder %s809_s17, 1  ;;  %s809_s17 = sphi %s842_s17, %s14_s17   ;;  %s805_s16 = sphi %s840_s16, %s941_s16   ;;  %s801_s15 = sphi %s838_s15, %s940_s15  }
   0x3   : > { %p28_p1 = scmp.ge.s32.totalorder %s26_s18, 2  ;;  %p201_p2 = scmp.lt.s32.totalorder %s809_s17, 3 }
   0x5   : > { %s943_s18 = smov (%p28_p1, %s26_s18), 0  ;;  %p202_p3 = pnand %p664_p0, %p201_p2 }
   0x6   : > { %p246_p4 = scmp.lt.s32.totalorder (!%p202_p3), %s801_s15, 1 }
   0x7   : > { %205 = sbr.rel (%p202_p3) target bundleno = 257 (0x101), region = 36 }
   0xc   : > { %v765_v0 = vld [vmem:[%s936_s1 + $0x78] sm:$0xff]   ;;  %v811_v2 = vmov 0.0   ;;  %v767_v3 = vld [vmem:[%s936_s1 + $0x70] sm:$0xff]   ;;  %vm812_vm0 = vmmov 0   ;;  %v769_v5 = vld [vmem:[%s936_s1 + $0x68] sm:$0xff]   ;;  %s945_s15 = smov (!%p246_p4, %s801_s15), 1 }
   0xd   : > { %v766_v1 = vld [vmem:[%s936_s1 + $0x38] sm:$0xff]   ;;  %730 = vmatprep.subr.bf16.mxu1 %v811_v2  ;;  %705 = vmatprep.subr.bf16.mxu0 %v765_v0  ;;  %v768_v4 = vld [vmem:[%s936_s1 + $0x30] sm:$0xff]   ;;  %v770_v6 = vld [vmem:[%s936_s1 + $0x28] sm:$0xff]   ;;  %s738_s11 = smul.u32 24, %s945_s15  ;;  %vm447_vm1 = vcmask 261120   ;;  %vm549_vm2 = vcmask 257024  }
   0xe   : > { %706 = vmatpush3.bf16.msra.mxu0 %v766_v1  ;;  %734 = vmatprep.mubr.msk.bf16.mxu1 %vm812_vm0, %v811_v2  ;;  %v771_v7 = vld [vmem:[%s936_s1 + $0x60] sm:$0xff]   ;;  %v773_v9 = vld [vmem:[%s936_s1 + $0x58] sm:$0xff]   ;;  %v779_v10 = vld [vmem:[%s936_s1 + $0x88] sm:$0xff]  }
   0xf   : > { %707 = vmatprep.subr.bf16.mxu0 %v767_v3  ;;  %v772_v8 = vld [vmem:[%s936_s1 + $0x20] sm:$0xff]   ;;  %v774_v11 = vld [vmem:[%s936_s1 + $0x18] sm:$0xff]   ;;  %v775_v12 = vld [vmem:[%s936_s1 + $0x50] sm:$0xff]   ;;  %731 = vmatpush3.bf16.msra.mxu1 %v779_v10  ;;  %s254_s24 = scalar_lea.vmem %s935_s0, %s738_s11  ;;  %s697_s11 = sshll.u32 %s945_s15, 3 }
  0x10   : > { %732 = vmatprep.subr.bf16.mxu1 %v811_v2  ;;  %v782_v13 = vld [vmem:[%s936_s1 + $0x80] sm:$0xff]   ;;  %v776_v14 = vld [vmem:[%s936_s1 + $0x10] sm:$0xff]   ;;  %v777_v16 = vld [vmem:[%s936_s1 + $0x48] sm:$0xff]   ;;  %s264_s14 = scalar_lea.vmem %s938_s3, %s697_s11  ;;  %s274_s22 = scalar_lea.vmem %s939_s4, %s697_s11 }
  0x11   : > { %v785_v15 = vld [vmem:[%s254_s24 + $0x4] ss:$12 sps:$4 sm:$0xff]   ;;  %v786_v17 = vld [vmem:[%s254_s24 + $0x8] ss:$12 sps:$4 sm:$0xff]   ;;  %v783_v21 = vld [vmem:[%s254_s24] ss:$12 sps:$4 sm:$0xff]  }
  0x12   : > { %708 = vmatpush3.bf16.msra.mxu0 %v768_v4  ;;  %483 = vmatprep.mubr.bf16.mxu0 %v785_v15  ;;  %v778_v18 = vld [vmem:[%s936_s1 + $0x8] sm:$0xff]   ;;  %v780_v19 = vld [vmem:[%s936_s1 + $0x40] sm:$0xff]  }
  0x13   : > { %709 = vmatprep.subr.bf16.mxu0 %v769_v5  ;;  %733 = vmatpush3.bf16.msra.mxu1 %v782_v13  ;;  %v781_v20 = vld [vmem:[%s936_s1] sm:$0xff]  }
  0x14   : > { %v670_v27 = vld [vmem:[%s937_s2] ss:$0 sm:$0xff] }
  0x15   : > { %v702_v30 = vld [vmem:[%s264_s14] sm:$0xff]  }
  0x16   : > { %710 = vmatpush3.bf16.msra.mxu0 %v770_v6  ;;  %735 = vmatmul.mubr.msk.bf16.vlgmr.msra.gmra.mxu1 %vm447_vm1, %v786_v17  ;;  %v703_v35 = vunpack.c.l.bf16 %v702_v30  ;;  %v704_v41 = vunpack.c.h.bf16 %v702_v30 }
  0x17   : > { %711 = vmatprep.subr.bf16.mxu0 %v771_v7 }
  0x1a   : > { %712 = vmatpush3.bf16.msra.mxu0 %v772_v8 }
  0x1b   : > { %713 = vmatprep.subr.bf16.mxu0 %v773_v9 }
  0x1e   : > { %714 = vmatpush3.bf16.msra.mxu0 %v774_v11 }
  0x1f   : > { %715 = vmatprep.subr.bf16.mxu0 %v775_v12 }
  0x22   : > { %716 = vmatpush3.bf16.msra.mxu0 %v776_v14 }
  0x23   : > { %717 = vmatprep.subr.bf16.mxu0 %v777_v16 }
  0x26   : > { %718 = vmatpush3.bf16.msra.mxu0 %v778_v18 }
  0x27   : > { %719 = vmatprep.subr.bf16.mxu0 %v780_v19 }
  0x2a   : > { %720 = vmatpush3.bf16.msra.mxu0 %v781_v20 }
  0x2d   : > { %484 = vmatmul.mubr.bf16.vlgmr.msra.gmra.mxu0 %v783_v21 }
  0xd6   : > { %v526_v22 = vpop.f32.mrf.mxu1 }
  0xd8   : > { %v736_v23 = vpop.f32.mrf.mxu1 }
  0xda   : > { %v529_v24 = vpop.f32.mrf.mxu1 }
  0xdc   : > { %v737_v25 = vpop.f32.mrf.mxu1 }
  0xed   : > { %v721_v26 = vpop.f32.mrf.mxu0 }
  0xef   : > { %v722_v28 = vpop.f32.mrf.mxu0 }
  0xf0   : > { %v723_v29 = vadd.f32 %v722_v28, %v721_v26 }
  0xf1   : > { %v724_v31 = vpop.f32.mrf.mxu0 }
  0xf2   : > { %v486_v32 = vadd.f32 %v723_v29, %v670_v27 }
  0xf3   : > { %v725_v33 = vpop.f32.mrf.mxu0 }
  0xf4   : > { %v527_v34 = vadd.f32 %v526_v22, %v486_v32  ;;  %v726_v36 = vadd.f32 %v725_v33, %v724_v31 }
  0xf6   : > { %v533_v37 = vmax.f32 %v527_v34, 0.0  ;;  %v489_v38 = vadd.f32 %v726_v36, %v670_v27 }
  0xf8   : > { %v539_v39 = vadd.f32 %v703_v35, %v533_v37  ;;  %v530_v40 = vadd.f32 %v529_v24, %v489_v38 }
  0xfa   : > { %v699_v42 = vpack.c.bf16 %v539_v39, %v539_v39  ;;  %v534_v43 = vmax.f32 %v530_v40, 0.0 }
  0xfc   : > { %550 = vst.msk [vmem:[%s274_s22] sm:$0xf] %vm549_vm2, %v699_v42  ;;  %v540_v44 = vadd.f32 %v704_v41, %v534_v43 }
  0xfe   : > { %v700_v45 = vpack.c.bf16 %v540_v44, %v540_v44 }
 0x100   : > { %551 = vst.msk [vmem:[%s274_s22 + $0x4] sm:$0xf] %vm549_vm2, %v700_v45 }
 0x101 PF: > { %s14_s17 = sadd.s32 1, %s809_s17   ;;  %s940_s15 = smov %s805_s16 }
 0x102   : > { %p11_p5 = scmp.ge.s32.totalorder %s14_s17, 4   ;;  %s941_s16 = smov %s943_s18 }
 0x104   :  { %13 = sbr.rel (!%p11_p5) target bundleno = 2 (0x2), region = 69 }

// kernel: baseline1net_forward.23
= control target key start
LH: loop header
LB: loop body
LE: loop exit
PB: predicated region body
PF: predicated region fallthrough
CT: control target
= control target key end

     0   :  { %s699_s12 = smov 0   ;;  %s701_s13 = smov 0   ;;  %s793_s0 = inlined_call_operand.vmem [shape: bf16[2,4,288], index: 0, kind: input, shape index: {}]   ;;  %s794_s1 = inlined_call_operand.vmem [shape: bf16[288,64], index: 1, kind: input, shape index: {}]   ;;  %s795_s2 = inlined_call_operand.vmem [shape: f32[1,64], index: 2, kind: input, shape index: {}]   ;;  %s796_s3 = inlined_call_operand.vmem [shape: bf16[2,4,64], index: 3, kind: output, shape index: {}]  }
   0x1   :  { %s703_s14 = smov 0  }
   0x2 LB: > { %s25_s15 = sadd.s32 1, %s670_s13  ;;  %p547_p0 = scmp.ge.s32.totalorder %s674_s14, 1  ;;  %s674_s14 = sphi %s703_s14, %s13_s14   ;;  %s670_s13 = sphi %s701_s13, %s798_s13   ;;  %s666_s12 = sphi %s699_s12, %s797_s12  }
   0x3   : > { %p27_p1 = scmp.ge.s32.totalorder %s25_s15, 2  ;;  %p157_p2 = scmp.lt.s32.totalorder %s674_s14, 3 }
   0x5   : > { %s800_s15 = smov (%p27_p1, %s25_s15), 0  ;;  %p158_p3 = pnand %p547_p0, %p157_p2 }
   0x6   : > { %p187_p4 = scmp.lt.s32.totalorder (!%p158_p3), %s666_s12, 1 }
   0x7   : > { %161 = sbr.rel (%p158_p3) target bundleno = 251 (0xfb), region = 32 }
   0xc   : > { %v633_v0 = vld [vmem:[%s794_s1 + $0x78] sm:$0xff]   ;;  %v676_v2 = vmov 0.0   ;;  %v635_v3 = vld [vmem:[%s794_s1 + $0x70] sm:$0xff]   ;;  %v637_v5 = vld [vmem:[%s794_s1 + $0x68] sm:$0xff]   ;;  %vm677_vm0 = vmmov 0   ;;  %s802_s12 = smov (!%p187_p4, %s666_s12), 1  ;;  %v253_v12 = vlaneseq }
   0xd   : > { %v634_v1 = vld [vmem:[%s794_s1 + $0x38] sm:$0xff]   ;;  %597 = vmatprep.subr.bf16.mxu1 %v676_v2  ;;  %572 = vmatprep.subr.bf16.mxu0 %v633_v0  ;;  %v636_v4 = vld [vmem:[%s794_s1 + $0x30] sm:$0xff]   ;;  %v638_v6 = vld [vmem:[%s794_s1 + $0x28] sm:$0xff]   ;;  %s605_s5 = smul.u32 6, %s802_s12  ;;  %v678_v17 = vmov 1983009808  }
   0xe   : > { %573 = vmatpush3.bf16.msra.mxu0 %v634_v1  ;;  %601 = vmatprep.mubr.msk.bf16.mxu1 %vm677_vm0, %v676_v2  ;;  %v639_v7 = vld [vmem:[%s794_s1 + $0x60] sm:$0xff]   ;;  %v641_v9 = vld [vmem:[%s794_s1 + $0x58] sm:$0xff]   ;;  %v647_v10 = vld [vmem:[%s794_s1 + $0x88] sm:$0xff]   ;;  %v251_v18 = vunpack.c.l.s4 %v678_v17  ;;  %v254_v19 = vshrl.u32 %v253_v12, 7  ;;  %vm375_vm1 = vcmask 261120   ;;  %s549_s8 = sshll.u32 %s802_s12, 1 }
   0xf   : > { %574 = vmatprep.subr.bf16.mxu0 %v635_v3  ;;  %v640_v8 = vld [vmem:[%s794_s1 + $0x20] sm:$0xff]   ;;  %v642_v11 = vld [vmem:[%s794_s1 + $0x18] sm:$0xff]   ;;  %s195_s18 = scalar_lea.vmem %s793_s0, %s605_s5  ;;  %v643_v13 = vld [vmem:[%s794_s1 + $0x50] sm:$0xff]   ;;  %598 = vmatpush3.bf16.msra.mxu1 %v647_v10  ;;  %s202_s11 = scalar_lea.vmem %s796_s3, %s549_s8  ;;  %vm461_vm2 = vcmask 517120  }
  0x10   : > { %599 = vmatprep.subr.bf16.mxu1 %v676_v2  ;;  %v650_v14 = vld [vmem:[%s794_s1 + $0x80] sm:$0xff]   ;;  %v644_v16 = vld [vmem:[%s794_s1 + $0x10] sm:$0xff]   ;;  %v645_v20 = vld [vmem:[%s794_s1 + $0x48] sm:$0xff]   ;;  %v252_v22 = vunpack.c.0.s8 %v251_v18 }
  0x11   : > { %v204_v15 = vld [vmem:[%s195_s18] sm:$0x3f]  ;;  %v646_v23 = vld [vmem:[%s794_s1 + $0x8] sm:$0xff]  }
  0x12   : > { %575 = vmatpush3.bf16.msra.mxu0 %v636_v4  ;;  %v249_v21 = vcombine.high %v204_v15, %v204_v15  ;;  %v255_v24 = vsub.s32 %v252_v22, %v254_v19  ;;  %v648_v25 = vld [vmem:[%s794_s1 + $0x40] sm:$0xff]  }
  0x13   : > { %576 = vmatprep.subr.bf16.mxu0 %v637_v5  ;;  %600 = vmatpush3.bf16.msra.mxu1 %v650_v14  ;;  %v649_v28 = vld [vmem:[%s794_s1] sm:$0xff]  }
  0x14   : > { %v256_v26 = vrot.slane %v204_v15, %v255_v24  ;;  %v263_v27 = vrot.slane %v249_v21, %v255_v24  ;;  %v550_v35 = vld [vmem:[%s795_s2] ss:$0 sm:$0xff] }
  0x16   : > { %577 = vmatpush3.bf16.msra.mxu0 %v638_v6  ;;  %v264_v29 = vcombine.high %v256_v26, %v256_v26  ;;  %602 = vmatmul.mubr.msk.bf16.vlgmr.msra.gmra.mxu1 %vm375_vm1, %v263_v27 }
  0x17   : > { %578 = vmatprep.subr.bf16.mxu0 %v639_v7 }
  0x18   : > { %411 = vmatprep.mubr.bf16.mxu0 %v264_v29 }
  0x1a   : > { %579 = vmatpush3.bf16.msra.mxu0 %v640_v8 }
  0x1b   : > { %580 = vmatprep.subr.bf16.mxu0 %v641_v9 }
  0x1e   : > { %581 = vmatpush3.bf16.msra.mxu0 %v642_v11 }
  0x1f   : > { %582 = vmatprep.subr.bf16.mxu0 %v643_v13 }
  0x22   : > { %583 = vmatpush3.bf16.msra.mxu0 %v644_v16 }
  0x23   : > { %584 = vmatprep.subr.bf16.mxu0 %v645_v20 }
  0x26   : > { %585 = vmatpush3.bf16.msra.mxu0 %v646_v23 }
  0x27   : > { %586 = vmatprep.subr.bf16.mxu0 %v648_v25 }
  0x2a   : > { %587 = vmatpush3.bf16.msra.mxu0 %v649_v28 }
  0x2d   : > { %412 = vmatmul.mubr.bf16.vlgmr.msra.gmra.mxu0 %v256_v26 }
  0xd6   : > { %v453_v30 = vpop.f32.mrf.mxu1 }
  0xd8   : > { %v603_v31 = vpop.f32.mrf.mxu1 }
  0xda   : > { %v456_v32 = vpop.f32.mrf.mxu1 }
  0xdc   : > { %v604_v33 = vpop.f32.mrf.mxu1 }
  0xed   : > { %v588_v34 = vpop.f32.mrf.mxu0 }
  0xef   : > { %v589_v36 = vpop.f32.mrf.mxu0 }
  0xf0   : > { %v590_v37 = vadd.f32 %v589_v36, %v588_v34 }
  0xf1   : > { %v591_v38 = vpop.f32.mrf.mxu0 }
  0xf2   : > { %v414_v39 = vadd.f32 %v590_v37, %v550_v35 }
  0xf3   : > { %v592_v40 = vpop.f32.mrf.mxu0 }
  0xf4   : > { %v454_v41 = vadd.f32 %v453_v30, %v414_v39 }
  0xf6   : > { %v459_v42 = vmax.f32 %v454_v41, 0.0 }
  0xf8   : > { %v460_v43 = vpack.c.bf16 %v459_v42, %v459_v42 }
  0xfa   : > { %462 = vst.msk [vmem:[%s202_s11] sm:$0x3] %vm461_vm2, %v460_v43 }
  0xfb PF: > { %s13_s14 = sadd.s32 1, %s674_s14   ;;  %s797_s12 = smov %s670_s13 }
  0xfc   : > { %p10_p5 = scmp.ge.s32.totalorder %s13_s14, 4   ;;  %s798_s13 = smov %s800_s15 }
  0xfe   :  { %12 = sbr.rel (!%p10_p5) target bundleno = 2 (0x2), region = 62 }

// kernel: baseline1net_forward.24
= control target key start
LH: loop header
LB: loop body
LE: loop exit
PB: predicated region body
PF: predicated region fallthrough
CT: control target
= control target key end

     0   :  { %s1039_s15 = smov 0   ;;  %s1041_s16 = smov 0   ;;  %s1198_s0 = inlined_call_operand.vmem [shape: bf16[2,4,576], index: 0, kind: input, shape index: {}]   ;;  %s1199_s1 = inlined_call_operand.vmem [shape: bf16[576,64], index: 1, kind: input, shape index: {}]   ;;  %s1200_s2 = inlined_call_operand.vmem [shape: f32[1,64], index: 2, kind: input, shape index: {}]   ;;  %s1201_s3 = inlined_call_operand.vmem [shape: bf16[2,4,64], index: 3, kind: input, shape index: {}]   ;;  %s1202_s4 = inlined_call_operand.vmem [shape: bf16[2,4,64], index: 4, kind: output, shape index: {}]  }
   0x1   :  { %s1043_s17 = smov 0  }
   0x2 LB: > { %s26_s18 = sadd.s32 1, %s1005_s16  ;;  %p816_p0 = scmp.ge.s32.totalorder %s1009_s17, 1  ;;  %s1009_s17 = sphi %s1043_s17, %s14_s17   ;;  %s1005_s16 = sphi %s1041_s16, %s1204_s16   ;;  %s1001_s15 = sphi %s1039_s15, %s1203_s15  }
   0x3   : > { %p28_p1 = scmp.ge.s32.totalorder %s26_s18, 2  ;;  %p196_p2 = scmp.lt.s32.totalorder %s1009_s17, 3 }
   0x5   : > { %s1206_s18 = smov (%p28_p1, %s26_s18), 0  ;;  %p197_p3 = pnand %p816_p0, %p196_p2 }
   0x6   : > { %p235_p4 = scmp.lt.s32.totalorder (!%p197_p3), %s1001_s15, 1 }
   0x7   : > { %200 = sbr.rel (%p197_p3) target bundleno = 263 (0x107), region = 36 }
   0xc   : > { %v950_v0 = vld [vmem:[%s1199_s1 + $0x78] sm:$0xff]   ;;  %v954_v4 = vld [vmem:[%s1199_s1 + $0x70] sm:$0xff]   ;;  %v958_v8 = vld [vmem:[%s1199_s1 + $0x68] sm:$0xff]   ;;  %s1208_s15 = smov (!%p235_p4, %s1001_s15), 1  ;;  %v346_v30 = vlaneseq  ;;  %v1011_v34 = vmov 0.0   ;;  %vm1013_vm0 = vmmov 0  }
   0xd   : > { %v951_v1 = vld [vmem:[%s1199_s1 + $0x38] sm:$0xff]   ;;  %861 = vmatprep.subr.bf16.mxu0 %v950_v0  ;;  %v955_v5 = vld [vmem:[%s1199_s1 + $0x30] sm:$0xff]   ;;  %v959_v9 = vld [vmem:[%s1199_s1 + $0x28] sm:$0xff]   ;;  %s922_s25 = smul.u32 10, %s1208_s15  ;;  %v1012_v35 = vmov 1983009808  }
   0xe   : > { %v952_v2 = vld [vmem:[%s1199_s1 + $0xf8] sm:$0xff]   ;;  %862 = vmatpush3.bf16.msra.mxu0 %v951_v1  ;;  %v956_v6 = vld [vmem:[%s1199_s1 + $0xf0] sm:$0xff]   ;;  %v960_v10 = vld [vmem:[%s1199_s1 + $0xe8] sm:$0xff]   ;;  %v344_v36 = vunpack.c.l.s4 %v1012_v35  ;;  %v347_v37 = vshrl.u32 %v346_v30, 7  ;;  %vm586_vm1 = vcmask 523264   ;;  %s818_s5 = sshll.u32 %s1208_s15, 1 }
   0xf   : > { %v953_v3 = vld [vmem:[%s1199_s1 + $0xb8] sm:$0xff]   ;;  %883 = vmatprep.subr.bf16.mxu1 %v952_v2  ;;  %863 = vmatprep.subr.bf16.mxu0 %v954_v4  ;;  %v957_v7 = vld [vmem:[%s1199_s1 + $0xb0] sm:$0xff]   ;;  %v961_v11 = vld [vmem:[%s1199_s1 + $0xa8] sm:$0xff]   ;;  %s1154_s10 = scalar_lea.vmem %s1198_s0, %s922_s25  ;;  %s250_s8 = scalar_lea.vmem %s1201_s3, %s818_s5  ;;  %vm715_vm2 = vcmask 517120  }
  0x10   : > { %884 = vmatpush3.bf16.msra.mxu1 %v953_v3  ;;  %v962_v12 = vld [vmem:[%s1199_s1 + $0x60] sm:$0xff]   ;;  %v966_v16 = vld [vmem:[%s1199_s1 + $0x58] sm:$0xff]   ;;  %v970_v20 = vld [vmem:[%s1199_s1 + $0x50] sm:$0xff]   ;;  %v345_v38 = vunpack.c.0.s8 %v344_v36  ;;  %s257_s11 = scalar_lea.vmem %s1202_s4, %s818_s5 }
  0x11   : > { %885 = vmatprep.subr.bf16.mxu1 %v956_v6  ;;  %v963_v13 = vld [vmem:[%s1199_s1 + $0x20] sm:$0xff]   ;;  %v967_v17 = vld [vmem:[%s1199_s1 + $0x18] sm:$0xff]   ;;  %v971_v21 = vld [vmem:[%s1199_s1 + $0x10] sm:$0xff]  }
  0x12   : > { %864 = vmatpush3.bf16.msra.mxu0 %v955_v5  ;;  %v964_v14 = vld [vmem:[%s1199_s1 + $0xe0] sm:$0xff]   ;;  %v968_v18 = vld [vmem:[%s1199_s1 + $0xd8] sm:$0xff]   ;;  %v972_v22 = vld [vmem:[%s1199_s1 + $0xd0] sm:$0xff]   ;;  %v348_v40 = vsub.s32 %v345_v38, %v347_v37 }
  0x13   : > { %865 = vmatprep.subr.bf16.mxu0 %v958_v8  ;;  %v965_v15 = vld [vmem:[%s1199_s1 + $0xa0] sm:$0xff]   ;;  %v969_v19 = vld [vmem:[%s1199_s1 + $0x98] sm:$0xff]   ;;  %v973_v23 = vld [vmem:[%s1199_s1 + $0x90] sm:$0xff]  }
  0x14   : > { %886 = vmatpush3.bf16.msra.mxu1 %v957_v7  ;;  %v974_v24 = vld [vmem:[%s1199_s1 + $0x48] sm:$0xff]   ;;  %v978_v28 = vld [vmem:[%s1199_s1 + $0x40] sm:$0xff]   ;;  %v983_v45 = vld [vmem:[%s1199_s1 + $0x118] sm:$0xff]  }
  0x15   : > { %887 = vmatprep.subr.bf16.mxu1 %v960_v10  ;;  %v975_v25 = vld [vmem:[%s1199_s1 + $0x8] sm:$0xff]   ;;  %v979_v29 = vld [vmem:[%s1199_s1] sm:$0xff]   ;;  %v984_v46 = vld [vmem:[%s1199_s1 + $0x110] sm:$0xff]  }
  0x16   : > { %866 = vmatpush3.bf16.msra.mxu0 %v959_v9  ;;  %v976_v26 = vld [vmem:[%s1199_s1 + $0xc8] sm:$0xff]   ;;  %v980_v31 = vld [vmem:[%s1199_s1 + $0xc0] sm:$0xff]  }
  0x17   : > { %867 = vmatprep.subr.bf16.mxu0 %v962_v12  ;;  %v977_v27 = vld [vmem:[%s1199_s1 + $0x88] sm:$0xff]   ;;  %v259_v32 = vld [vmem:[%s1154_s10] sm:$0xff] }
  0x18   : > { %888 = vmatpush3.bf16.msra.mxu1 %v961_v11  ;;  %v981_v33 = vld [vmem:[%s1199_s1 + $0x80] sm:$0xff]   ;;  %v342_v39 = vcombine.high %v259_v32, %v259_v32  ;;  %v349_v41 = vrot.slane %v259_v32, %v348_v40  ;;  %v985_v47 = vld [vmem:[%s1199_s1 + $0x108] sm:$0xff]  }
  0x19   : > { %889 = vmatprep.subr.bf16.mxu1 %v964_v14  ;;  %v986_v48 = vld [vmem:[%s1199_s1 + $0x100] sm:$0xff]   ;;  %v821_v49 = vld.sshfl [vmem:[%s1154_s10 + $0x8] sm:$0x3 pattern:$0x76325410] }
  0x1a   : > { %868 = vmatpush3.bf16.msra.mxu0 %v963_v13  ;;  %v356_v42 = vrot.slane %v342_v39, %v348_v40  ;;  %v357_v43 = vcombine.high %v349_v41, %v349_v41  ;;  %v820_v59 = vld [vmem:[%s1200_s2] ss:$0 sm:$0xff] }
  0x1b   : > { %869 = vmatprep.subr.bf16.mxu0 %v966_v16  ;;  %v711_v62 = vld [vmem:[%s250_s8] sm:$0x3] }
  0x1c   : > { %890 = vmatpush3.bf16.msra.mxu1 %v965_v15  ;;  %v358_v44 = vcombine.high %v356_v42, %v356_v42  ;;  %622 = vmatprep.mubr.bf16.mxu0 %v357_v43  ;;  %v712_v2 = vunpack.c.l.bf16 %v711_v62 }
  0x1d   : > { %891 = vmatprep.subr.bf16.mxu1 %v968_v18 }
  0x1e   : > { %870 = vmatpush3.bf16.msra.mxu0 %v967_v17  ;;  %662 = vmatprep.mubr.bf16.mxu1 %v358_v44 }
  0x1f   : > { %871 = vmatprep.subr.bf16.mxu0 %v970_v20 }
  0x20   : > { %892 = vmatpush3.bf16.msra.mxu1 %v969_v19 }
  0x21   : > { %893 = vmatprep.subr.bf16.mxu1 %v972_v22 }
  0x22   : > { %872 = vmatpush3.bf16.msra.mxu0 %v971_v21 }
  0x23   : > { %873 = vmatprep.subr.bf16.mxu0 %v974_v24 }
  0x24   : > { %894 = vmatpush3.bf16.msra.mxu1 %v973_v23 }
  0x25   : > { %895 = vmatprep.subr.bf16.mxu1 %v976_v26 }
  0x26   : > { %874 = vmatpush3.bf16.msra.mxu0 %v975_v25 }
  0x27   : > { %875 = vmatprep.subr.bf16.mxu0 %v978_v28 }
  0x28   : > { %896 = vmatpush3.bf16.msra.mxu1 %v977_v27 }
  0x29   : > { %897 = vmatprep.subr.bf16.mxu1 %v980_v31 }
  0x2a   : > { %876 = vmatpush3.bf16.msra.mxu0 %v979_v29 }
  0x2b   : > { %910 = vmatprep.subr.bf16.mxu0 %v1011_v34 }
  0x2c   : > { %898 = vmatpush3.bf16.msra.mxu1 %v981_v33 }
  0x2d   : > { %623 = vmatmul.mubr.bf16.vlgmr.msra.gmra.mxu0 %v349_v41 }
  0x2e   : > { %911 = vmatpush3.bf16.msra.mxu0 %v983_v45  ;;  %918 = vmatprep.mubr.msk.bf16.mxu0 %vm1013_vm0, %v1011_v34 }
  0x2f   : > { %663 = vmatmul.mubr.bf16.vlgmr.msra.gmra.mxu1 %v356_v42  ;;  %912 = vmatprep.subr.bf16.mxu0 %v1011_v34 }
  0x32   : > { %913 = vmatpush3.bf16.msra.mxu0 %v984_v46 }
  0x33   : > { %914 = vmatprep.subr.bf16.mxu0 %v1011_v34 }
  0x36   : > { %915 = vmatpush3.bf16.msra.mxu0 %v985_v47 }
  0x37   : > { %916 = vmatprep.subr.bf16.mxu0 %v1011_v34 }
  0x3a   : > { %917 = vmatpush3.bf16.msra.mxu0 %v986_v48 }
  0x3d   : > { %919 = vmatmul.mubr.msk.bf16.vlgmr.msra.gmra.mxu0 %vm586_vm1, %v821_v49 }
  0xed   : > { %v877_v50 = vpop.f32.mrf.mxu0 }
  0xef   : > { %v899_v51 = vpop.f32.mrf.mxu1  ;;  %v878_v52 = vpop.f32.mrf.mxu0 }
  0xf0   : > { %v879_v58 = vadd.f32 %v878_v52, %v877_v50 }
  0xf1   : > { %v900_v53 = vpop.f32.mrf.mxu1  ;;  %v880_v54 = vpop.f32.mrf.mxu0 }
  0xf2   : > { %v625_v60 = vadd.f32 %v879_v58, %v820_v59  ;;  %v901_v61 = vadd.f32 %v900_v53, %v899_v51 }
  0xf3   : > { %v902_v55 = vpop.f32.mrf.mxu1  ;;  %v881_v56 = vpop.f32.mrf.mxu0 }
  0xf4   : > { %v665_v63 = vadd.f32 %v901_v61, %v625_v60 }
  0xf5   : > { %v903_v57 = vpop.f32.mrf.mxu1 }
  0xfd   : > { %v704_v0 = vpop.f32.mrf.mxu0 }
  0xfe   : > { %v705_v1 = vadd.f32 %v704_v0, %v665_v63 }
  0xff   : > { %v920_v3 = vpop.f32.mrf.mxu0 }
 0x100   : > { %v710_v4 = vmax.f32 %v705_v1, 0.0 }
 0x101   : > { %v707_v5 = vpop.f32.mrf.mxu0 }
 0x102   : > { %v713_v6 = vadd.f32 %v712_v2, %v710_v4 }
 0x103   : > { %v921_v7 = vpop.f32.mrf.mxu0 }
 0x104   : > { %v714_v8 = vpack.c.bf16 %v713_v6, %v713_v6 }
 0x106   : > { %716 = vst.msk [vmem:[%s257_s11] sm:$0x3] %vm715_vm2, %v714_v8 }
 0x107 PF: > { %s14_s17 = sadd.s32 1, %s1009_s17   ;;  %s1203_s15 = smov %s1005_s16 }
 0x108   : > { %p11_p5 = scmp.ge.s32.totalorder %s14_s17, 4   ;;  %s1204_s16 = smov %s1206_s18 }
 0x10a   :  { %13 = sbr.rel (!%p11_p5) target bundleno = 2 (0x2), region = 69 }

// kernel: baseline1net_forward.27
= control target key start
LH: loop header
LB: loop body
LE: loop exit
PB: predicated region body
PF: predicated region fallthrough
CT: control target
= control target key end

     0   :  { %s1005_s12 = smov 0   ;;  %s1007_s13 = smov 0   ;;  %s1164_s0 = inlined_call_operand.vmem [shape: bf16[2,16,576], index: 0, kind: input, shape index: {}]   ;;  %s1165_s1 = inlined_call_operand.vmem [shape: bf16[576,32], index: 1, kind: input, shape index: {}]   ;;  %s1166_s2 = inlined_call_operand.vmem [shape: f32[1,32], index: 2, kind: input, shape index: {}]   ;;  %s1167_s3 = inlined_call_operand.vmem [shape: bf16[2,16,32], index: 3, kind: output, shape index: {}]  }
   0x1   :  { %s1009_s14 = smov 0  }
   0x2 LB: > { %s25_s15 = sadd.s32 1, %s977_s13  ;;  %p774_p0 = scmp.ge.s32.totalorder %s981_s14, 1  ;;  %s981_s14 = sphi %s1009_s14, %s13_s14   ;;  %s977_s13 = sphi %s1007_s13, %s1169_s13   ;;  %s973_s12 = sphi %s1005_s12, %s1168_s12  }
   0x3   : > { %p27_p1 = scmp.ge.s32.totalorder %s25_s15, 2  ;;  %p159_p2 = scmp.lt.s32.totalorder %s981_s14, 3 }
   0x5   : > { %s1171_s15 = smov (%p27_p1, %s25_s15), 0  ;;  %p160_p3 = pnand %p774_p0, %p159_p2 }
   0x6   : > { %p193_p4 = scmp.lt.s32.totalorder (!%p160_p3), %s973_s12, 1 }
   0x7   : > { %163 = sbr.rel (%p160_p3) target bundleno = 265 (0x109), region = 32 }
   0xc   : > { %v916_v0 = vld [vmem:[%s1165_s1 + $0x78] sm:$0xff]   ;;  %v920_v4 = vld [vmem:[%s1165_s1 + $0x70] sm:$0xff]   ;;  %v924_v8 = vld [vmem:[%s1165_s1 + $0x68] sm:$0xff]   ;;  %s1173_s12 = smov (!%p193_p4, %s973_s12), 1  ;;  %v983_v33 = vmov 0.0   ;;  %vm984_vm0 = vmmov 0  }
   0xd   : > { %v917_v1 = vld [vmem:[%s1165_s1 + $0x38] sm:$0xff]   ;;  %828 = vmatprep.subr.bf16.mxu0 %v916_v0  ;;  %v921_v5 = vld [vmem:[%s1165_s1 + $0x30] sm:$0xff]   ;;  %v925_v9 = vld [vmem:[%s1165_s1 + $0x28] sm:$0xff]   ;;  %s889_s20 = smul.u32 40, %s1173_s12  ;;  %vm540_vm1 = vcmask 523264   ;;  %s825_s25 = sshll.u32 %s1173_s12, 3 }
   0xe   : > { %v918_v2 = vld [vmem:[%s1165_s1 + $0xf8] sm:$0xff]   ;;  %829 = vmatpush3.bf16.msra.mxu0 %v917_v1  ;;  %v922_v6 = vld [vmem:[%s1165_s1 + $0xf0] sm:$0xff]   ;;  %v926_v10 = vld [vmem:[%s1165_s1 + $0xe8] sm:$0xff]   ;;  %s211_s28 = scalar_lea.vmem %s1167_s3, %s825_s25  ;;  %vm677_vm2 = vcmask 257024  }
   0xf   : > { %v919_v3 = vld [vmem:[%s1165_s1 + $0xb8] sm:$0xff]   ;;  %850 = vmatprep.subr.bf16.mxu1 %v918_v2  ;;  %830 = vmatprep.subr.bf16.mxu0 %v920_v4  ;;  %v923_v7 = vld [vmem:[%s1165_s1 + $0xb0] sm:$0xff]   ;;  %v927_v11 = vld [vmem:[%s1165_s1 + $0xa8] sm:$0xff]   ;;  %s1120_s4 = scalar_lea.vmem %s1164_s0, %s889_s20 }
  0x10   : > { %851 = vmatpush3.bf16.msra.mxu1 %v919_v3  ;;  %v928_v12 = vld [vmem:[%s1165_s1 + $0x60] sm:$0xff]   ;;  %v932_v16 = vld [vmem:[%s1165_s1 + $0x58] sm:$0xff]   ;;  %v936_v20 = vld [vmem:[%s1165_s1 + $0x50] sm:$0xff]  }
  0x11   : > { %852 = vmatprep.subr.bf16.mxu1 %v922_v6  ;;  %v929_v13 = vld [vmem:[%s1165_s1 + $0x20] sm:$0xff]   ;;  %v933_v17 = vld [vmem:[%s1165_s1 + $0x18] sm:$0xff]   ;;  %v937_v21 = vld [vmem:[%s1165_s1 + $0x10] sm:$0xff]  }
  0x12   : > { %831 = vmatpush3.bf16.msra.mxu0 %v921_v5  ;;  %v930_v14 = vld [vmem:[%s1165_s1 + $0xe0] sm:$0xff]   ;;  %v934_v18 = vld [vmem:[%s1165_s1 + $0xd8] sm:$0xff]   ;;  %v938_v22 = vld [vmem:[%s1165_s1 + $0xd0] sm:$0xff]  }
  0x13   : > { %832 = vmatprep.subr.bf16.mxu0 %v924_v8  ;;  %v931_v15 = vld [vmem:[%s1165_s1 + $0xa0] sm:$0xff]   ;;  %v935_v19 = vld [vmem:[%s1165_s1 + $0x98] sm:$0xff]   ;;  %v939_v23 = vld [vmem:[%s1165_s1 + $0x90] sm:$0xff]  }
  0x14   : > { %853 = vmatpush3.bf16.msra.mxu1 %v923_v7  ;;  %v940_v24 = vld [vmem:[%s1165_s1 + $0x48] sm:$0xff]   ;;  %v944_v28 = vld [vmem:[%s1165_s1 + $0x40] sm:$0xff]   ;;  %v954_v37 = vld [vmem:[%s1165_s1 + $0x118] sm:$0xff]  }
  0x15   : > { %854 = vmatprep.subr.bf16.mxu1 %v926_v10  ;;  %v941_v25 = vld [vmem:[%s1165_s1 + $0x8] sm:$0xff]   ;;  %v945_v29 = vld [vmem:[%s1165_s1] sm:$0xff]   ;;  %v955_v38 = vld [vmem:[%s1165_s1 + $0x110] sm:$0xff]  }
  0x16   : > { %833 = vmatpush3.bf16.msra.mxu0 %v925_v9  ;;  %v942_v26 = vld [vmem:[%s1165_s1 + $0xc8] sm:$0xff]   ;;  %v946_v30 = vld [vmem:[%s1165_s1 + $0xc0] sm:$0xff]  }
  0x17   : > { %834 = vmatprep.subr.bf16.mxu0 %v928_v12  ;;  %v943_v27 = vld [vmem:[%s1165_s1 + $0x88] sm:$0xff]   ;;  %v947_v31 = vld [vmem:[%s1120_s4] ss:$20 sps:$4 sm:$0xff]   ;;  %v949_v32 = vld [vmem:[%s1120_s4 + $0x4] ss:$20 sps:$4 sm:$0xff]  }
  0x18   : > { %855 = vmatpush3.bf16.msra.mxu1 %v927_v11  ;;  %v950_v34 = vld [vmem:[%s1165_s1 + $0x80] sm:$0xff]   ;;  %576 = vmatprep.mubr.bf16.mxu0 %v949_v32  ;;  %v951_v35 = vld [vmem:[%s1120_s4 + $0x8] ss:$20 sps:$4 sm:$0xff]  }
  0x19   : > { %856 = vmatprep.subr.bf16.mxu1 %v930_v14  ;;  %v953_v36 = vld [vmem:[%s1120_s4 + $0xc] ss:$20 sps:$4 sm:$0xff]   ;;  %v958_v41 = vld [vmem:[%s1120_s4 + $0x10] ss:$20 sps:$4 sm:$0xff]  }
  0x1a   : > { %835 = vmatpush3.bf16.msra.mxu0 %v929_v13  ;;  %617 = vmatprep.mubr.bf16.mxu1 %v953_v36  ;;  %v956_v39 = vld [vmem:[%s1165_s1 + $0x108] sm:$0xff]   ;;  %v957_v40 = vld [vmem:[%s1165_s1 + $0x100] sm:$0xff]  }
  0x1b   : > { %836 = vmatprep.subr.bf16.mxu0 %v932_v16  ;;  %v778_v48 = vld [vmem:[%s1166_s2] ss:$0 sm:$0xff] }
  0x1c   : > { %857 = vmatpush3.bf16.msra.mxu1 %v931_v15 }
  0x1d   : > { %858 = vmatprep.subr.bf16.mxu1 %v934_v18 }
  0x1e   : > { %837 = vmatpush3.bf16.msra.mxu0 %v933_v17 }
  0x1f   : > { %838 = vmatprep.subr.bf16.mxu0 %v936_v20 }
  0x20   : > { %859 = vmatpush3.bf16.msra.mxu1 %v935_v19 }
  0x21   : > { %860 = vmatprep.subr.bf16.mxu1 %v938_v22 }
  0x22   : > { %839 = vmatpush3.bf16.msra.mxu0 %v937_v21 }
  0x23   : > { %840 = vmatprep.subr.bf16.mxu0 %v940_v24 }
  0x24   : > { %861 = vmatpush3.bf16.msra.mxu1 %v939_v23 }
  0x25   : > { %862 = vmatprep.subr.bf16.mxu1 %v942_v26 }
  0x26   : > { %841 = vmatpush3.bf16.msra.mxu0 %v941_v25 }
  0x27   : > { %842 = vmatprep.subr.bf16.mxu0 %v944_v28 }
  0x28   : > { %863 = vmatpush3.bf16.msra.mxu1 %v943_v27 }
  0x29   : > { %864 = vmatprep.subr.bf16.mxu1 %v946_v30 }
  0x2a   : > { %843 = vmatpush3.bf16.msra.mxu0 %v945_v29 }
  0x2b   : > { %877 = vmatprep.subr.bf16.mxu0 %v983_v33 }
  0x2c   : > { %865 = vmatpush3.bf16.msra.mxu1 %v950_v34 }
  0x2d   : > { %577 = vmatmul.mubr.bf16.vlgmr.msra.gmra.mxu0 %v947_v31 }
  0x2e   : > { %885 = vmatprep.mubr.msk.bf16.mxu0 %vm984_vm0, %v983_v33  ;;  %878 = vmatpush3.bf16.msra.mxu0 %v954_v37 }
  0x2f   : > { %618 = vmatmul.mubr.bf16.vlgmr.msra.gmra.mxu1 %v951_v35  ;;  %879 = vmatprep.subr.bf16.mxu0 %v983_v33 }
  0x32   : > { %880 = vmatpush3.bf16.msra.mxu0 %v955_v38 }
  0x33   : > { %881 = vmatprep.subr.bf16.mxu0 %v983_v33 }
  0x36   : > { %882 = vmatpush3.bf16.msra.mxu0 %v956_v39 }
  0x37   : > { %883 = vmatprep.subr.bf16.mxu0 %v983_v33 }
  0x3a   : > { %884 = vmatpush3.bf16.msra.mxu0 %v957_v40 }
  0x3d   : > { %886 = vmatmul.mubr.msk.bf16.vlgmr.msra.gmra.mxu0 %vm540_vm1, %v958_v41 }
  0xed   : > { %v844_v42 = vpop.f32.mrf.mxu0 }
  0xef   : > { %v845_v43 = vpop.f32.mrf.mxu0  ;;  %v866_v44 = vpop.f32.mrf.mxu1 }
  0xf0   : > { %v846_v47 = vadd.f32 %v845_v43, %v844_v42 }
  0xf1   : > { %v847_v45 = vpop.f32.mrf.mxu0  ;;  %v867_v46 = vpop.f32.mrf.mxu1 }
  0xf2   : > { %v579_v51 = vadd.f32 %v846_v47, %v778_v48  ;;  %v868_v52 = vadd.f32 %v867_v46, %v866_v44 }
  0xf3   : > { %v848_v49 = vpop.f32.mrf.mxu0  ;;  %v869_v50 = vpop.f32.mrf.mxu1 }
  0xf4   : > { %v849_v53 = vadd.f32 %v848_v49, %v847_v45  ;;  %v620_v57 = vadd.f32 %v868_v52, %v579_v51 }
  0xf5   : > { %v870_v54 = vpop.f32.mrf.mxu1 }
  0xf6   : > { %v582_v55 = vadd.f32 %v849_v53, %v778_v48  ;;  %v871_v56 = vadd.f32 %v870_v54, %v869_v50 }
  0xf8   : > { %v623_v62 = vadd.f32 %v871_v56, %v582_v55 }
  0xfd   : > { %v660_v58 = vpop.f32.mrf.mxu0 }
  0xfe   : > { %v661_v59 = vadd.f32 %v660_v58, %v620_v57 }
  0xff   : > { %v887_v60 = vpop.f32.mrf.mxu0 }
 0x100   : > { %v667_v61 = vmax.f32 %v661_v59, 0.0 }
 0x101   : > { %v663_v63 = vpop.f32.mrf.mxu0 }
 0x102   : > { %v826_v0 = vpack.c.bf16 %v667_v61, %v667_v61  ;;  %v664_v1 = vadd.f32 %v663_v63, %v623_v62 }
 0x103   : > { %v888_v2 = vpop.f32.mrf.mxu0 }
 0x104   : > { %678 = vst.msk [vmem:[%s211_s28] sm:$0xf] %vm677_vm2, %v826_v0  ;;  %v668_v3 = vmax.f32 %v664_v1, 0.0 }
 0x106   : > { %v827_v4 = vpack.c.bf16 %v668_v3, %v668_v3 }
 0x108   : > { %679 = vst.msk [vmem:[%s211_s28 + $0x4] sm:$0xf] %vm677_vm2, %v827_v4 }
 0x109 PF: > { %s13_s14 = sadd.s32 1, %s981_s14   ;;  %s1168_s12 = smov %s977_s13 }
 0x10a   : > { %p10_p5 = scmp.ge.s32.totalorder %s13_s14, 4   ;;  %s1169_s13 = smov %s1171_s15 }
 0x10c   :  { %12 = sbr.rel (!%p10_p5) target bundleno = 2 (0x2), region = 62 }

// kernel: baseline1net_forward.29
= control target key start
LH: loop header
LB: loop body
LE: loop exit
PB: predicated region body
PF: predicated region fallthrough
CT: control target
= control target key end

     0   :  { %s962_s12 = smov 0   ;;  %s964_s13 = smov 0   ;;  %s1092_s0 = inlined_call_operand.vmem [shape: bf16[2,64,288], index: 0, kind: input, shape index: {}]   ;;  %s1093_s1 = inlined_call_operand.vmem [shape: bf16[288,16], index: 1, kind: input, shape index: {}]   ;;  %s1094_s2 = inlined_call_operand.vmem [shape: f32[1,16], index: 2, kind: input, shape index: {}]   ;;  %s1095_s3 = inlined_call_operand.vmem [shape: bf16[2,64,16], index: 3, kind: output, shape index: {}]  }
   0x1   :  { %s966_s14 = smov 0  }
   0x2 LB: > { %s25_s15 = sadd.s32 1, %s936_s13  ;;  %p727_p0 = scmp.ge.s32.totalorder %s940_s14, 1  ;;  %s940_s14 = sphi %s966_s14, %s13_s14   ;;  %s936_s13 = sphi %s964_s13, %s1097_s13   ;;  %s932_s12 = sphi %s962_s12, %s1096_s12  }
   0x3   : > { %p27_p1 = scmp.ge.s32.totalorder %s25_s15, 2  ;;  %p159_p2 = scmp.lt.s32.totalorder %s940_s14, 3 }
   0x5   : > { %s1099_s15 = smov (%p27_p1, %s25_s15), 0  ;;  %p160_p3 = pnand %p727_p0, %p159_p2 }
   0x6   : > { %p193_p4 = scmp.lt.s32.totalorder (!%p160_p3), %s932_s12, 1 }
   0x7   : > { %163 = sbr.rel (%p160_p3) target bundleno = 271 (0x10f), region = 32 }
   0xc   : > { %v884_v0 = vld [vmem:[%s1093_s1 + $0x78] sm:$0xff]   ;;  %v886_v2 = vld [vmem:[%s1093_s1 + $0x70] sm:$0xff]   ;;  %v888_v4 = vld [vmem:[%s1093_s1 + $0x68] sm:$0xff]   ;;  %s1101_s12 = smov (!%p193_p4, %s932_s12), 1  ;;  %vm441_vm0 = vcmask 261120   ;;  %vm624_vm1 = vcmask 125952  }
   0xd   : > { %v885_v1 = vld [vmem:[%s1093_s1 + $0x38] sm:$0xff]   ;;  %785 = vmatprep.subr.bf16.mxu0 %v884_v0  ;;  %843 = vmatprep.subr.bf16.mxu1 %v884_v0  ;;  %v887_v3 = vld [vmem:[%s1093_s1 + $0x30] sm:$0xff]   ;;  %v889_v5 = vld [vmem:[%s1093_s1 + $0x28] sm:$0xff]   ;;  %s859_s30 = smul.u32 96, %s1101_s12  ;;  %s776_s8 = sshll.u32 %s1101_s12, 5 }
   0xe   : > { %786 = vmatpush3.bf16.msra.mxu0 %v885_v1  ;;  %851 = vmatpush3.bf16.msra.mxu1 %v885_v1  ;;  %v890_v6 = vld [vmem:[%s1093_s1 + $0x60] sm:$0xff]   ;;  %v892_v8 = vld [vmem:[%s1093_s1 + $0x58] sm:$0xff]   ;;  %v894_v10 = vld [vmem:[%s1093_s1 + $0x50] sm:$0xff]   ;;  %s1065_s11 = scalar_lea.vmem %s1095_s3, %s776_s8 }
   0xf   : > { %787 = vmatprep.subr.bf16.mxu0 %v886_v2  ;;  %844 = vmatprep.subr.bf16.mxu1 %v886_v2  ;;  %v891_v7 = vld [vmem:[%s1093_s1 + $0x20] sm:$0xff]   ;;  %s1013_s10 = scalar_lea.vmem %s1092_s0, %s859_s30  ;;  %v893_v9 = vld [vmem:[%s1093_s1 + $0x18] sm:$0xff]   ;;  %v895_v13 = vld [vmem:[%s1093_s1 + $0x10] sm:$0xff]  }
  0x10   : > { %v902_v11 = vld [vmem:[%s1013_s10 + $0x4] ss:$12 sps:$4 sm:$0xff]   ;;  %v905_v12 = vld [vmem:[%s1013_s10 + $0x4c] ss:$12 sps:$4 sm:$0xff]   ;;  %v903_v20 = vld [vmem:[%s1013_s10 + $0x48] ss:$12 sps:$4 sm:$0xff]  }
  0x11   : > { %v896_v14 = vld [vmem:[%s1093_s1 + $0x48] sm:$0xff]   ;;  %486 = vmatprep.mubr.bf16.mxu0 %v902_v11  ;;  %510 = vmatprep.mubr.bf16.mxu1 %v905_v12  ;;  %v898_v16 = vld [vmem:[%s1093_s1 + $0x40] sm:$0xff]   ;;  %v916_v28 = vld [vmem:[%s1013_s10 + $0x30] ss:$12 sps:$4 sm:$0xff]  }
  0x12   : > { %788 = vmatpush3.bf16.msra.mxu0 %v887_v3  ;;  %852 = vmatpush3.bf16.msra.mxu1 %v887_v3  ;;  %v897_v15 = vld [vmem:[%s1093_s1 + $0x8] sm:$0xff]   ;;  %v899_v17 = vld [vmem:[%s1093_s1] sm:$0xff]   ;;  %v917_v29 = vld [vmem:[%s1013_s10 + $0x50] ss:$12 sps:$4 sm:$0xff]  }
  0x13   : > { %789 = vmatprep.subr.bf16.mxu0 %v888_v4  ;;  %845 = vmatprep.subr.bf16.mxu1 %v888_v4  ;;  %v906_v18 = vld [vmem:[%s1093_s1 + $0x88] sm:$0xff]   ;;  %v907_v22 = vld [vmem:[%s1093_s1 + $0x80] sm:$0xff]  }
  0x14   : > { %v900_v19 = vld [vmem:[%s1013_s10] ss:$12 sps:$4 sm:$0xff]   ;;  %v908_v21 = vld [vmem:[%s1013_s10 + $0x1c] ss:$12 sps:$4 sm:$0xff]   ;;  %v911_v24 = vld [vmem:[%s1013_s10 + $0x18] ss:$12 sps:$4 sm:$0xff]  }
  0x15   : > { %v910_v23 = vld [vmem:[%s1013_s10 + $0x8] ss:$12 sps:$4 sm:$0xff]   ;;  %v912_v25 = vld [vmem:[%s1013_s10 + $0x20] ss:$12 sps:$4 sm:$0xff]   ;;  %v915_v27 = vld [vmem:[%s1013_s10 + $0x38] ss:$12 sps:$4 sm:$0xff]  }
  0x16   : > { %790 = vmatpush3.bf16.msra.mxu0 %v889_v5  ;;  %853 = vmatpush3.bf16.msra.mxu1 %v889_v5  ;;  %v913_v26 = vld [vmem:[%s1013_s10 + $0x34] ss:$12 sps:$4 sm:$0xff]  }
  0x17   : > { %791 = vmatprep.subr.bf16.mxu0 %v890_v6  ;;  %846 = vmatprep.subr.bf16.mxu1 %v890_v6  ;;  %v731_v39 = vld [vmem:[%s1094_s2] ss:$0 sm:$0xff] }
  0x1a   : > { %792 = vmatpush3.bf16.msra.mxu0 %v891_v7  ;;  %854 = vmatpush3.bf16.msra.mxu1 %v891_v7 }
  0x1b   : > { %793 = vmatprep.subr.bf16.mxu0 %v892_v8  ;;  %847 = vmatprep.subr.bf16.mxu1 %v892_v8 }
  0x1e   : > { %794 = vmatpush3.bf16.msra.mxu0 %v893_v9  ;;  %855 = vmatpush3.bf16.msra.mxu1 %v893_v9 }
  0x1f   : > { %795 = vmatprep.subr.bf16.mxu0 %v894_v10  ;;  %848 = vmatprep.subr.bf16.mxu1 %v894_v10 }
  0x22   : > { %796 = vmatpush3.bf16.msra.mxu0 %v895_v13  ;;  %856 = vmatpush3.bf16.msra.mxu1 %v895_v13 }
  0x23   : > { %797 = vmatprep.subr.bf16.mxu0 %v896_v14  ;;  %849 = vmatprep.subr.bf16.mxu1 %v896_v14 }
  0x26   : > { %798 = vmatpush3.bf16.msra.mxu0 %v897_v15  ;;  %857 = vmatpush3.bf16.msra.mxu1 %v897_v15 }
  0x27   : > { %799 = vmatprep.subr.bf16.mxu0 %v898_v16  ;;  %850 = vmatprep.subr.bf16.mxu1 %v898_v16 }
  0x2a   : > { %800 = vmatpush3.bf16.msra.mxu0 %v899_v17  ;;  %858 = vmatpush3.bf16.msra.mxu1 %v899_v17 }
  0x2b   : > { %831 = vmatprep.subr.bf16.mxu1 %v906_v18 }
  0x2d   : > { %487 = vmatmul.mubr.bf16.vlgmr.msra.gmra.mxu0 %v900_v19  ;;  %511 = vmatmul.mubr.bf16.vlgmr.msra.gmra.mxu1 %v903_v20 }
  0x2e   : > { %832 = vmatpush3.bf16.msra.mxu1 %v906_v18  ;;  %494 = vmatprep.mubr.bf16.mxu0 %v908_v21 }
  0x2f   : > { %833 = vmatprep.subr.bf16.mxu1 %v907_v22  ;;  %835 = vmatprep.mubr.msk.bf16.mxu1 %vm441_vm0, %v910_v23 }
  0x32   : > { %834 = vmatpush3.bf16.msra.mxu1 %v907_v22 }
  0x35   : > { %495 = vmatmul.mubr.bf16.gmra.mxu0 %v911_v24  ;;  %836 = vmatmul.mubr.msk.bf16.vlgmr.msra.gmra.mxu1 %vm441_vm0, %v912_v25 }
  0x36   : > { %502 = vmatprep.mubr.bf16.mxu0 %v913_v26  ;;  %839 = vmatprep.mubr.msk.bf16.mxu1 %vm441_vm0, %v915_v27 }
  0x3d   : > { %503 = vmatmul.mubr.bf16.gmra.mxu0 %v916_v28  ;;  %840 = vmatmul.mubr.msk.bf16.gmra.mxu1 %vm441_vm0, %v917_v29 }
  0xed   : > { %v801_v30 = vpop.f32.mrf.mxu0  ;;  %v819_v31 = vpop.f32.mrf.mxu1 }
  0xef   : > { %v802_v32 = vpop.f32.mrf.mxu0  ;;  %v820_v33 = vpop.f32.mrf.mxu1 }
  0xf0   : > { %v803_v36 = vadd.f32 %v802_v32, %v801_v30  ;;  %v821_v44 = vadd.f32 %v820_v33, %v819_v31 }
  0xf1   : > { %v804_v34 = vpop.f32.mrf.mxu0  ;;  %v822_v35 = vpop.f32.mrf.mxu1 }
  0xf2   : > { %v489_v43 = vadd.f32 %v803_v36, %v731_v39  ;;  %v513_v57 = vadd.f32 %v821_v44, %v731_v39 }
  0xf3   : > { %v805_v37 = vpop.f32.mrf.mxu0  ;;  %v823_v38 = vpop.f32.mrf.mxu1 }
  0xf4   : > { %v806_v42 = vadd.f32 %v805_v37, %v804_v34  ;;  %v824_v54 = vadd.f32 %v823_v38, %v822_v35 }
  0xf5   : > { %v807_v40 = vpop.f32.mrf.mxu0  ;;  %v837_v41 = vpop.f32.mrf.mxu1 }
  0xf6   : > { %v492_v53 = vadd.f32 %v806_v42, %v731_v39  ;;  %v516_v6 = vadd.f32 %v824_v54, %v731_v39 }
  0xf7   : > { %v808_v45 = vpop.f32.mrf.mxu0  ;;  %v553_v46 = vpop.f32.mrf.mxu1 }
  0xf8   : > { %v809_v47 = vadd.f32 %v808_v45, %v807_v40  ;;  %v554_v48 = vadd.f32 %v553_v46, %v489_v43 }
  0xf9   : > { %v810_v49 = vpop.f32.mrf.mxu0  ;;  %v838_v50 = vpop.f32.mrf.mxu1 }
  0xfa   : > { %v497_v51 = vadd.f32 %v809_v47, %v731_v39  ;;  %v584_v52 = vmax.f32 %v554_v48, 0.0 }
  0xfb   : > { %v811_v55 = vpop.f32.mrf.mxu0  ;;  %v556_v56 = vpop.f32.mrf.mxu1 }
  0xfc   : > { %v562_v58 = vadd.f32 %v837_v41, %v497_v51  ;;  %v777_v59 = vpack.c.bf16 %v584_v52, %v584_v52  ;;  %v812_v60 = vadd.f32 %v811_v55, %v810_v49  ;;  %v557_v61 = vadd.f32 %v556_v56, %v492_v53 }
  0xfd   : > { %v813_v62 = vpop.f32.mrf.mxu0  ;;  %v841_v63 = vpop.f32.mrf.mxu1 }
  0xfe   : > { %v586_v0 = vmax.f32 %v562_v58, 0.0  ;;  %625 = vst.msk [vmem:[%s1065_s11] sm:$0xf] %vm624_vm1, %v777_v59  ;;  %v500_v1 = vadd.f32 %v812_v60, %v731_v39  ;;  %v585_v2 = vmax.f32 %v557_v61, 0.0  ;;  %v578_v3 = vadd.f32 %v841_v63, %v513_v57 }
  0xff   : > { %v814_v4 = vpop.f32.mrf.mxu0  ;;  %v569_v5 = vpop.f32.mrf.mxu1 }
 0x100   : > { %v779_v7 = vpack.c.bf16 %v586_v0, %v586_v0  ;;  %v565_v8 = vadd.f32 %v838_v50, %v500_v1  ;;  %v778_v9 = vpack.c.bf16 %v585_v2, %v585_v2  ;;  %v590_v10 = vmax.f32 %v578_v3, 0.0 }
 0x101   : > { %v815_v11 = vadd.f32 %v814_v4, %v813_v62  ;;  %v816_v12 = vpop.f32.mrf.mxu0  ;;  %v842_v13 = vpop.f32.mrf.mxu1 }
 0x102   : > { %627 = vst.msk [vmem:[%s1065_s11 + $0x8] sm:$0xf] %vm624_vm1, %v779_v7  ;;  %v587_v14 = vmax.f32 %v565_v8, 0.0  ;;  %626 = vst.msk [vmem:[%s1065_s11 + $0x4] sm:$0xf] %vm624_vm1, %v778_v9  ;;  %v783_v15 = vpack.c.bf16 %v590_v10, %v590_v10  ;;  %v581_v16 = vadd.f32 %v842_v13, %v516_v6 }
 0x103   : > { %v505_v17 = vadd.f32 %v815_v11, %v731_v39  ;;  %v817_v18 = vpop.f32.mrf.mxu0  ;;  %v572_v26 = vpop.f32.mrf.mxu1 }
 0x104   : > { %v780_v19 = vpack.c.bf16 %v587_v14, %v587_v14  ;;  %631 = vst.msk [vmem:[%s1065_s11 + $0x18] sm:$0xf] %vm624_vm1, %v783_v15  ;;  %v591_v20 = vmax.f32 %v581_v16, 0.0  ;;  %v818_v21 = vadd.f32 %v817_v18, %v816_v12 }
 0x105   : > { %v570_v22 = vadd.f32 %v569_v5, %v505_v17 }
 0x106   : > { %628 = vst.msk [vmem:[%s1065_s11 + $0xc] sm:$0xf] %vm624_vm1, %v780_v19  ;;  %v784_v23 = vpack.c.bf16 %v591_v20, %v591_v20  ;;  %v508_v24 = vadd.f32 %v818_v21, %v731_v39 }
 0x107   : > { %v588_v25 = vmax.f32 %v570_v22, 0.0 }
 0x108   : > { %632 = vst.msk [vmem:[%s1065_s11 + $0x1c] sm:$0xf] %vm624_vm1, %v784_v23  ;;  %v573_v27 = vadd.f32 %v572_v26, %v508_v24 }
 0x109   : > { %v781_v28 = vpack.c.bf16 %v588_v25, %v588_v25 }
 0x10a   : > { %v589_v29 = vmax.f32 %v573_v27, 0.0 }
 0x10b   : > { %629 = vst.msk [vmem:[%s1065_s11 + $0x10] sm:$0xf] %vm624_vm1, %v781_v28 }
 0x10c   : > { %v782_v30 = vpack.c.bf16 %v589_v29, %v589_v29 }
 0x10e   : > { %630 = vst.msk [vmem:[%s1065_s11 + $0x14] sm:$0xf] %vm624_vm1, %v782_v30 }
 0x10f PF: > { %s13_s14 = sadd.s32 1, %s940_s14   ;;  %s1096_s12 = smov %s936_s13 }
 0x110   : > { %p10_p5 = scmp.ge.s32.totalorder %s13_s14, 4   ;;  %s1097_s13 = smov %s1099_s15 }
 0x112   :  { %12 = sbr.rel (!%p10_p5) target bundleno = 2 (0x2), region = 62 }

// kernel: baseline1net_forward.31
= control target key start
LH: loop header
LB: loop body
LE: loop exit
PB: predicated region body
PF: predicated region fallthrough
CT: control target
= control target key end

     0   :  { %s1242_s12 = smov 0   ;;  %s1244_s13 = smov 0   ;;  %s1459_s0 = inlined_call_operand.vmem [shape: bf16[2,256,144], index: 0, kind: input, shape index: {}]   ;;  %s1460_s1 = inlined_call_operand.vmem [shape: bf16[144,8], index: 1, kind: input, shape index: {}]   ;;  %s1461_s2 = inlined_call_operand.vmem [shape: f32[1,8], index: 2, kind: input, shape index: {}]   ;;  %s1462_s3 = inlined_call_operand.vmem [shape: bf16[2,256,8], index: 3, kind: output, shape index: {}]  }
   0x1   :  { %s1246_s14 = smov 0  }
   0x2 LB: > { %s25_s15 = sadd.s32 1, %s1215_s13  ;;  %p966_p0 = scmp.ge.s32.totalorder %s1219_s14, 1  ;;  %s1219_s14 = sphi %s1246_s14, %s13_s14   ;;  %s1215_s13 = sphi %s1244_s13, %s1464_s13   ;;  %s1211_s12 = sphi %s1242_s12, %s1463_s12  }
   0x3   : > { %p27_p1 = scmp.ge.s32.totalorder %s25_s15, 2  ;;  %p159_p2 = scmp.lt.s32.totalorder %s1219_s14, 3 }
   0x5   : > { %s1466_s15 = smov (%p27_p1, %s25_s15), 0  ;;  %p160_p3 = pnand %p966_p0, %p159_p2 }
   0x6   : > { %p193_p4 = scmp.lt.s32.totalorder (!%p160_p3), %s1211_s12, 1 }
   0x7   : > { %163 = sbr.rel (%p160_p3) target bundleno = 309 (0x135), region = 32 }
   0xc   : > { %v1140_v0 = vld [vmem:[%s1460_s1 + $0x38] sm:$0xff]   ;;  %v1221_v1 = vmov 0   ;;  %v1141_v2 = vld [vmem:[%s1460_s1 + $0x30] sm:$0xff]   ;;  %s1468_s12 = smov (!%p193_p4, %s1211_s12), 1  ;;  %v1142_v3 = vld [vmem:[%s1460_s1 + $0x28] sm:$0xff]   ;;  %vm469_vm0 = vcmask 130048  }
   0xd   : > { %518 = vmatprep.subr.bf16.mxu0 %v1221_v1  ;;  %1097 = vmatprep.subr.bf16.mxu1 %v1221_v1  ;;  %s1063_s20 = sshll.u32 %s1468_s12, 8  ;;  %v1143_v4 = vld [vmem:[%s1460_s1 + $0x20] sm:$0xff]   ;;  %v1144_v7 = vld [vmem:[%s1460_s1 + $0x18] sm:$0xff]   ;;  %v1145_v8 = vld [vmem:[%s1460_s1 + $0x10] sm:$0xff]   ;;  %s1064_s17 = sshll.u32 %s1468_s12, 7  ;;  %vm839_vm1 = vcmask 60416  }
   0xe   : > { %519 = vmatpush1.bf16.msra.mxu0 %v1140_v0  ;;  %1106 = vmatpush1.bf16.msra.mxu1 %v1140_v0  ;;  %s1275_s25 = scalar_lea.vmem %s1459_s0, %s1063_s20  ;;  %v1146_v9 = vld [vmem:[%s1460_s1 + $0x8] sm:$0xff]   ;;  %v1147_v10 = vld [vmem:[%s1460_s1] sm:$0xff]   ;;  %s1354_s20 = scalar_lea.vmem %s1462_s3, %s1064_s17 }
   0xf   : > { %520 = vmatprep.subr.bf16.mxu0 %v1221_v1  ;;  %1098 = vmatprep.subr.bf16.mxu1 %v1221_v1  ;;  %v1151_v5 = vld [vmem:[%s1275_s25 + $0x4] ss:$8 sps:$4 sm:$0xff]   ;;  %v1149_v12 = vld [vmem:[%s1275_s25] ss:$8 sps:$4 sm:$0xff]   ;;  %v1155_v14 = vld [vmem:[%s1275_s25 + $0x14] ss:$8 sps:$4 sm:$0xff]  }
  0x10   : > { %v1154_v6 = vld [vmem:[%s1275_s25 + $0x84] ss:$8 sps:$4 sm:$0xff]   ;;  %1013 = vmatprep.mubr.msk.bf16.mxu0 %vm469_vm0, %v1151_v5  ;;  %v1152_v13 = vld [vmem:[%s1275_s25 + $0x80] ss:$8 sps:$4 sm:$0xff]   ;;  %v1157_v15 = vld [vmem:[%s1275_s25 + $0x94] ss:$8 sps:$4 sm:$0xff]  }
  0x11   : > { %1021 = vmatprep.mubr.msk.bf16.mxu1 %vm469_vm0, %v1154_v6  ;;  %v1148_v11 = vld [vmem:[%s1460_s1 + $0x40] sm:$0xff]   ;;  %v1159_v16 = vld [vmem:[%s1275_s25 + $0x10] ss:$8 sps:$4 sm:$0xff]   ;;  %v1167_v22 = vld [vmem:[%s1275_s25 + $0x34] ss:$8 sps:$4 sm:$0xff]  }
  0x12   : > { %521 = vmatpush1.bf16.msra.mxu0 %v1141_v2  ;;  %1107 = vmatpush1.bf16.msra.mxu1 %v1141_v2  ;;  %v1160_v17 = vld [vmem:[%s1275_s25 + $0x90] ss:$8 sps:$4 sm:$0xff]   ;;  %v1161_v18 = vld [vmem:[%s1275_s25 + $0x24] ss:$8 sps:$4 sm:$0xff]   ;;  %v1165_v20 = vld [vmem:[%s1275_s25 + $0x20] ss:$8 sps:$4 sm:$0xff]  }
  0x13   : > { %522 = vmatprep.subr.bf16.mxu0 %v1221_v1  ;;  %1099 = vmatprep.subr.bf16.mxu1 %v1221_v1  ;;  %v1163_v19 = vld [vmem:[%s1275_s25 + $0xa4] ss:$8 sps:$4 sm:$0xff]   ;;  %v1166_v21 = vld [vmem:[%s1275_s25 + $0xa0] ss:$8 sps:$4 sm:$0xff]   ;;  %v1169_v23 = vld [vmem:[%s1275_s25 + $0xb4] ss:$8 sps:$4 sm:$0xff]  }
  0x14   : > { %v1171_v24 = vld [vmem:[%s1275_s25 + $0x30] ss:$8 sps:$4 sm:$0xff]   ;;  %v1173_v26 = vld [vmem:[%s1275_s25 + $0x44] ss:$8 sps:$4 sm:$0xff]   ;;  %v1177_v28 = vld [vmem:[%s1275_s25 + $0x40] ss:$8 sps:$4 sm:$0xff]  }
  0x15   : > { %v1172_v25 = vld [vmem:[%s1275_s25 + $0xb0] ss:$8 sps:$4 sm:$0xff]   ;;  %v1175_v27 = vld [vmem:[%s1275_s25 + $0xc4] ss:$8 sps:$4 sm:$0xff]   ;;  %v1178_v29 = vld [vmem:[%s1275_s25 + $0xc0] ss:$8 sps:$4 sm:$0xff]  }
  0x16   : > { %523 = vmatpush1.bf16.msra.mxu0 %v1142_v3  ;;  %1108 = vmatpush1.bf16.msra.mxu1 %v1142_v3  ;;  %v1179_v30 = vld [vmem:[%s1275_s25 + $0x54] ss:$8 sps:$4 sm:$0xff]   ;;  %v1183_v32 = vld [vmem:[%s1275_s25 + $0x50] ss:$8 sps:$4 sm:$0xff]   ;;  %v1185_v34 = vld [vmem:[%s1275_s25 + $0x64] ss:$8 sps:$4 sm:$0xff]  }
  0x17   : > { %524 = vmatprep.subr.bf16.mxu0 %v1221_v1  ;;  %1100 = vmatprep.subr.bf16.mxu1 %v1221_v1  ;;  %v1181_v31 = vld [vmem:[%s1275_s25 + $0xd4] ss:$8 sps:$4 sm:$0xff]   ;;  %v1184_v33 = vld [vmem:[%s1275_s25 + $0xd0] ss:$8 sps:$4 sm:$0xff]   ;;  %v1187_v35 = vld [vmem:[%s1275_s25 + $0xe4] ss:$8 sps:$4 sm:$0xff]  }
  0x18   : > { %v1189_v36 = vld [vmem:[%s1275_s25 + $0x60] ss:$8 sps:$4 sm:$0xff]   ;;  %v1191_v38 = vld [vmem:[%s1275_s25 + $0x74] ss:$8 sps:$4 sm:$0xff]   ;;  %v1195_v40 = vld [vmem:[%s1275_s25 + $0x70] ss:$8 sps:$4 sm:$0xff]  }
  0x19   : > { %v1190_v37 = vld [vmem:[%s1275_s25 + $0xe0] ss:$8 sps:$4 sm:$0xff]   ;;  %v1193_v39 = vld [vmem:[%s1275_s25 + $0xf4] ss:$8 sps:$4 sm:$0xff]   ;;  %v1196_v41 = vld [vmem:[%s1275_s25 + $0xf0] ss:$8 sps:$4 sm:$0xff]  }
  0x1a   : > { %525 = vmatpush1.bf16.msra.mxu0 %v1143_v4  ;;  %1109 = vmatpush1.bf16.msra.mxu1 %v1143_v4  ;;  %v1346_v42 = vld [vmem:[%s1461_s2] ss:$0 sm:$0xff] }
  0x1b   : > { %526 = vmatprep.subr.bf16.mxu0 %v1221_v1  ;;  %1101 = vmatprep.subr.bf16.mxu1 %v1221_v1 }
  0x1e   : > { %527 = vmatpush1.bf16.msra.mxu0 %v1144_v7  ;;  %1110 = vmatpush1.bf16.msra.mxu1 %v1144_v7 }
  0x1f   : > { %528 = vmatprep.subr.bf16.mxu0 %v1221_v1  ;;  %1102 = vmatprep.subr.bf16.mxu1 %v1221_v1 }
  0x22   : > { %529 = vmatpush1.bf16.msra.mxu0 %v1145_v8  ;;  %1111 = vmatpush1.bf16.msra.mxu1 %v1145_v8 }
  0x23   : > { %530 = vmatprep.subr.bf16.mxu0 %v1221_v1  ;;  %1103 = vmatprep.subr.bf16.mxu1 %v1221_v1 }
  0x26   : > { %531 = vmatpush1.bf16.msra.mxu0 %v1146_v9  ;;  %1112 = vmatpush1.bf16.msra.mxu1 %v1146_v9 }
  0x27   : > { %532 = vmatprep.subr.bf16.mxu0 %v1221_v1  ;;  %1104 = vmatprep.subr.bf16.mxu1 %v1221_v1 }
  0x2a   : > { %533 = vmatpush1.bf16.msra.mxu0 %v1147_v10  ;;  %1113 = vmatpush1.bf16.msra.mxu1 %v1147_v10 }
  0x2b   : > { %548 = vmatprep.subr.bf16.mxu0 %v1221_v1  ;;  %1105 = vmatprep.subr.bf16.mxu1 %v1221_v1 }
  0x2e   : > { %549 = vmatpush2.bf16.msra.mxu0 %v1148_v11  ;;  %1114 = vmatpush2.bf16.msra.mxu1 %v1148_v11 }
  0x31   : > { %551 = vmatmul.mubr.bf16.vlgmr.msra.gmra.mxu0 %v1149_v12  ;;  %615 = vmatmul.mubr.bf16.vlgmr.msra.gmra.mxu1 %v1152_v13 }
  0x32   : > { %1014 = vmatprep.mubr.msk.bf16.mxu0 %vm469_vm0, %v1155_v14  ;;  %1022 = vmatprep.mubr.msk.bf16.mxu1 %vm469_vm0, %v1157_v15 }
  0x39   : > { %559 = vmatmul.mubr.bf16.gmra.mxu0 %v1159_v16  ;;  %623 = vmatmul.mubr.bf16.gmra.mxu1 %v1160_v17 }
  0x3a   : > { %1015 = vmatprep.mubr.msk.bf16.mxu0 %vm469_vm0, %v1161_v18  ;;  %1023 = vmatprep.mubr.msk.bf16.mxu1 %vm469_vm0, %v1163_v19 }
  0x41   : > { %567 = vmatmul.mubr.bf16.gmra.mxu0 %v1165_v20  ;;  %631 = vmatmul.mubr.bf16.gmra.mxu1 %v1166_v21 }
  0x42   : > { %1016 = vmatprep.mubr.msk.bf16.mxu0 %vm469_vm0, %v1167_v22  ;;  %1024 = vmatprep.mubr.msk.bf16.mxu1 %vm469_vm0, %v1169_v23 }
  0x49   : > { %575 = vmatmul.mubr.bf16.gmra.mxu0 %v1171_v24  ;;  %639 = vmatmul.mubr.bf16.gmra.mxu1 %v1172_v25 }
  0x4a   : > { %1017 = vmatprep.mubr.msk.bf16.mxu0 %vm469_vm0, %v1173_v26  ;;  %1025 = vmatprep.mubr.msk.bf16.mxu1 %vm469_vm0, %v1175_v27 }
  0x51   : > { %583 = vmatmul.mubr.bf16.gmra.mxu0 %v1177_v28  ;;  %647 = vmatmul.mubr.bf16.gmra.mxu1 %v1178_v29 }
  0x52   : > { %1018 = vmatprep.mubr.msk.bf16.mxu0 %vm469_vm0, %v1179_v30  ;;  %1026 = vmatprep.mubr.msk.bf16.mxu1 %vm469_vm0, %v1181_v31 }
  0x59   : > { %591 = vmatmul.mubr.bf16.gmra.mxu0 %v1183_v32  ;;  %655 = vmatmul.mubr.bf16.gmra.mxu1 %v1184_v33 }
  0x5a   : > { %1019 = vmatprep.mubr.msk.bf16.mxu0 %vm469_vm0, %v1185_v34  ;;  %1027 = vmatprep.mubr.msk.bf16.mxu1 %vm469_vm0, %v1187_v35 }
  0x61   : > { %599 = vmatmul.mubr.bf16.gmra.mxu0 %v1189_v36  ;;  %663 = vmatmul.mubr.bf16.gmra.mxu1 %v1190_v37 }
  0x62   : > { %1020 = vmatprep.mubr.msk.bf16.mxu0 %vm469_vm0, %v1191_v38  ;;  %1028 = vmatprep.mubr.msk.bf16.mxu1 %vm469_vm0, %v1193_v39 }
  0x69   : > { %607 = vmatmul.mubr.bf16.gmra.mxu0 %v1195_v40  ;;  %671 = vmatmul.mubr.bf16.gmra.mxu1 %v1196_v41 }
  0xf1   : > { %v552_v43 = vpop.f32.mrf.mxu0  ;;  %v616_v44 = vpop.f32.mrf.mxu1 }
  0xf2   : > { %v553_v45 = vadd.f32 %v1346_v42, %v552_v43  ;;  %v617_v46 = vadd.f32 %v1346_v42, %v616_v44 }
  0xf3   : > { %v554_v47 = vpop.f32.mrf.mxu0  ;;  %v618_v48 = vpop.f32.mrf.mxu1 }
  0xf4   : > { %v679_v49 = vmax.f32 %v553_v45, 0.0  ;;  %v695_v50 = vmax.f32 %v617_v46, 0.0 }
  0xf5   : > { %v555_v51 = vpop.f32.mrf.mxu0  ;;  %v619_v52 = vpop.f32.mrf.mxu1 }
  0xf6   : > { %v1065_v53 = vpack.c.bf16 %v679_v49, %v679_v49  ;;  %v1081_v54 = vpack.c.bf16 %v695_v50, %v695_v50  ;;  %v556_v55 = vadd.f32 %v1346_v42, %v555_v51  ;;  %v620_v56 = vadd.f32 %v1346_v42, %v619_v52 }
  0xf7   : > { %v557_v57 = vpop.f32.mrf.mxu0  ;;  %v621_v58 = vpop.f32.mrf.mxu1 }
  0xf8   : > { %840 = vst.msk [vmem:[%s1354_s20] sm:$0xf] %vm839_vm1, %v1065_v53  ;;  %856 = vst.msk [vmem:[%s1354_s20 + $0x40] sm:$0xf] %vm839_vm1, %v1081_v54  ;;  %v680_v59 = vmax.f32 %v556_v55, 0.0  ;;  %v696_v60 = vmax.f32 %v620_v56, 0.0 }
  0xf9   : > { %v560_v61 = vpop.f32.mrf.mxu0  ;;  %v624_v62 = vpop.f32.mrf.mxu1 }
  0xfa   : > { %v1066_v63 = vpack.c.bf16 %v680_v59, %v680_v59  ;;  %v1082_v0 = vpack.c.bf16 %v696_v60, %v696_v60  ;;  %v561_v1 = vadd.f32 %v1346_v42, %v560_v61  ;;  %v625_v2 = vadd.f32 %v1346_v42, %v624_v62 }
  0xfb   : > { %v562_v3 = vpop.f32.mrf.mxu0  ;;  %v626_v4 = vpop.f32.mrf.mxu1 }
  0xfc   : > { %841 = vst.msk [vmem:[%s1354_s20 + $0x4] sm:$0xf] %vm839_vm1, %v1066_v63  ;;  %857 = vst.msk [vmem:[%s1354_s20 + $0x44] sm:$0xf] %vm839_vm1, %v1082_v0  ;;  %v681_v5 = vmax.f32 %v561_v1, 0.0  ;;  %v697_v6 = vmax.f32 %v625_v2, 0.0 }
  0xfd   : > { %v563_v7 = vpop.f32.mrf.mxu0  ;;  %v627_v8 = vpop.f32.mrf.mxu1 }
  0xfe   : > { %v1067_v9 = vpack.c.bf16 %v681_v5, %v681_v5  ;;  %v1083_v10 = vpack.c.bf16 %v697_v6, %v697_v6  ;;  %v564_v11 = vadd.f32 %v1346_v42, %v563_v7  ;;  %v628_v12 = vadd.f32 %v1346_v42, %v627_v8 }
  0xff   : > { %v565_v13 = vpop.f32.mrf.mxu0  ;;  %v629_v14 = vpop.f32.mrf.mxu1 }
 0x100   : > { %842 = vst.msk [vmem:[%s1354_s20 + $0x8] sm:$0xf] %vm839_vm1, %v1067_v9  ;;  %858 = vst.msk [vmem:[%s1354_s20 + $0x48] sm:$0xf] %vm839_vm1, %v1083_v10  ;;  %v682_v15 = vmax.f32 %v564_v11, 0.0  ;;  %v698_v16 = vmax.f32 %v628_v12, 0.0 }
 0x101   : > { %v568_v17 = vpop.f32.mrf.mxu0  ;;  %v632_v18 = vpop.f32.mrf.mxu1 }
 0x102   : > { %v1068_v19 = vpack.c.bf16 %v682_v15, %v682_v15  ;;  %v1084_v20 = vpack.c.bf16 %v698_v16, %v698_v16  ;;  %v569_v21 = vadd.f32 %v1346_v42, %v568_v17  ;;  %v633_v22 = vadd.f32 %v1346_v42, %v632_v18 }
 0x103   : > { %v570_v23 = vpop.f32.mrf.mxu0  ;;  %v634_v24 = vpop.f32.mrf.mxu1 }
 0x104   : > { %843 = vst.msk [vmem:[%s1354_s20 + $0xc] sm:$0xf] %vm839_vm1, %v1068_v19  ;;  %859 = vst.msk [vmem:[%s1354_s20 + $0x4c] sm:$0xf] %vm839_vm1, %v1084_v20  ;;  %v683_v25 = vmax.f32 %v569_v21, 0.0  ;;  %v699_v26 = vmax.f32 %v633_v22, 0.0 }
 0x105   : > { %v571_v27 = vpop.f32.mrf.mxu0  ;;  %v635_v28 = vpop.f32.mrf.mxu1 }
 0x106   : > { %v1069_v29 = vpack.c.bf16 %v683_v25, %v683_v25  ;;  %v1085_v30 = vpack.c.bf16 %v699_v26, %v699_v26  ;;  %v572_v31 = vadd.f32 %v1346_v42, %v571_v27  ;;  %v636_v32 = vadd.f32 %v1346_v42, %v635_v28 }
 0x107   : > { %v573_v33 = vpop.f32.mrf.mxu0  ;;  %v637_v34 = vpop.f32.mrf.mxu1 }
 0x108   : > { %844 = vst.msk [vmem:[%s1354_s20 + $0x10] sm:$0xf] %vm839_vm1, %v1069_v29  ;;  %860 = vst.msk [vmem:[%s1354_s20 + $0x50] sm:$0xf] %vm839_vm1, %v1085_v30  ;;  %v684_v35 = vmax.f32 %v572_v31, 0.0  ;;  %v700_v36 = vmax.f32 %v636_v32, 0.0 }
 0x109   : > { %v576_v37 = vpop.f32.mrf.mxu0  ;;  %v640_v38 = vpop.f32.mrf.mxu1 }
 0x10a   : > { %v1070_v39 = vpack.c.bf16 %v684_v35, %v684_v35  ;;  %v1086_v40 = vpack.c.bf16 %v700_v36, %v700_v36  ;;  %v577_v41 = vadd.f32 %v1346_v42, %v576_v37  ;;  %v641_v43 = vadd.f32 %v1346_v42, %v640_v38 }
 0x10b   : > { %v578_v44 = vpop.f32.mrf.mxu0  ;;  %v642_v45 = vpop.f32.mrf.mxu1 }
 0x10c   : > { %845 = vst.msk [vmem:[%s1354_s20 + $0x14] sm:$0xf] %vm839_vm1, %v1070_v39  ;;  %861 = vst.msk [vmem:[%s1354_s20 + $0x54] sm:$0xf] %vm839_vm1, %v1086_v40  ;;  %v685_v46 = vmax.f32 %v577_v41, 0.0  ;;  %v701_v47 = vmax.f32 %v641_v43, 0.0 }
 0x10d   : > { %v579_v48 = vpop.f32.mrf.mxu0  ;;  %v643_v49 = vpop.f32.mrf.mxu1 }
 0x10e   : > { %v1071_v50 = vpack.c.bf16 %v685_v46, %v685_v46  ;;  %v1087_v51 = vpack.c.bf16 %v701_v47, %v701_v47  ;;  %v580_v52 = vadd.f32 %v1346_v42, %v579_v48  ;;  %v644_v53 = vadd.f32 %v1346_v42, %v643_v49 }
 0x10f   : > { %v581_v54 = vpop.f32.mrf.mxu0  ;;  %v645_v55 = vpop.f32.mrf.mxu1 }
 0x110   : > { %846 = vst.msk [vmem:[%s1354_s20 + $0x18] sm:$0xf] %vm839_vm1, %v1071_v50  ;;  %862 = vst.msk [vmem:[%s1354_s20 + $0x58] sm:$0xf] %vm839_vm1, %v1087_v51  ;;  %v686_v56 = vmax.f32 %v580_v52, 0.0  ;;  %v702_v57 = vmax.f32 %v644_v53, 0.0 }
 0x111   : > { %v584_v58 = vpop.f32.mrf.mxu0  ;;  %v648_v59 = vpop.f32.mrf.mxu1 }
 0x112   : > { %v1072_v60 = vpack.c.bf16 %v686_v56, %v686_v56  ;;  %v1088_v61 = vpack.c.bf16 %v702_v57, %v702_v57  ;;  %v585_v62 = vadd.f32 %v1346_v42, %v584_v58  ;;  %v649_v63 = vadd.f32 %v1346_v42, %v648_v59 }
 0x113   : > { %v586_v0 = vpop.f32.mrf.mxu0  ;;  %v650_v1 = vpop.f32.mrf.mxu1 }
 0x114   : > { %847 = vst.msk [vmem:[%s1354_s20 + $0x1c] sm:$0xf] %vm839_vm1, %v1072_v60  ;;  %863 = vst.msk [vmem:[%s1354_s20 + $0x5c] sm:$0xf] %vm839_vm1, %v1088_v61  ;;  %v687_v2 = vmax.f32 %v585_v62, 0.0  ;;  %v703_v3 = vmax.f32 %v649_v63, 0.0 }
 0x115   : > { %v587_v4 = vpop.f32.mrf.mxu0  ;;  %v651_v5 = vpop.f32.mrf.mxu1 }
 0x116   : > { %v1073_v6 = vpack.c.bf16 %v687_v2, %v687_v2  ;;  %v1089_v7 = vpack.c.bf16 %v703_v3, %v703_v3  ;;  %v588_v8 = vadd.f32 %v1346_v42, %v587_v4  ;;  %v652_v9 = vadd.f32 %v1346_v42, %v651_v5 }
 0x117   : > { %v589_v10 = vpop.f32.mrf.mxu0  ;;  %v653_v11 = vpop.f32.mrf.mxu1 }
 0x118   : > { %848 = vst.msk [vmem:[%s1354_s20 + $0x20] sm:$0xf] %vm839_vm1, %v1073_v6  ;;  %864 = vst.msk [vmem:[%s1354_s20 + $0x60] sm:$0xf] %vm839_vm1, %v1089_v7  ;;  %v688_v12 = vmax.f32 %v588_v8, 0.0  ;;  %v704_v13 = vmax.f32 %v652_v9, 0.0 }
 0x119   : > { %v592_v14 = vpop.f32.mrf.mxu0  ;;  %v656_v15 = vpop.f32.mrf.mxu1 }
 0x11a   : > { %v1074_v16 = vpack.c.bf16 %v688_v12, %v688_v12  ;;  %v1090_v17 = vpack.c.bf16 %v704_v13, %v704_v13  ;;  %v593_v18 = vadd.f32 %v1346_v42, %v592_v14  ;;  %v657_v19 = vadd.f32 %v1346_v42, %v656_v15 }
 0x11b   : > { %v594_v20 = vpop.f32.mrf.mxu0  ;;  %v658_v21 = vpop.f32.mrf.mxu1 }
 0x11c   : > { %849 = vst.msk [vmem:[%s1354_s20 + $0x24] sm:$0xf] %vm839_vm1, %v1074_v16  ;;  %865 = vst.msk [vmem:[%s1354_s20 + $0x64] sm:$0xf] %vm839_vm1, %v1090_v17  ;;  %v689_v22 = vmax.f32 %v593_v18, 0.0  ;;  %v705_v23 = vmax.f32 %v657_v19, 0.0 }
 0x11d   : > { %v595_v24 = vpop.f32.mrf.mxu0  ;;  %v659_v25 = vpop.f32.mrf.mxu1 }
 0x11e   : > { %v1075_v26 = vpack.c.bf16 %v689_v22, %v689_v22  ;;  %v1091_v27 = vpack.c.bf16 %v705_v23, %v705_v23  ;;  %v596_v28 = vadd.f32 %v1346_v42, %v595_v24  ;;  %v660_v29 = vadd.f32 %v1346_v42, %v659_v25 }
 0x11f   : > { %v597_v30 = vpop.f32.mrf.mxu0  ;;  %v661_v31 = vpop.f32.mrf.mxu1 }
 0x120   : > { %850 = vst.msk [vmem:[%s1354_s20 + $0x28] sm:$0xf] %vm839_vm1, %v1075_v26  ;;  %866 = vst.msk [vmem:[%s1354_s20 + $0x68] sm:$0xf] %vm839_vm1, %v1091_v27  ;;  %v690_v32 = vmax.f32 %v596_v28, 0.0  ;;  %v706_v33 = vmax.f32 %v660_v29, 0.0 }
 0x121   : > { %v600_v34 = vpop.f32.mrf.mxu0  ;;  %v664_v35 = vpop.f32.mrf.mxu1 }
 0x122   : > { %v1076_v36 = vpack.c.bf16 %v690_v32, %v690_v32  ;;  %v1092_v37 = vpack.c.bf16 %v706_v33, %v706_v33  ;;  %v601_v38 = vadd.f32 %v1346_v42, %v600_v34  ;;  %v665_v39 = vadd.f32 %v1346_v42, %v664_v35 }
 0x123   : > { %v602_v40 = vpop.f32.mrf.mxu0  ;;  %v666_v41 = vpop.f32.mrf.mxu1 }
 0x124   : > { %851 = vst.msk [vmem:[%s1354_s20 + $0x2c] sm:$0xf] %vm839_vm1, %v1076_v36  ;;  %867 = vst.msk [vmem:[%s1354_s20 + $0x6c] sm:$0xf] %vm839_vm1, %v1092_v37  ;;  %v691_v43 = vmax.f32 %v601_v38, 0.0  ;;  %v707_v44 = vmax.f32 %v665_v39, 0.0 }
 0x125   : > { %v603_v45 = vpop.f32.mrf.mxu0  ;;  %v667_v46 = vpop.f32.mrf.mxu1 }
 0x126   : > { %v1077_v47 = vpack.c.bf16 %v691_v43, %v691_v43  ;;  %v1093_v48 = vpack.c.bf16 %v707_v44, %v707_v44  ;;  %v604_v49 = vadd.f32 %v1346_v42, %v603_v45  ;;  %v668_v50 = vadd.f32 %v1346_v42, %v667_v46 }
 0x127   : > { %v605_v51 = vpop.f32.mrf.mxu0  ;;  %v669_v52 = vpop.f32.mrf.mxu1 }
 0x128   : > { %852 = vst.msk [vmem:[%s1354_s20 + $0x30] sm:$0xf] %vm839_vm1, %v1077_v47  ;;  %868 = vst.msk [vmem:[%s1354_s20 + $0x70] sm:$0xf] %vm839_vm1, %v1093_v48  ;;  %v692_v53 = vmax.f32 %v604_v49, 0.0  ;;  %v708_v54 = vmax.f32 %v668_v50, 0.0 }
 0x129   : > { %v608_v55 = vpop.f32.mrf.mxu0  ;;  %v672_v56 = vpop.f32.mrf.mxu1 }
 0x12a   : > { %v1078_v57 = vpack.c.bf16 %v692_v53, %v692_v53  ;;  %v1094_v58 = vpack.c.bf16 %v708_v54, %v708_v54  ;;  %v609_v59 = vadd.f32 %v1346_v42, %v608_v55  ;;  %v673_v60 = vadd.f32 %v1346_v42, %v672_v56 }
 0x12b   : > { %v610_v61 = vpop.f32.mrf.mxu0  ;;  %v674_v62 = vpop.f32.mrf.mxu1 }
 0x12c   : > { %853 = vst.msk [vmem:[%s1354_s20 + $0x34] sm:$0xf] %vm839_vm1, %v1078_v57  ;;  %869 = vst.msk [vmem:[%s1354_s20 + $0x74] sm:$0xf] %vm839_vm1, %v1094_v58  ;;  %v693_v63 = vmax.f32 %v609_v59, 0.0  ;;  %v709_v0 = vmax.f32 %v673_v60, 0.0 }
 0x12d   : > { %v611_v1 = vpop.f32.mrf.mxu0  ;;  %v675_v2 = vpop.f32.mrf.mxu1 }
 0x12e   : > { %v1079_v3 = vpack.c.bf16 %v693_v63, %v693_v63  ;;  %v1095_v4 = vpack.c.bf16 %v709_v0, %v709_v0  ;;  %v612_v5 = vadd.f32 %v1346_v42, %v611_v1  ;;  %v676_v6 = vadd.f32 %v1346_v42, %v675_v2 }
 0x12f   : > { %v613_v7 = vpop.f32.mrf.mxu0  ;;  %v677_v8 = vpop.f32.mrf.mxu1 }
 0x130   : > { %854 = vst.msk [vmem:[%s1354_s20 + $0x38] sm:$0xf] %vm839_vm1, %v1079_v3  ;;  %870 = vst.msk [vmem:[%s1354_s20 + $0x78] sm:$0xf] %vm839_vm1, %v1095_v4  ;;  %v694_v9 = vmax.f32 %v612_v5, 0.0  ;;  %v710_v10 = vmax.f32 %v676_v6, 0.0 }
 0x132   : > { %v1080_v11 = vpack.c.bf16 %v694_v9, %v694_v9  ;;  %v1096_v12 = vpack.c.bf16 %v710_v10, %v710_v10 }
 0x134   : > { %855 = vst.msk [vmem:[%s1354_s20 + $0x3c] sm:$0xf] %vm839_vm1, %v1080_v11  ;;  %871 = vst.msk [vmem:[%s1354_s20 + $0x7c] sm:$0xf] %vm839_vm1, %v1096_v12 }
 0x135 PF: > { %s13_s14 = sadd.s32 1, %s1219_s14   ;;  %s1463_s12 = smov %s1215_s13 }
 0x136   : > { %p10_p5 = scmp.ge.s32.totalorder %s13_s14, 4   ;;  %s1464_s13 = smov %s1466_s15 }
 0x138   :  { %12 = sbr.rel (!%p10_p5) target bundleno = 2 (0x2), region = 62 }

// kernel: baseline1net_forward.33
= control target key start
LH: loop header
LB: loop body
LE: loop exit
PB: predicated region body
PF: predicated region fallthrough
CT: control target
= control target key end

     0   :  { %s1075_s12 = smov 0   ;;  %s1077_s13 = smov 0   ;;  %s1264_s0 = inlined_call_operand.vmem [shape: bf16[2,256,72], index: 0, kind: input, shape index: {}]   ;;  %s1265_s1 = inlined_call_operand.vmem [shape: bf16[72,3], index: 1, kind: input, shape index: {}]   ;;  %s1266_s2 = inlined_call_operand.vmem [shape: f32[1,3], index: 2, kind: input, shape index: {}]   ;;  %s1267_s3 = inlined_call_operand.vmem [shape: f32[2,256,3], index: 3, kind: output, shape index: {}]  }
   0x1   :  { %s1079_s14 = smov 0  }
   0x2 LB: > { %s25_s15 = sadd.s32 1, %s1049_s13  ;;  %p800_p0 = scmp.ge.s32.totalorder %s1053_s14, 1  ;;  %s1053_s14 = sphi %s1079_s14, %s13_s14   ;;  %s1049_s13 = sphi %s1077_s13, %s1269_s13   ;;  %s1045_s12 = sphi %s1075_s12, %s1268_s12  }
   0x3   : > { %p27_p1 = scmp.ge.s32.totalorder %s25_s15, 2  ;;  %p158_p2 = scmp.lt.s32.totalorder %s1053_s14, 3 }
   0x5   : > { %s1271_s15 = smov (%p27_p1, %s25_s15), 0  ;;  %p159_p3 = pnand %p800_p0, %p158_p2 }
   0x6   : > { %p191_p4 = scmp.lt.s32.totalorder (!%p159_p3), %s1045_s12, 1 }
   0x7   : > { %162 = sbr.rel (%p159_p3) target bundleno = 278 (0x116), region = 32 }
   0xc   : > { %v946_v0 = vld [vmem:[%s1265_s1 + $0x20] ss:$0 sps:$4 sm:$0xff]   ;;  %vm415_vm0 = vcmask 1043456   ;;  %v947_v1 = vld [vmem:[%s1265_s1 + $0x18] sm:$0xff]   ;;  %v948_v3 = vld [vmem:[%s1265_s1 + $0x10] sm:$0xff]   ;;  %s1273_s12 = smov (!%p191_p4, %s1045_s12), 1 }
   0xd   : > { %920 = vmatprep.subr.msk.bf16.mxu0 %vm415_vm0, %v946_v0  ;;  %921 = vmatprep.subr.msk.bf16.mxu1 %vm415_vm0, %v946_v0  ;;  %v417_v2 = vsel %vm415_vm0, %v946_v0, 0  ;;  %s845_s22 = sshll.u32 %s1273_s12, 7  ;;  %v949_v4 = vld [vmem:[%s1265_s1 + $0x8] sm:$0xff]   ;;  %vm366_vm1 = vcmask 588800   ;;  %v950_v7 = vld [vmem:[%s1265_s1] sm:$0xff]   ;;  %s846_s5 = sshll.u32 %s1273_s12, 8 }
   0xe   : > { %869 = vmatpush3.bf16.msra.mxu0 %v417_v2  ;;  %915 = vmatpush3.bf16.msra.mxu1 %v417_v2  ;;  %s1111_s27 = scalar_lea.vmem %s1264_s0, %s845_s22  ;;  %v1151_v22 = vld [vmem:[%s1266_s2] ss:$0 sm:$0xff]  ;;  %s1175_s8 = scalar_lea.vmem %s1267_s3, %s846_s5  ;;  %vm676_vm2 = vcmask 23552  }
   0xf   : > { %870 = vmatprep.subr.bf16.mxu0 %v947_v1  ;;  %911 = vmatprep.subr.bf16.mxu1 %v947_v1  ;;  %v951_v5 = vld [vmem:[%s1111_s27] sm:$0xff]   ;;  %v953_v8 = vld [vmem:[%s1111_s27 + $0x8] sm:$0xff]   ;;  %v955_v10 = vld [vmem:[%s1111_s27 + $0x10] sm:$0xff]  }
  0x10   : > { %v952_v6 = vld [vmem:[%s1111_s27 + $0x40] sm:$0xff]   ;;  %878 = vmatprep.mubr.msk.bf16.mxu0 %vm366_vm1, %v951_v5  ;;  %v954_v9 = vld [vmem:[%s1111_s27 + $0x48] sm:$0xff]   ;;  %v956_v11 = vld [vmem:[%s1111_s27 + $0x50] sm:$0xff]  }
  0x11   : > { %894 = vmatprep.mubr.msk.bf16.mxu1 %vm366_vm1, %v952_v6  ;;  %v957_v12 = vld [vmem:[%s1111_s27 + $0x18] sm:$0xff]   ;;  %v959_v14 = vld [vmem:[%s1111_s27 + $0x20] sm:$0xff]   ;;  %v961_v16 = vld [vmem:[%s1111_s27 + $0x28] sm:$0xff]  }
  0x12   : > { %871 = vmatpush3.bf16.msra.mxu0 %v947_v1  ;;  %916 = vmatpush3.bf16.msra.mxu1 %v947_v1  ;;  %v958_v13 = vld [vmem:[%s1111_s27 + $0x58] sm:$0xff]   ;;  %v960_v15 = vld [vmem:[%s1111_s27 + $0x60] sm:$0xff]   ;;  %v962_v17 = vld [vmem:[%s1111_s27 + $0x68] sm:$0xff]  }
  0x13   : > { %872 = vmatprep.subr.bf16.mxu0 %v948_v3  ;;  %912 = vmatprep.subr.bf16.mxu1 %v948_v3  ;;  %v963_v18 = vld [vmem:[%s1111_s27 + $0x30] sm:$0xff]   ;;  %v965_v20 = vld [vmem:[%s1111_s27 + $0x38] sm:$0xff]  }
  0x14   : > { %v964_v19 = vld [vmem:[%s1111_s27 + $0x70] sm:$0xff]   ;;  %v966_v21 = vld [vmem:[%s1111_s27 + $0x78] sm:$0xff]  }
  0x16   : > { %873 = vmatpush3.bf16.msra.mxu0 %v948_v3  ;;  %917 = vmatpush3.bf16.msra.mxu1 %v948_v3 }
  0x17   : > { %874 = vmatprep.subr.bf16.mxu0 %v949_v4  ;;  %913 = vmatprep.subr.bf16.mxu1 %v949_v4 }
  0x1a   : > { %875 = vmatpush3.bf16.msra.mxu0 %v949_v4  ;;  %918 = vmatpush3.bf16.msra.mxu1 %v949_v4 }
  0x1b   : > { %876 = vmatprep.subr.bf16.mxu0 %v950_v7  ;;  %914 = vmatprep.subr.bf16.mxu1 %v950_v7 }
  0x1e   : > { %877 = vmatpush3.bf16.msra.mxu0 %v950_v7  ;;  %919 = vmatpush3.bf16.msra.mxu1 %v950_v7 }
  0x21   : > { %879 = vmatmul.mubr.msk.bf16.vlgmr.msra.gmra.mxu0 %vm366_vm1, %v953_v8  ;;  %895 = vmatmul.mubr.msk.bf16.vlgmr.msra.gmra.mxu1 %vm366_vm1, %v954_v9 }
  0x22   : > { %882 = vmatprep.mubr.msk.bf16.mxu0 %vm366_vm1, %v955_v10  ;;  %898 = vmatprep.mubr.msk.bf16.mxu1 %vm366_vm1, %v956_v11 }
  0x29   : > { %883 = vmatmul.mubr.msk.bf16.gmra.mxu0 %vm366_vm1, %v957_v12  ;;  %899 = vmatmul.mubr.msk.bf16.gmra.mxu1 %vm366_vm1, %v958_v13 }
  0x2a   : > { %886 = vmatprep.mubr.msk.bf16.mxu0 %vm366_vm1, %v959_v14  ;;  %902 = vmatprep.mubr.msk.bf16.mxu1 %vm366_vm1, %v960_v15 }
  0x31   : > { %887 = vmatmul.mubr.msk.bf16.gmra.mxu0 %vm366_vm1, %v961_v16  ;;  %903 = vmatmul.mubr.msk.bf16.gmra.mxu1 %vm366_vm1, %v962_v17 }
  0x32   : > { %890 = vmatprep.mubr.msk.bf16.mxu0 %vm366_vm1, %v963_v18  ;;  %906 = vmatprep.mubr.msk.bf16.mxu1 %vm366_vm1, %v964_v19 }
  0x39   : > { %891 = vmatmul.mubr.msk.bf16.gmra.mxu0 %vm366_vm1, %v965_v20  ;;  %907 = vmatmul.mubr.msk.bf16.gmra.mxu1 %vm366_vm1, %v966_v21 }
  0xe1   : > { %v880_v23 = vpop.f32.mrf.mxu0  ;;  %v896_v24 = vpop.f32.mrf.mxu1 }
  0xe2   : > { %v462_v25 = vadd.f32 %v880_v23, %v1151_v22  ;;  %v526_v26 = vadd.f32 %v896_v24, %v1151_v22 }
  0xe3   : > { %v453_v27 = vpop.f32.mrf.mxu0  ;;  %v517_v28 = vpop.f32.mrf.mxu1 }
  0xe4   : > { %967 = vtanh.f32 %v462_v25  ;;  %v454_v29 = vadd.f32 %v1151_v22, %v453_v27  ;;  %v518_v30 = vadd.f32 %v1151_v22, %v517_v28 }
  0xe5   : > { %969 = vtanh.f32 %v526_v26  ;;  %v881_v31 = vpop.f32.mrf.mxu0  ;;  %v897_v32 = vpop.f32.mrf.mxu1 }
  0xe6   : > { %971 = vtanh.f32 %v454_v29  ;;  %v465_v33 = vadd.f32 %v881_v31, %v1151_v22  ;;  %v529_v34 = vadd.f32 %v897_v32, %v1151_v22 }
  0xe7   : > { %973 = vtanh.f32 %v518_v30  ;;  %v456_v35 = vpop.f32.mrf.mxu0  ;;  %v520_v36 = vpop.f32.mrf.mxu1 }
  0xe8   : > { %975 = vtanh.f32 %v465_v33  ;;  %v457_v37 = vadd.f32 %v1151_v22, %v456_v35  ;;  %v521_v38 = vadd.f32 %v1151_v22, %v520_v36 }
  0xe9   : > { %977 = vtanh.f32 %v529_v34  ;;  %v884_v39 = vpop.f32.mrf.mxu0  ;;  %v900_v40 = vpop.f32.mrf.mxu1 }
  0xea   : > { %979 = vtanh.f32 %v457_v37  ;;  %v478_v41 = vadd.f32 %v884_v39, %v1151_v22  ;;  %v542_v42 = vadd.f32 %v900_v40, %v1151_v22 }
  0xeb   : > { %981 = vtanh.f32 %v521_v38  ;;  %v469_v43 = vpop.f32.mrf.mxu0  ;;  %v533_v44 = vpop.f32.mrf.mxu1 }
  0xec   : > { %983 = vtanh.f32 %v478_v41  ;;  %v470_v45 = vadd.f32 %v1151_v22, %v469_v43  ;;  %v534_v46 = vadd.f32 %v1151_v22, %v533_v44 }
  0xed   : > { %985 = vtanh.f32 %v542_v42  ;;  %v885_v47 = vpop.f32.mrf.mxu0  ;;  %v901_v48 = vpop.f32.mrf.mxu1 }
  0xee   : > { %987 = vtanh.f32 %v470_v45  ;;  %v481_v49 = vadd.f32 %v885_v47, %v1151_v22  ;;  %v545_v50 = vadd.f32 %v901_v48, %v1151_v22 }
  0xef   : > { %989 = vtanh.f32 %v534_v46  ;;  %v472_v51 = vpop.f32.mrf.mxu0  ;;  %v536_v52 = vpop.f32.mrf.mxu1 }
  0xf0   : > { %991 = vtanh.f32 %v481_v49  ;;  %v473_v53 = vadd.f32 %v1151_v22, %v472_v51  ;;  %v537_v54 = vadd.f32 %v1151_v22, %v536_v52 }
  0xf1   : > { %v968_v55 = vpop.eup %967  ;;  %993 = vtanh.f32 %v545_v50  ;;  %v888_v56 = vpop.f32.mrf.mxu0 }
  0xf2   : > { %v904_v57 = vpop.f32.mrf.mxu1  ;;  %v970_v58 = vpop.eup %969  ;;  %v614_v59 = vadd.f32 1.0, %v968_v55  ;;  %995 = vtanh.f32 %v473_v53  ;;  %v494_v60 = vadd.f32 %v888_v56, %v1151_v22 }
  0xf3   : > { %v558_v61 = vadd.f32 %v904_v57, %v1151_v22  ;;  %v972_v62 = vpop.eup %971  ;;  %v630_v63 = vadd.f32 1.0, %v970_v58  ;;  %997 = vtanh.f32 %v537_v54  ;;  %v485_v0 = vpop.f32.mrf.mxu0 }
  0xf4   : > { %v549_v1 = vpop.f32.mrf.mxu1  ;;  %v974_v2 = vpop.eup %973  ;;  %v646_v3 = vmul.f32 0.5, %v614_v59  ;;  %v612_v4 = vadd.f32 1.0, %v972_v62  ;;  %999 = vtanh.f32 %v494_v60  ;;  %v486_v5 = vadd.f32 %v1151_v22, %v485_v0 }
  0xf5   : > { %v976_v6 = vpop.eup %975  ;;  %v662_v7 = vmul.f32 0.5, %v630_v63  ;;  %v628_v8 = vadd.f32 1.0, %v974_v2  ;;  %1001 = vtanh.f32 %v558_v61  ;;  %v550_v9 = vadd.f32 %v1151_v22, %v549_v1  ;;  %v889_v10 = vpop.f32.mrf.mxu0 }
  0xf6   : > { %v905_v11 = vpop.f32.mrf.mxu1  ;;  %v978_v12 = vpop.eup %977  ;;  %679 = vst.msk [vmem:[%s1175_s8 + $0x10] sm:$0xff] %vm676_vm2, %v646_v3  ;;  %v644_v13 = vmul.f32 0.5, %v612_v4  ;;  %v615_v14 = vadd.f32 1.0, %v976_v6  ;;  %1003 = vtanh.f32 %v486_v5  ;;  %v497_v15 = vadd.f32 %v889_v10, %v1151_v22 }
  0xf7   : > { %v980_v16 = vpop.eup %979  ;;  %695 = vst.msk [vmem:[%s1175_s8 + $0x90] sm:$0xff] %vm676_vm2, %v662_v7  ;;  %v660_v17 = vmul.f32 0.5, %v628_v8  ;;  %v631_v18 = vadd.f32 1.0, %v978_v12  ;;  %1005 = vtanh.f32 %v550_v9  ;;  %v561_v19 = vadd.f32 %v905_v11, %v1151_v22  ;;  %v488_v20 = vpop.f32.mrf.mxu0 }
  0xf8   : > { %v552_v21 = vpop.f32.mrf.mxu1  ;;  %v982_v23 = vpop.eup %981  ;;  %677 = vst.msk [vmem:[%s1175_s8] sm:$0xff] %vm676_vm2, %v644_v13  ;;  %v647_v24 = vmul.f32 0.5, %v615_v14  ;;  %v613_v25 = vadd.f32 1.0, %v980_v16  ;;  %1007 = vtanh.f32 %v497_v15  ;;  %v489_v26 = vadd.f32 %v1151_v22, %v488_v20 }
  0xf9   : > { %v984_v27 = vpop.eup %983  ;;  %693 = vst.msk [vmem:[%s1175_s8 + $0x80] sm:$0xff] %vm676_vm2, %v660_v17  ;;  %v663_v28 = vmul.f32 0.5, %v631_v18  ;;  %v629_v29 = vadd.f32 1.0, %v982_v23  ;;  %1009 = vtanh.f32 %v561_v19  ;;  %v553_v30 = vadd.f32 %v1151_v22, %v552_v21  ;;  %v892_v31 = vpop.f32.mrf.mxu0 }
  0xfa   : > { %v908_v32 = vpop.f32.mrf.mxu1  ;;  %v986_v33 = vpop.eup %985  ;;  %680 = vst.msk [vmem:[%s1175_s8 + $0x18] sm:$0xff] %vm676_vm2, %v647_v24  ;;  %v645_v34 = vmul.f32 0.5, %v613_v25  ;;  %v618_v35 = vadd.f32 1.0, %v984_v27  ;;  %1011 = vtanh.f32 %v489_v26  ;;  %v510_v36 = vadd.f32 %v892_v31, %v1151_v22 }
  0xfb   : > { %v988_v37 = vpop.eup %987  ;;  %696 = vst.msk [vmem:[%s1175_s8 + $0x98] sm:$0xff] %vm676_vm2, %v663_v28  ;;  %v661_v38 = vmul.f32 0.5, %v629_v29  ;;  %v634_v39 = vadd.f32 1.0, %v986_v33  ;;  %1013 = vtanh.f32 %v553_v30  ;;  %v574_v40 = vadd.f32 %v908_v32, %v1151_v22  ;;  %v501_v41 = vpop.f32.mrf.mxu0 }
  0xfc   : > { %v565_v42 = vpop.f32.mrf.mxu1  ;;  %v990_v43 = vpop.eup %989  ;;  %678 = vst.msk [vmem:[%s1175_s8 + $0x8] sm:$0xff] %vm676_vm2, %v645_v34  ;;  %v650_v44 = vmul.f32 0.5, %v618_v35  ;;  %v616_v45 = vadd.f32 1.0, %v988_v37  ;;  %1015 = vtanh.f32 %v510_v36  ;;  %v502_v46 = vadd.f32 %v1151_v22, %v501_v41 }
  0xfd   : > { %v992_v47 = vpop.eup %991  ;;  %694 = vst.msk [vmem:[%s1175_s8 + $0x88] sm:$0xff] %vm676_vm2, %v661_v38  ;;  %v666_v48 = vmul.f32 0.5, %v634_v39  ;;  %v632_v49 = vadd.f32 1.0, %v990_v43  ;;  %1017 = vtanh.f32 %v574_v40  ;;  %v566_v50 = vadd.f32 %v1151_v22, %v565_v42  ;;  %v893_v51 = vpop.f32.mrf.mxu0 }
  0xfe   : > { %v909_v52 = vpop.f32.mrf.mxu1  ;;  %v994_v53 = vpop.eup %993  ;;  %683 = vst.msk [vmem:[%s1175_s8 + $0x30] sm:$0xff] %vm676_vm2, %v650_v44  ;;  %v648_v54 = vmul.f32 0.5, %v616_v45  ;;  %v619_v55 = vadd.f32 1.0, %v992_v47  ;;  %1019 = vtanh.f32 %v502_v46  ;;  %v513_v56 = vadd.f32 %v893_v51, %v1151_v22 }
  0xff   : > { %v996_v57 = vpop.eup %995  ;;  %699 = vst.msk [vmem:[%s1175_s8 + $0xb0] sm:$0xff] %vm676_vm2, %v666_v48  ;;  %v664_v58 = vmul.f32 0.5, %v632_v49  ;;  %v635_v59 = vadd.f32 1.0, %v994_v53  ;;  %1021 = vtanh.f32 %v566_v50  ;;  %v577_v60 = vadd.f32 %v909_v52, %v1151_v22  ;;  %v504_v61 = vpop.f32.mrf.mxu0 }
 0x100   : > { %v568_v62 = vpop.f32.mrf.mxu1  ;;  %v998_v63 = vpop.eup %997  ;;  %681 = vst.msk [vmem:[%s1175_s8 + $0x20] sm:$0xff] %vm676_vm2, %v648_v54  ;;  %v651_v0 = vmul.f32 0.5, %v619_v55  ;;  %v617_v1 = vadd.f32 1.0, %v996_v57  ;;  %1023 = vtanh.f32 %v513_v56  ;;  %v505_v2 = vadd.f32 %v1151_v22, %v504_v61 }
 0x101   : > { %v1000_v3 = vpop.eup %999  ;;  %697 = vst.msk [vmem:[%s1175_s8 + $0xa0] sm:$0xff] %vm676_vm2, %v664_v58  ;;  %v667_v4 = vmul.f32 0.5, %v635_v59  ;;  %v633_v5 = vadd.f32 1.0, %v998_v63  ;;  %1025 = vtanh.f32 %v577_v60  ;;  %v569_v6 = vadd.f32 %v1151_v22, %v568_v62 }
 0x102   : > { %v1002_v7 = vpop.eup %1001  ;;  %684 = vst.msk [vmem:[%s1175_s8 + $0x38] sm:$0xff] %vm676_vm2, %v651_v0  ;;  %v649_v8 = vmul.f32 0.5, %v617_v1  ;;  %v622_v9 = vadd.f32 1.0, %v1000_v3  ;;  %1027 = vtanh.f32 %v505_v2 }
 0x103   : > { %v1004_v10 = vpop.eup %1003  ;;  %700 = vst.msk [vmem:[%s1175_s8 + $0xb8] sm:$0xff] %vm676_vm2, %v667_v4  ;;  %v665_v11 = vmul.f32 0.5, %v633_v5  ;;  %v638_v12 = vadd.f32 1.0, %v1002_v7  ;;  %1029 = vtanh.f32 %v569_v6 }
 0x104   : > { %v1006_v13 = vpop.eup %1005  ;;  %682 = vst.msk [vmem:[%s1175_s8 + $0x28] sm:$0xff] %vm676_vm2, %v649_v8  ;;  %v654_v22 = vmul.f32 0.5, %v622_v9  ;;  %v620_v14 = vadd.f32 1.0, %v1004_v10 }
 0x105   : > { %v1008_v15 = vpop.eup %1007  ;;  %698 = vst.msk [vmem:[%s1175_s8 + $0xa8] sm:$0xff] %vm676_vm2, %v665_v11  ;;  %v670_v16 = vmul.f32 0.5, %v638_v12  ;;  %v636_v17 = vadd.f32 1.0, %v1006_v13 }
 0x106   : > { %v1010_v18 = vpop.eup %1009  ;;  %687 = vst.msk [vmem:[%s1175_s8 + $0x50] sm:$0xff] %vm676_vm2, %v654_v22  ;;  %v652_v19 = vmul.f32 0.5, %v620_v14  ;;  %v623_v20 = vadd.f32 1.0, %v1008_v15 }
 0x107   : > { %v1012_v21 = vpop.eup %1011  ;;  %703 = vst.msk [vmem:[%s1175_s8 + $0xd0] sm:$0xff] %vm676_vm2, %v670_v16  ;;  %v668_v23 = vmul.f32 0.5, %v636_v17  ;;  %v639_v24 = vadd.f32 1.0, %v1010_v18 }
 0x108   : > { %v1014_v25 = vpop.eup %1013  ;;  %685 = vst.msk [vmem:[%s1175_s8 + $0x40] sm:$0xff] %vm676_vm2, %v652_v19  ;;  %v655_v26 = vmul.f32 0.5, %v623_v20  ;;  %v621_v27 = vadd.f32 1.0, %v1012_v21 }
 0x109   : > { %v1016_v28 = vpop.eup %1015  ;;  %701 = vst.msk [vmem:[%s1175_s8 + $0xc0] sm:$0xff] %vm676_vm2, %v668_v23  ;;  %v671_v29 = vmul.f32 0.5, %v639_v24  ;;  %v637_v30 = vadd.f32 1.0, %v1014_v25 }
 0x10a   : > { %v1018_v31 = vpop.eup %1017  ;;  %688 = vst.msk [vmem:[%s1175_s8 + $0x58] sm:$0xff] %vm676_vm2, %v655_v26  ;;  %v653_v32 = vmul.f32 0.5, %v621_v27  ;;  %v626_v33 = vadd.f32 1.0, %v1016_v28 }
 0x10b   : > { %v1020_v34 = vpop.eup %1019  ;;  %704 = vst.msk [vmem:[%s1175_s8 + $0xd8] sm:$0xff] %vm676_vm2, %v671_v29  ;;  %v669_v35 = vmul.f32 0.5, %v637_v30  ;;  %v642_v36 = vadd.f32 1.0, %v1018_v31 }
 0x10c   : > { %v1022_v37 = vpop.eup %1021  ;;  %686 = vst.msk [vmem:[%s1175_s8 + $0x48] sm:$0xff] %vm676_vm2, %v653_v32  ;;  %v658_v38 = vmul.f32 0.5, %v626_v33  ;;  %v624_v39 = vadd.f32 1.0, %v1020_v34 }
 0x10d   : > { %v1024_v40 = vpop.eup %1023  ;;  %702 = vst.msk [vmem:[%s1175_s8 + $0xc8] sm:$0xff] %vm676_vm2, %v669_v35  ;;  %v674_v41 = vmul.f32 0.5, %v642_v36  ;;  %v640_v42 = vadd.f32 1.0, %v1022_v37 }
 0x10e   : > { %v1026_v43 = vpop.eup %1025  ;;  %691 = vst.msk [vmem:[%s1175_s8 + $0x70] sm:$0xff] %vm676_vm2, %v658_v38  ;;  %v656_v44 = vmul.f32 0.5, %v624_v39  ;;  %v627_v45 = vadd.f32 1.0, %v1024_v40 }
 0x10f   : > { %v1028_v46 = vpop.eup %1027  ;;  %707 = vst.msk [vmem:[%s1175_s8 + $0xf0] sm:$0xff] %vm676_vm2, %v674_v41  ;;  %v672_v47 = vmul.f32 0.5, %v640_v42  ;;  %v643_v48 = vadd.f32 1.0, %v1026_v43 }
 0x110   : > { %v1030_v49 = vpop.eup %1029  ;;  %689 = vst.msk [vmem:[%s1175_s8 + $0x60] sm:$0xff] %vm676_vm2, %v656_v44  ;;  %v659_v50 = vmul.f32 0.5, %v627_v45  ;;  %v625_v51 = vadd.f32 1.0, %v1028_v46 }
 0x111   : > { %705 = vst.msk [vmem:[%s1175_s8 + $0xe0] sm:$0xff] %vm676_vm2, %v672_v47  ;;  %v675_v52 = vmul.f32 0.5, %v643_v48  ;;  %v641_v53 = vadd.f32 1.0, %v1030_v49 }
 0x112   : > { %692 = vst.msk [vmem:[%s1175_s8 + $0x78] sm:$0xff] %vm676_vm2, %v659_v50  ;;  %v657_v54 = vmul.f32 0.5, %v625_v51 }
 0x113   : > { %708 = vst.msk [vmem:[%s1175_s8 + $0xf8] sm:$0xff] %vm676_vm2, %v675_v52  ;;  %v673_v55 = vmul.f32 0.5, %v641_v53 }
 0x114   : > { %690 = vst.msk [vmem:[%s1175_s8 + $0x68] sm:$0xff] %vm676_vm2, %v657_v54 }
 0x115   : > { %706 = vst.msk [vmem:[%s1175_s8 + $0xe8] sm:$0xff] %vm676_vm2, %v673_v55 }
 0x116 PF: > { %s13_s14 = sadd.s32 1, %s1053_s14   ;;  %s1268_s12 = smov %s1049_s13 }
 0x117   : > { %p10_p5 = scmp.ge.s32.totalorder %s13_s14, 4   ;;  %s1269_s13 = smov %s1271_s15 }
 0x119   :  { %12 = sbr.rel (!%p10_p5) target bundleno = 2 (0x2), region = 62 }

</bundles_post_ra>
